<compile_context>
chip_gen: v7x
topology: tpu7x:2x2x1
jax: 0.10.0
libtpu: 0.0.40
codegen_flags: <defaults>
</compile_context>

<pallas_src>
import functools

import jax
import jax.numpy as jnp
from jax.experimental import pallas as pl
from jax.experimental.pallas import tpu as pltpu

LANE = 128


def vqvae_kernel(
    x_ref,              # (TB, Dp)  bf16
    w1_ref, b1_ref,     # (Dp, Hp) bf16, (1, Hp) f32
    w2_ref, b2_ref,     # (Hp, Ep) bf16, (1, Ep) f32
    emb_ref, e2_ref,    # (Kp, Ep) f32,  (1, Kp) f32   (padded rows carry e2=+1e30)
    w3_ref, b3_ref,     # (Ep, Hp) bf16, (1, Hp) f32
    w4_ref, b4_ref,     # (Hp, Dp) bf16, (1, Dp) f32
    xhat_ref,           # (TB, Dp)   f32
    ze_ref,             # (TB, Ep)   f32
    zq_ref,             # (TB, Ep)   f32
    idx_ref,            # (TB, 128)  int32 (lane-broadcast of the code index)
):
    f32 = jnp.float32
    bf16 = jnp.bfloat16

    # ---- encoder: Linear -> ReLU -> Linear (bf16 MXU operands, f32 accumulate) ----
    h = jnp.dot(x_ref[...], w1_ref[...], preferred_element_type=f32) + b1_ref[...]
    h = jnp.maximum(h, 0.0)
    z_e = jnp.dot(h.astype(bf16), w2_ref[...], preferred_element_type=f32) + b2_ref[...]
    ze_ref[...] = z_e

    # ---- quantize (f32): argmin_k ||z_e - e_k||^2, then one-hot codebook gather ----
    emb = emb_ref[...]                                      # (Kp, Ep)
    tb = z_e.shape[0]
    kp = emb.shape[0]
    z2 = jnp.sum(z_e * z_e, axis=1, keepdims=True)          # (TB, 1)
    cross = jax.lax.dot_general(                            # z_e @ emb.T  -> (TB, Kp)
        z_e, emb, (((1,), (1,)), ((), ())), preferred_element_type=f32)
    # Squared distance (may be slightly negative from cancellation -- harmless for
    # argmin).  Padded codebook rows carry e2 = +1e30 so they never win.
    d2 = z2 + e2_ref[...] - 2.0 * cross                     # (TB, Kp)

    col = jax.lax.broadcasted_iota(jnp.int32, (tb, kp), 1)
    d_min = jnp.min(d2, axis=1, keepdims=True)
    # first-occurrence argmin (matches torch tie-breaking)
    idx = jnp.min(jnp.where(d2 <= d_min, col, kp), axis=1, keepdims=True)
    idx = idx.astype(jnp.int32)                             # (TB, 1)
    idx_ref[...] = jnp.broadcast_to(idx, idx_ref.shape)     # lane-dense store

    onehot = (col == idx).astype(f32)                       # (TB, Kp)
    z_q = jnp.dot(onehot, emb, preferred_element_type=f32)  # exact row gather on MXU
    zq_ref[...] = z_q

    # ---- decoder: Linear -> ReLU -> Linear ----
    h2 = jnp.dot(z_q.astype(bf16), w3_ref[...], preferred_element_type=f32) + b3_ref[...]
    h2 = jnp.maximum(h2, 0.0)
    xhat_ref[...] = (
        jnp.dot(h2.astype(bf16), w4_ref[...], preferred_element_type=f32) + b4_ref[...]
    )


def _round_up(n, m):
    return ((n + m - 1) // m) * m


def _pad2d(a, rows, cols, dtype=None):
    r, c = a.shape
    out = jnp.pad(a, ((0, rows - r), (0, cols - c)))
    return out.astype(dtype) if dtype is not None else out


def prepare_params(params):
    """One-time padding / casting of weights + codebook (hoisted out of the hot path)."""
    w1, b1, w2, b2, emb, w3, b3, w4, b4 = params
    d_in, h = w1.shape
    k, e = emb.shape
    dp, hp, ep, kp = (_round_up(v, LANE) for v in (d_in, h, e, k))

    e2 = jnp.sum(emb.astype(jnp.float32) ** 2, axis=1)               # (K,)
    e2 = jnp.concatenate([e2, jnp.full((kp - k,), 1e30, jnp.float32)])[None, :]  # (1, Kp)

    prepared = (
        _pad2d(w1, dp, hp, jnp.bfloat16), _pad2d(b1, 1, hp, jnp.float32),
        _pad2d(w2, hp, ep, jnp.bfloat16), _pad2d(b2, 1, ep, jnp.float32),
        _pad2d(emb, kp, ep, jnp.float32), e2,
        _pad2d(w3, ep, hp, jnp.bfloat16), _pad2d(b3, 1, hp, jnp.float32),
        _pad2d(w4, hp, dp, jnp.bfloat16), _pad2d(b4, 1, dp, jnp.float32),
    )
    dims = (d_in, h, e, k)
    return prepared, dims


@functools.partial(jax.jit, static_argnames=("dims", "tb", "single_buffer_consts"))
def vqvae_forward(x, prepared, dims, *, tb=128, single_buffer_consts=True):
    """Fused VQVAE forward.  x: (B, D_in) float32 -> (x_hat, z_e, z_q, indices)."""
    d_in, h, e, k = dims
    dp, hp = prepared[0].shape
    ep = prepared[2].shape[1]
    kp = prepared[4].shape[0]

    B = x.shape[0]
    tb = min(tb, B)
    if B % tb:
        raise ValueError(f"batch {B} must be divisible by tile {tb}")
    grid = (B // tb,)

    x_pad = _pad2d(x, B, dp, jnp.bfloat16)

    def const_spec(shape):
        # grid-invariant inputs: DMA'd once; single-buffer to halve their VMEM footprint
        if single_buffer_consts:
            return pl.BlockSpec(shape, lambda i: (0, 0), pipeline_mode=pl.Buffered(1))
        return pl.BlockSpec(shape, lambda i: (0, 0))

    batch_spec = lambda feat: pl.BlockSpec((tb, feat), lambda i: (i, 0))

    out_shapes = (
        jax.ShapeDtypeStruct((B, dp), jnp.float32),    # x_hat (padded)
        jax.ShapeDtypeStruct((B, ep), jnp.float32),    # z_e   (padded)
        jax.ShapeDtypeStruct((B, ep), jnp.float32),    # z_q   (padded)
        jax.ShapeDtypeStruct((B, LANE), jnp.int32),    # indices (lane-broadcast)
    )

    xhat_p, ze_p, zq_p, idx_p = pl.pallas_call(
        vqvae_kernel,
        out_shape=out_shapes,
        grid_spec=pl.GridSpec(
            grid=grid,
            in_specs=[
                batch_spec(dp),                               # x
                const_spec((dp, hp)), const_spec((1, hp)),    # w1, b1
                const_spec((hp, ep)), const_spec((1, ep)),    # w2, b2
                const_spec((kp, ep)), const_spec((1, kp)),    # emb, ||e||^2
                const_spec((ep, hp)), const_spec((1, hp)),    # w3, b3
                const_spec((hp, dp)), const_spec((1, dp)),    # w4, b4
            ],
            out_specs=(
                batch_spec(dp),
                batch_spec(ep),
                batch_spec(ep),
                batch_spec(LANE),
            ),
        ),
        compiler_params=pltpu.CompilerParams(
            dimension_semantics=("parallel",),
        ),
    )(x_pad, *prepared)

    # TODO(synk): for very large codebooks (K >~ 8k) block the codebook over K with a
    # running min/argmin so the (TB, K) distance tile fits v7x's 64 MiB VMEM.
    return xhat_p[:, :d_in], ze_p[:, :e], zq_p[:, :e], idx_p[:, 0]


def init_params(key, d_in, hidden, embed_dim, num_codes):
    ks = jax.random.split(key, 9)
    scale = 0.1
    w1 = scale * jax.random.normal(ks[0], (d_in, hidden), jnp.float32)
    b1 = scale * jax.random.normal(ks[1], (1, hidden), jnp.float32)
    w2 = scale * jax.random.normal(ks[2], (hidden, embed_dim), jnp.float32)
    b2 = scale * jax.random.normal(ks[3], (1, embed_dim), jnp.float32)
    # frozen, precomputed codebook (nn.Embedding.from_pretrained, freeze=True)
    emb = jax.random.normal(ks[4], (num_codes, embed_dim), jnp.float32)
    w3 = scale * jax.random.normal(ks[5], (embed_dim, hidden), jnp.float32)
    b3 = scale * jax.random.normal(ks[6], (1, hidden), jnp.float32)
    w4 = scale * jax.random.normal(ks[7], (hidden, d_in), jnp.float32)
    b4 = scale * jax.random.normal(ks[8], (1, d_in), jnp.float32)
    return (w1, b1, w2, b2, emb, w3, b3, w4, b4)


if __name__ == "__main__":
    # Small, module-consistent shapes: 256 tokens of dim 32, hidden 64,
    # embedding_dim 8, 32 codebook entries.
    B, D_in, H, E, K = 256, 32, 64, 8, 32

    key = jax.random.PRNGKey(0)
    k_x, k_p = jax.random.split(key)
    x = jax.random.normal(k_x, (B, D_in), jnp.float32)
    params = init_params(k_p, D_in, H, E, K)
    prepared, dims = prepare_params(params)

    try:
        outs = vqvae_forward(x, prepared, dims, tb=128, single_buffer_consts=True)
        outs = jax.block_until_ready(outs)
    except Exception:
        # Fallback if this JAX build rejects single-buffered (Buffered(1)) BlockSpecs.
        outs = vqvae_forward(x, prepared, dims, tb=128, single_buffer_consts=False)
        outs = jax.block_until_ready(outs)
    x_hat, z_e, z_q, idx = outs

    # ---- staged correctness checks (robust to bf16 matmul rounding, no tie flakes) ----
    w1, b1, w2, b2, emb, w3, b3, w4, b4 = params

    # 1) encoder (kernel: bf16 MXU operands, f32 accumulate) vs. f32 reference.
    z_e_ref = jnp.maximum(x @ w1 + b1, 0.0) @ w2 + b2
    assert jnp.allclose(z_e, z_e_ref, atol=5e-2), "z_e mismatch"

    # 2) quantization semantics (torch.cdist + argmin + embedding lookup),
    #    evaluated at the kernel's own z_e so the discrete argmin cannot flake.
    d2_ref = jnp.sum((z_e[:, None, :] - emb[None, :, :]) ** 2, axis=-1)   # (B, K), exact f32
    d2_at_idx = d2_ref[jnp.arange(B), idx]
    assert jnp.all(d2_at_idx <= jnp.min(d2_ref, axis=1) + 5e-3), "indices not nearest codes"
    assert jnp.allclose(z_q, emb[idx], atol=1e-5), "z_q != embedding[indices]"
    assert idx.dtype == jnp.int32 and idx.shape == (B,)

    # 3) decoder applied to the kernel's z_q (bf16 MXU) vs. f32 reference.
    x_hat_ref = jnp.maximum(z_q @ w3 + b3, 0.0) @ w4 + b4
    assert jnp.allclose(x_hat, x_hat_ref, atol=5e-2), "x_hat mismatch"

    print("KERNEL_OK")
</pallas_src>

<mosaic_0001>
module attributes {stable_mosaic.version = 11 : i64} {
  func.func @vqvae_kernel(%arg0: i32, %arg1: memref<128x128xbf16, #tpu.memory_space<vmem>>, %arg2: memref<128x128xbf16, #tpu.memory_space<vmem>>, %arg3: memref<1x128xf32, #tpu.memory_space<vmem>>, %arg4: memref<128x128xbf16, #tpu.memory_space<vmem>>, %arg5: memref<1x128xf32, #tpu.memory_space<vmem>>, %arg6: memref<128x128xf32, #tpu.memory_space<vmem>>, %arg7: memref<1x128xf32, #tpu.memory_space<vmem>>, %arg8: memref<128x128xbf16, #tpu.memory_space<vmem>>, %arg9: memref<1x128xf32, #tpu.memory_space<vmem>>, %arg10: memref<128x128xbf16, #tpu.memory_space<vmem>>, %arg11: memref<1x128xf32, #tpu.memory_space<vmem>>, %arg12: memref<128x128xf32, #tpu.memory_space<vmem>>, %arg13: memref<128x128xf32, #tpu.memory_space<vmem>>, %arg14: memref<128x128xf32, #tpu.memory_space<vmem>>, %arg15: memref<128x128xi32, #tpu.memory_space<vmem>>) attributes {dimension_semantics = [#tpu.dimension_semantics<parallel>], iteration_bounds = array<i64: 2>, scalar_prefetch = 0 : i64, scratch_operands = 0 : i64, tpu.core_type = #tpu.core_type<tc>, window_params = [{transform_indices = @transform_0, window_bounds = array<i64: 128, 128>}, {pipeline_mode = #tpu.pipeline_mode<synchronous>, transform_indices = @transform_1, window_bounds = array<i64: 128, 128>}, {pipeline_mode = #tpu.pipeline_mode<synchronous>, transform_indices = @transform_2, window_bounds = array<i64: 1, 128>}, {pipeline_mode = #tpu.pipeline_mode<synchronous>, transform_indices = @transform_3, window_bounds = array<i64: 128, 128>}, {pipeline_mode = #tpu.pipeline_mode<synchronous>, transform_indices = @transform_4, window_bounds = array<i64: 1, 128>}, {pipeline_mode = #tpu.pipeline_mode<synchronous>, transform_indices = @transform_5, window_bounds = array<i64: 128, 128>}, {pipeline_mode = #tpu.pipeline_mode<synchronous>, transform_indices = @transform_6, window_bounds = array<i64: 1, 128>}, {pipeline_mode = #tpu.pipeline_mode<synchronous>, transform_indices = @transform_7, window_bounds = array<i64: 128, 128>}, {pipeline_mode = #tpu.pipeline_mode<synchronous>, transform_indices = @transform_8, window_bounds = array<i64: 1, 128>}, {pipeline_mode = #tpu.pipeline_mode<synchronous>, transform_indices = @transform_9, window_bounds = array<i64: 128, 128>}, {pipeline_mode = #tpu.pipeline_mode<synchronous>, transform_indices = @transform_10, window_bounds = array<i64: 1, 128>}, {transform_indices = @transform_11, window_bounds = array<i64: 128, 128>}, {transform_indices = @transform_12, window_bounds = array<i64: 128, 128>}, {transform_indices = @transform_13, window_bounds = array<i64: 128, 128>}, {transform_indices = @transform_14, window_bounds = array<i64: 128, 128>}]} {
    %c0 = arith.constant 0 : index
    %c0_0 = arith.constant 0 : index
    %0 = vector.load %arg1[%c0, %c0_0] : memref<128x128xbf16, #tpu.memory_space<vmem>>, vector<128x128xbf16>
    %c0_1 = arith.constant 0 : index
    %c0_2 = arith.constant 0 : index
    %1 = vector.load %arg2[%c0_1, %c0_2] : memref<128x128xbf16, #tpu.memory_space<vmem>>, vector<128x128xbf16>
    %cst = arith.constant dense<0.000000e+00> : vector<128x128xf32>
    %2 = tpu.matmul %0, %1, %cst {dimension_numbers = #tpu.dot_dimension_numbers<[1], [0], [0], [1], [0, 0, 1, 1], [], []>} : vector<128x128xbf16>, vector<128x128xbf16>, vector<128x128xf32> -> vector<128x128xf32>
    %c0_3 = arith.constant 0 : index
    %c0_4 = arith.constant 0 : index
    %3 = vector.load %arg3[%c0_3, %c0_4] : memref<1x128xf32, #tpu.memory_space<vmem>>, vector<1x128xf32>
    %4 = vector.broadcast %3 : vector<1x128xf32> to vector<128x128xf32>
    %5 = arith.addf %2, %4 : vector<128x128xf32>
    %cst_5 = arith.constant 0.000000e+00 : f32
    %6 = vector.broadcast %cst_5 : f32 to vector<128x128xf32>
    %7 = arith.maximumf %5, %6 : vector<128x128xf32>
    %8 = arith.truncf %7 : vector<128x128xf32> to vector<128x128xbf16>
    %c0_6 = arith.constant 0 : index
    %c0_7 = arith.constant 0 : index
    %9 = vector.load %arg4[%c0_6, %c0_7] : memref<128x128xbf16, #tpu.memory_space<vmem>>, vector<128x128xbf16>
    %cst_8 = arith.constant dense<0.000000e+00> : vector<128x128xf32>
    %10 = tpu.matmul %8, %9, %cst_8 {dimension_numbers = #tpu.dot_dimension_numbers<[1], [0], [0], [1], [0, 0, 1, 1], [], []>} : vector<128x128xbf16>, vector<128x128xbf16>, vector<128x128xf32> -> vector<128x128xf32>
    %c0_9 = arith.constant 0 : index
    %c0_10 = arith.constant 0 : index
    %11 = vector.load %arg5[%c0_9, %c0_10] : memref<1x128xf32, #tpu.memory_space<vmem>>, vector<1x128xf32>
    %12 = vector.broadcast %11 : vector<1x128xf32> to vector<128x128xf32>
    %13 = arith.addf %10, %12 : vector<128x128xf32>
    %c0_11 = arith.constant 0 : index
    %c0_12 = arith.constant 0 : index
    %14 = vector.load %arg13[%c0_11, %c0_12] : memref<128x128xf32, #tpu.memory_space<vmem>>, vector<128x128xf32>
    tpu.vector_store %arg13[%c0_11, %c0_12], %13 {strides = array<i32>} : memref<128x128xf32, #tpu.memory_space<vmem>>, vector<128x128xf32>,
    %c0_13 = arith.constant 0 : index
    %c0_14 = arith.constant 0 : index
    %15 = vector.load %arg6[%c0_13, %c0_14] : memref<128x128xf32, #tpu.memory_space<vmem>>, vector<128x128xf32>
    %16 = arith.mulf %13, %13 : vector<128x128xf32>
    %cst_15 = arith.constant dense<0.000000e+00> : vector<128xf32>
    %17 = vector.multi_reduction <add>, %16, %cst_15 [1] : vector<128x128xf32> to vector<128xf32>
    %18 = vector.shape_cast %17 : vector<128xf32> to vector<128x1xf32>
    %cst_16 = arith.constant dense<0.000000e+00> : vector<128x128xf32>
    %19 = tpu.matmul %13, %15, %cst_16 {dimension_numbers = #tpu.dot_dimension_numbers<[1], [1], [0], [0], [0, 0, 1, 0], [], []>} : vector<128x128xf32>, vector<128x128xf32>, vector<128x128xf32> -> vector<128x128xf32>
    %c0_17 = arith.constant 0 : index
    %c0_18 = arith.constant 0 : index
    %20 = vector.load %arg7[%c0_17, %c0_18] : memref<1x128xf32, #tpu.memory_space<vmem>>, vector<1x128xf32>
    %21 = vector.broadcast %18 : vector<128x1xf32> to vector<128x128xf32>
    %22 = vector.broadcast %20 : vector<1x128xf32> to vector<128x128xf32>
    %23 = arith.addf %21, %22 : vector<128x128xf32>
    %cst_19 = arith.constant 2.000000e+00 : f32
    %24 = vector.broadcast %cst_19 : f32 to vector<128x128xf32>
    %25 = arith.mulf %24, %19 : vector<128x128xf32>
    %26 = arith.subf %23, %25 : vector<128x128xf32>
    %27 = tpu.iota {dimensions = array<i32: 1>} : vector<128x128xi32>
    %cst_20 = arith.constant dense<0x7F800000> : vector<128xf32>
    %28 = vector.multi_reduction <minimumf>, %26, %cst_20 [1] : vector<128x128xf32> to vector<128xf32>
    %29 = vector.shape_cast %28 : vector<128xf32> to vector<128x1xf32>
    %30 = vector.broadcast %29 : vector<128x1xf32> to vector<128x128xf32>
    %31 = arith.cmpf ole, %26, %30 : vector<128x128xf32>
    %c128_i32 = arith.constant 128 : i32
    %32 = vector.broadcast %c128_i32 : i32 to vector<128x128xi32>
    %33 = arith.select %31, %27, %32 : vector<128x128xi1>, vector<128x128xi32>
    %cst_21 = arith.constant dense<2147483647> : vector<128xi32>
    %34 = vector.multi_reduction <minsi>, %33, %cst_21 [1] : vector<128x128xi32> to vector<128xi32>
    %35 = vector.shape_cast %34 : vector<128xi32> to vector<128x1xi32>
    %36 = vector.shape_cast %35 : vector<128x1xi32> to vector<128x1xi32>
    %37 = vector.broadcast %36 : vector<128x1xi32> to vector<128x128xi32>
    %c0_22 = arith.constant 0 : index
    %c0_23 = arith.constant 0 : index
    %38 = vector.load %arg15[%c0_22, %c0_23] : memref<128x128xi32, #tpu.memory_space<vmem>>, vector<128x128xi32>
    tpu.vector_store %arg15[%c0_22, %c0_23], %37 {strides = array<i32>} : memref<128x128xi32, #tpu.memory_space<vmem>>, vector<128x128xi32>,
    %39 = vector.broadcast %35 : vector<128x1xi32> to vector<128x128xi32>
    %40 = arith.cmpi eq, %27, %39 : vector<128x128xi32>
    %41 = arith.extui %40 : vector<128x128xi1> to vector<128x128xi32>
    %42 = arith.sitofp %41 : vector<128x128xi32> to vector<128x128xf32>
    %cst_24 = arith.constant dense<0.000000e+00> : vector<128x128xf32>
    %43 = tpu.matmul %42, %15, %cst_24 {dimension_numbers = #tpu.dot_dimension_numbers<[1], [0], [0], [1], [0, 0, 1, 1], [], []>} : vector<128x128xf32>, vector<128x128xf32>, vector<128x128xf32> -> vector<128x128xf32>
    %c0_25 = arith.constant 0 : index
    %c0_26 = arith.constant 0 : index
    %44 = vector.load %arg14[%c0_25, %c0_26] : memref<128x128xf32, #tpu.memory_space<vmem>>, vector<128x128xf32>
    tpu.vector_store %arg14[%c0_25, %c0_26], %43 {strides = array<i32>} : memref<128x128xf32, #tpu.memory_space<vmem>>, vector<128x128xf32>,
    %45 = arith.truncf %43 : vector<128x128xf32> to vector<128x128xbf16>
    %c0_27 = arith.constant 0 : index
    %c0_28 = arith.constant 0 : index
    %46 = vector.load %arg8[%c0_27, %c0_28] : memref<128x128xbf16, #tpu.memory_space<vmem>>, vector<128x128xbf16>
    %cst_29 = arith.constant dense<0.000000e+00> : vector<128x128xf32>
    %47 = tpu.matmul %45, %46, %cst_29 {dimension_numbers = #tpu.dot_dimension_numbers<[1], [0], [0], [1], [0, 0, 1, 1], [], []>} : vector<128x128xbf16>, vector<128x128xbf16>, vector<128x128xf32> -> vector<128x128xf32>
    %c0_30 = arith.constant 0 : index
    %c0_31 = arith.constant 0 : index
    %48 = vector.load %arg9[%c0_30, %c0_31] : memref<1x128xf32, #tpu.memory_space<vmem>>, vector<1x128xf32>
    %49 = vector.broadcast %48 : vector<1x128xf32> to vector<128x128xf32>
    %50 = arith.addf %47, %49 : vector<128x128xf32>
    %cst_32 = arith.constant 0.000000e+00 : f32
    %51 = vector.broadcast %cst_32 : f32 to vector<128x128xf32>
    %52 = arith.maximumf %50, %51 : vector<128x128xf32>
    %53 = arith.truncf %52 : vector<128x128xf32> to vector<128x128xbf16>
    %c0_33 = arith.constant 0 : index
    %c0_34 = arith.constant 0 : index
    %54 = vector.load %arg10[%c0_33, %c0_34] : memref<128x128xbf16, #tpu.memory_space<vmem>>, vector<128x128xbf16>
    %cst_35 = arith.constant dense<0.000000e+00> : vector<128x128xf32>
    %55 = tpu.matmul %53, %54, %cst_35 {dimension_numbers = #tpu.dot_dimension_numbers<[1], [0], [0], [1], [0, 0, 1, 1], [], []>} : vector<128x128xbf16>, vector<128x128xbf16>, vector<128x128xf32> -> vector<128x128xf32>
    %c0_36 = arith.constant 0 : index
    %c0_37 = arith.constant 0 : index
    %56 = vector.load %arg11[%c0_36, %c0_37] : memref<1x128xf32, #tpu.memory_space<vmem>>, vector<1x128xf32>
    %57 = vector.broadcast %56 : vector<1x128xf32> to vector<128x128xf32>
    %58 = arith.addf %55, %57 : vector<128x128xf32>
    %c0_38 = arith.constant 0 : index
    %c0_39 = arith.constant 0 : index
    %59 = vector.load %arg12[%c0_38, %c0_39] : memref<128x128xf32, #tpu.memory_space<vmem>>, vector<128x128xf32>
    tpu.vector_store %arg12[%c0_38, %c0_39], %58 {strides = array<i32>} : memref<128x128xf32, #tpu.memory_space<vmem>>, vector<128x128xf32>,
    return
  }
  func.func @transform_0(%arg0: i32) -> (i32, i32) {
    %c0_i32 = arith.constant 0 : i32
    %c0_i32_0 = arith.constant 0 : i32
    return %arg0, %c0_i32 : i32, i32
  }
  func.func @transform_1(%arg0: i32) -> (i32, i32) {
    %c0_i32 = arith.constant 0 : i32
    %c0_i32_0 = arith.constant 0 : i32
    %c0_i32_1 = arith.constant 0 : i32
    return %c0_i32, %c0_i32_0 : i32, i32
  }
  func.func @transform_2(%arg0: i32) -> (i32, i32) {
    %c0_i32 = arith.constant 0 : i32
    %c0_i32_0 = arith.constant 0 : i32
    %c0_i32_1 = arith.constant 0 : i32
    return %c0_i32, %c0_i32_0 : i32, i32
  }
  func.func @transform_3(%arg0: i32) -> (i32, i32) {
    %c0_i32 = arith.constant 0 : i32
    %c0_i32_0 = arith.constant 0 : i32
    %c0_i32_1 = arith.constant 0 : i32
    return %c0_i32, %c0_i32_0 : i32, i32
  }
  func.func @transform_4(%arg0: i32) -> (i32, i32) {
    %c0_i32 = arith.constant 0 : i32
    %c0_i32_0 = arith.constant 0 : i32
    %c0_i32_1 = arith.constant 0 : i32
    return %c0_i32, %c0_i32_0 : i32, i32
  }
  func.func @transform_5(%arg0: i32) -> (i32, i32) {
    %c0_i32 = arith.constant 0 : i32
    %c0_i32_0 = arith.constant 0 : i32
    %c0_i32_1 = arith.constant 0 : i32
    return %c0_i32, %c0_i32_0 : i32, i32
  }
  func.func @transform_6(%arg0: i32) -> (i32, i32) {
    %c0_i32 = arith.constant 0 : i32
    %c0_i32_0 = arith.constant 0 : i32
    %c0_i32_1 = arith.constant 0 : i32
    return %c0_i32, %c0_i32_0 : i32, i32
  }
  func.func @transform_7(%arg0: i32) -> (i32, i32) {
    %c0_i32 = arith.constant 0 : i32
    %c0_i32_0 = arith.constant 0 : i32
    %c0_i32_1 = arith.constant 0 : i32
    return %c0_i32, %c0_i32_0 : i32, i32
  }
  func.func @transform_8(%arg0: i32) -> (i32, i32) {
    %c0_i32 = arith.constant 0 : i32
    %c0_i32_0 = arith.constant 0 : i32
    %c0_i32_1 = arith.constant 0 : i32
    return %c0_i32, %c0_i32_0 : i32, i32
  }
  func.func @transform_9(%arg0: i32) -> (i32, i32) {
    %c0_i32 = arith.constant 0 : i32
    %c0_i32_0 = arith.constant 0 : i32
    %c0_i32_1 = arith.constant 0 : i32
    return %c0_i32, %c0_i32_0 : i32, i32
  }
  func.func @transform_10(%arg0: i32) -> (i32, i32) {
    %c0_i32 = arith.constant 0 : i32
    %c0_i32_0 = arith.constant 0 : i32
    %c0_i32_1 = arith.constant 0 : i32
    return %c0_i32, %c0_i32_0 : i32, i32
  }
  func.func @transform_11(%arg0: i32) -> (i32, i32) {
    %c0_i32 = arith.constant 0 : i32
    %c0_i32_0 = arith.constant 0 : i32
    return %arg0, %c0_i32 : i32, i32
  }
  func.func @transform_12(%arg0: i32) -> (i32, i32) {
    %c0_i32 = arith.constant 0 : i32
    %c0_i32_0 = arith.constant 0 : i32
    return %arg0, %c0_i32 : i32, i32
  }
  func.func @transform_13(%arg0: i32) -> (i32, i32) {
    %c0_i32 = arith.constant 0 : i32
    %c0_i32_0 = arith.constant 0 : i32
    return %arg0, %c0_i32 : i32, i32
  }
  func.func @transform_14(%arg0: i32) -> (i32, i32) {
    %c0_i32 = arith.constant 0 : i32
    %c0_i32_0 = arith.constant 0 : i32
    return %arg0, %c0_i32 : i32, i32
  }
}

module attributes {stable_mosaic.version = 11 : i64} {
  func.func @vqvae_kernel(%arg0: i32, %arg1: memref<128x128xbf16, #tpu.memory_space<vmem>>, %arg2: memref<128x128xbf16, #tpu.memory_space<vmem>>, %arg3: memref<1x128xf32, #tpu.memory_space<vmem>>, %arg4: memref<128x128xbf16, #tpu.memory_space<vmem>>, %arg5: memref<1x128xf32, #tpu.memory_space<vmem>>, %arg6: memref<128x128xf32, #tpu.memory_space<vmem>>, %arg7: memref<1x128xf32, #tpu.memory_space<vmem>>, %arg8: memref<128x128xbf16, #tpu.memory_space<vmem>>, %arg9: memref<1x128xf32, #tpu.memory_space<vmem>>, %arg10: memref<128x128xbf16, #tpu.memory_space<vmem>>, %arg11: memref<1x128xf32, #tpu.memory_space<vmem>>, %arg12: memref<128x128xf32, #tpu.memory_space<vmem>>, %arg13: memref<128x128xf32, #tpu.memory_space<vmem>>, %arg14: memref<128x128xf32, #tpu.memory_space<vmem>>, %arg15: memref<128x128xi32, #tpu.memory_space<vmem>>) attributes {dimension_semantics = [#tpu.dimension_semantics<parallel>], iteration_bounds = array<i64: 2>, scalar_prefetch = 0 : i64, scratch_operands = 0 : i64, tpu.core_type = #tpu.core_type<tc>, window_params = [{transform_indices = @transform_0, window_bounds = array<i64: 128, 128>}, {pipeline_mode = #tpu.pipeline_mode<synchronous>, transform_indices = @transform_1, window_bounds = array<i64: 128, 128>}, {pipeline_mode = #tpu.pipeline_mode<synchronous>, transform_indices = @transform_2, window_bounds = array<i64: 1, 128>}, {pipeline_mode = #tpu.pipeline_mode<synchronous>, transform_indices = @transform_3, window_bounds = array<i64: 128, 128>}, {pipeline_mode = #tpu.pipeline_mode<synchronous>, transform_indices = @transform_4, window_bounds = array<i64: 1, 128>}, {pipeline_mode = #tpu.pipeline_mode<synchronous>, transform_indices = @transform_5, window_bounds = array<i64: 128, 128>}, {pipeline_mode = #tpu.pipeline_mode<synchronous>, transform_indices = @transform_6, window_bounds = array<i64: 1, 128>}, {pipeline_mode = #tpu.pipeline_mode<synchronous>, transform_indices = @transform_7, window_bounds = array<i64: 128, 128>}, {pipeline_mode = #tpu.pipeline_mode<synchronous>, transform_indices = @transform_8, window_bounds = array<i64: 1, 128>}, {pipeline_mode = #tpu.pipeline_mode<synchronous>, transform_indices = @transform_9, window_bounds = array<i64: 128, 128>}, {pipeline_mode = #tpu.pipeline_mode<synchronous>, transform_indices = @transform_10, window_bounds = array<i64: 1, 128>}, {transform_indices = @transform_11, window_bounds = array<i64: 128, 128>}, {transform_indices = @transform_12, window_bounds = array<i64: 128, 128>}, {transform_indices = @transform_13, window_bounds = array<i64: 128, 128>}, {transform_indices = @transform_14, window_bounds = array<i64: 128, 128>}]} {
    %c0 = arith.constant 0 : index
    %c0_0 = arith.constant 0 : index
    %0 = vector.load %arg1[%c0, %c0_0] : memref<128x128xbf16, #tpu.memory_space<vmem>>, vector<128x128xbf16>
    %c0_1 = arith.constant 0 : index
    %c0_2 = arith.constant 0 : index
    %1 = vector.load %arg2[%c0_1, %c0_2] : memref<128x128xbf16, #tpu.memory_space<vmem>>, vector<128x128xbf16>
    %cst = arith.constant dense<0.000000e+00> : vector<128x128xf32>
    %2 = tpu.matmul %0, %1, %cst {dimension_numbers = #tpu.dot_dimension_numbers<[1], [0], [0], [1], [0, 0, 1, 1], [], []>} : vector<128x128xbf16>, vector<128x128xbf16>, vector<128x128xf32> -> vector<128x128xf32>
    %c0_3 = arith.constant 0 : index
    %c0_4 = arith.constant 0 : index
    %3 = vector.load %arg3[%c0_3, %c0_4] : memref<1x128xf32, #tpu.memory_space<vmem>>, vector<1x128xf32>
    %4 = vector.broadcast %3 : vector<1x128xf32> to vector<128x128xf32>
    %5 = arith.addf %2, %4 : vector<128x128xf32>
    %cst_5 = arith.constant 0.000000e+00 : f32
    %6 = vector.broadcast %cst_5 : f32 to vector<128x128xf32>
    %7 = arith.maximumf %5, %6 : vector<128x128xf32>
    %8 = arith.truncf %7 : vector<128x128xf32> to vector<128x128xbf16>
    %c0_6 = arith.constant 0 : index
    %c0_7 = arith.constant 0 : index
    %9 = vector.load %arg4[%c0_6, %c0_7] : memref<128x128xbf16, #tpu.memory_space<vmem>>, vector<128x128xbf16>
    %cst_8 = arith.constant dense<0.000000e+00> : vector<128x128xf32>
    %10 = tpu.matmul %8, %9, %cst_8 {dimension_numbers = #tpu.dot_dimension_numbers<[1], [0], [0], [1], [0, 0, 1, 1], [], []>} : vector<128x128xbf16>, vector<128x128xbf16>, vector<128x128xf32> -> vector<128x128xf32>
    %c0_9 = arith.constant 0 : index
    %c0_10 = arith.constant 0 : index
    %11 = vector.load %arg5[%c0_9, %c0_10] : memref<1x128xf32, #tpu.memory_space<vmem>>, vector<1x128xf32>
    %12 = vector.broadcast %11 : vector<1x128xf32> to vector<128x128xf32>
    %13 = arith.addf %10, %12 : vector<128x128xf32>
    %c0_11 = arith.constant 0 : index
    %c0_12 = arith.constant 0 : index
    %14 = vector.load %arg13[%c0_11, %c0_12] : memref<128x128xf32, #tpu.memory_space<vmem>>, vector<128x128xf32>
    tpu.vector_store %arg13[%c0_11, %c0_12], %13 {strides = array<i32>} : memref<128x128xf32, #tpu.memory_space<vmem>>, vector<128x128xf32>,
    %c0_13 = arith.constant 0 : index
    %c0_14 = arith.constant 0 : index
    %15 = vector.load %arg6[%c0_13, %c0_14] : memref<128x128xf32, #tpu.memory_space<vmem>>, vector<128x128xf32>
    %16 = arith.mulf %13, %13 : vector<128x128xf32>
    %cst_15 = arith.constant dense<0.000000e+00> : vector<128xf32>
    %17 = vector.multi_reduction <add>, %16, %cst_15 [1] : vector<128x128xf32> to vector<128xf32>
    %18 = vector.shape_cast %17 : vector<128xf32> to vector<128x1xf32>
    %cst_16 = arith.constant dense<0.000000e+00> : vector<128x128xf32>
    %19 = tpu.matmul %13, %15, %cst_16 {dimension_numbers = #tpu.dot_dimension_numbers<[1], [1], [0], [0], [0, 0, 1, 0], [], []>} : vector<128x128xf32>, vector<128x128xf32>, vector<128x128xf32> -> vector<128x128xf32>
    %c0_17 = arith.constant 0 : index
    %c0_18 = arith.constant 0 : index
    %20 = vector.load %arg7[%c0_17, %c0_18] : memref<1x128xf32, #tpu.memory_space<vmem>>, vector<1x128xf32>
    %21 = vector.broadcast %18 : vector<128x1xf32> to vector<128x128xf32>
    %22 = vector.broadcast %20 : vector<1x128xf32> to vector<128x128xf32>
    %23 = arith.addf %21, %22 : vector<128x128xf32>
    %cst_19 = arith.constant 2.000000e+00 : f32
    %24 = vector.broadcast %cst_19 : f32 to vector<128x128xf32>
    %25 = arith.mulf %24, %19 : vector<128x128xf32>
    %26 = arith.subf %23, %25 : vector<128x128xf32>
    %27 = tpu.iota {dimensions = array<i32: 1>} : vector<128x128xi32>
    %cst_20 = arith.constant dense<0x7F800000> : vector<128xf32>
    %28 = vector.multi_reduction <minimumf>, %26, %cst_20 [1] : vector<128x128xf32> to vector<128xf32>
    %29 = vector.shape_cast %28 : vector<128xf32> to vector<128x1xf32>
    %30 = vector.broadcast %29 : vector<128x1xf32> to vector<128x128xf32>
    %31 = arith.cmpf ole, %26, %30 : vector<128x128xf32>
    %c128_i32 = arith.constant 128 : i32
    %32 = vector.broadcast %c128_i32 : i32 to vector<128x128xi32>
    %33 = arith.select %31, %27, %32 : vector<128x128xi1>, vector<128x128xi32>
    %cst_21 = arith.constant dense<2147483647> : vector<128xi32>
    %34 = vector.multi_reduction <minsi>, %33, %cst_21 [1] : vector<128x128xi32> to vector<128xi32>
    %35 = vector.shape_cast %34 : vector<128xi32> to vector<128x1xi32>
    %36 = vector.shape_cast %35 : vector<128x1xi32> to vector<128x1xi32>
    %37 = vector.broadcast %36 : vector<128x1xi32> to vector<128x128xi32>
    %c0_22 = arith.constant 0 : index
    %c0_23 = arith.constant 0 : index
    %38 = vector.load %arg15[%c0_22, %c0_23] : memref<128x128xi32, #tpu.memory_space<vmem>>, vector<128x128xi32>
    tpu.vector_store %arg15[%c0_22, %c0_23], %37 {strides = array<i32>} : memref<128x128xi32, #tpu.memory_space<vmem>>, vector<128x128xi32>,
    %39 = vector.broadcast %35 : vector<128x1xi32> to vector<128x128xi32>
    %40 = arith.cmpi eq, %27, %39 : vector<128x128xi32>
    %41 = arith.extui %40 : vector<128x128xi1> to vector<128x128xi32>
    %42 = arith.sitofp %41 : vector<128x128xi32> to vector<128x128xf32>
    %cst_24 = arith.constant dense<0.000000e+00> : vector<128x128xf32>
    %43 = tpu.matmul %42, %15, %cst_24 {dimension_numbers = #tpu.dot_dimension_numbers<[1], [0], [0], [1], [0, 0, 1, 1], [], []>} : vector<128x128xf32>, vector<128x128xf32>, vector<128x128xf32> -> vector<128x128xf32>
    %c0_25 = arith.constant 0 : index
    %c0_26 = arith.constant 0 : index
    %44 = vector.load %arg14[%c0_25, %c0_26] : memref<128x128xf32, #tpu.memory_space<vmem>>, vector<128x128xf32>
    tpu.vector_store %arg14[%c0_25, %c0_26], %43 {strides = array<i32>} : memref<128x128xf32, #tpu.memory_space<vmem>>, vector<128x128xf32>,
    %45 = arith.truncf %43 : vector<128x128xf32> to vector<128x128xbf16>
    %c0_27 = arith.constant 0 : index
    %c0_28 = arith.constant 0 : index
    %46 = vector.load %arg8[%c0_27, %c0_28] : memref<128x128xbf16, #tpu.memory_space<vmem>>, vector<128x128xbf16>
    %cst_29 = arith.constant dense<0.000000e+00> : vector<128x128xf32>
    %47 = tpu.matmul %45, %46, %cst_29 {dimension_numbers = #tpu.dot_dimension_numbers<[1], [0], [0], [1], [0, 0, 1, 1], [], []>} : vector<128x128xbf16>, vector<128x128xbf16>, vector<128x128xf32> -> vector<128x128xf32>
    %c0_30 = arith.constant 0 : index
    %c0_31 = arith.constant 0 : index
    %48 = vector.load %arg9[%c0_30, %c0_31] : memref<1x128xf32, #tpu.memory_space<vmem>>, vector<1x128xf32>
    %49 = vector.broadcast %48 : vector<1x128xf32> to vector<128x128xf32>
    %50 = arith.addf %47, %49 : vector<128x128xf32>
    %cst_32 = arith.constant 0.000000e+00 : f32
    %51 = vector.broadcast %cst_32 : f32 to vector<128x128xf32>
    %52 = arith.maximumf %50, %51 : vector<128x128xf32>
    %53 = arith.truncf %52 : vector<128x128xf32> to vector<128x128xbf16>
    %c0_33 = arith.constant 0 : index
    %c0_34 = arith.constant 0 : index
    %54 = vector.load %arg10[%c0_33, %c0_34] : memref<128x128xbf16, #tpu.memory_space<vmem>>, vector<128x128xbf16>
    %cst_35 = arith.constant dense<0.000000e+00> : vector<128x128xf32>
    %55 = tpu.matmul %53, %54, %cst_35 {dimension_numbers = #tpu.dot_dimension_numbers<[1], [0], [0], [1], [0, 0, 1, 1], [], []>} : vector<128x128xbf16>, vector<128x128xbf16>, vector<128x128xf32> -> vector<128x128xf32>
    %c0_36 = arith.constant 0 : index
    %c0_37 = arith.constant 0 : index
    %56 = vector.load %arg11[%c0_36, %c0_37] : memref<1x128xf32, #tpu.memory_space<vmem>>, vector<1x128xf32>
    %57 = vector.broadcast %56 : vector<1x128xf32> to vector<128x128xf32>
    %58 = arith.addf %55, %57 : vector<128x128xf32>
    %c0_38 = arith.constant 0 : index
    %c0_39 = arith.constant 0 : index
    %59 = vector.load %arg12[%c0_38, %c0_39] : memref<128x128xf32, #tpu.memory_space<vmem>>, vector<128x128xf32>
    tpu.vector_store %arg12[%c0_38, %c0_39], %58 {strides = array<i32>} : memref<128x128xf32, #tpu.memory_space<vmem>>, vector<128x128xf32>,
    return
  }
  func.func @transform_0(%arg0: i32) -> (i32, i32) {
    %c0_i32 = arith.constant 0 : i32
    %c0_i32_0 = arith.constant 0 : i32
    return %arg0, %c0_i32 : i32, i32
  }
  func.func @transform_1(%arg0: i32) -> (i32, i32) {
    %c0_i32 = arith.constant 0 : i32
    %c0_i32_0 = arith.constant 0 : i32
    %c0_i32_1 = arith.constant 0 : i32
    return %c0_i32, %c0_i32_0 : i32, i32
  }
  func.func @transform_2(%arg0: i32) -> (i32, i32) {
    %c0_i32 = arith.constant 0 : i32
    %c0_i32_0 = arith.constant 0 : i32
    %c0_i32_1 = arith.constant 0 : i32
    return %c0_i32, %c0_i32_0 : i32, i32
  }
  func.func @transform_3(%arg0: i32) -> (i32, i32) {
    %c0_i32 = arith.constant 0 : i32
    %c0_i32_0 = arith.constant 0 : i32
    %c0_i32_1 = arith.constant 0 : i32
    return %c0_i32, %c0_i32_0 : i32, i32
  }
  func.func @transform_4(%arg0: i32) -> (i32, i32) {
    %c0_i32 = arith.constant 0 : i32
    %c0_i32_0 = arith.constant 0 : i32
    %c0_i32_1 = arith.constant 0 : i32
    return %c0_i32, %c0_i32_0 : i32, i32
  }
  func.func @transform_5(%arg0: i32) -> (i32, i32) {
    %c0_i32 = arith.constant 0 : i32
    %c0_i32_0 = arith.constant 0 : i32
    %c0_i32_1 = arith.constant 0 : i32
    return %c0_i32, %c0_i32_0 : i32, i32
  }
  func.func @transform_6(%arg0: i32) -> (i32, i32) {
    %c0_i32 = arith.constant 0 : i32
    %c0_i32_0 = arith.constant 0 : i32
    %c0_i32_1 = arith.constant 0 : i32
    return %c0_i32, %c0_i32_0 : i32, i32
  }
  func.func @transform_7(%arg0: i32) -> (i32, i32) {
    %c0_i32 = arith.constant 0 : i32
    %c0_i32_0 = arith.constant 0 : i32
    %c0_i32_1 = arith.constant 0 : i32
    return %c0_i32, %c0_i32_0 : i32, i32
  }
  func.func @transform_8(%arg0: i32) -> (i32, i32) {
    %c0_i32 = arith.constant 0 : i32
    %c0_i32_0 = arith.constant 0 : i32
    %c0_i32_1 = arith.constant 0 : i32
    return %c0_i32, %c0_i32_0 : i32, i32
  }
  func.func @transform_9(%arg0: i32) -> (i32, i32) {
    %c0_i32 = arith.constant 0 : i32
    %c0_i32_0 = arith.constant 0 : i32
    %c0_i32_1 = arith.constant 0 : i32
    return %c0_i32, %c0_i32_0 : i32, i32
  }
  func.func @transform_10(%arg0: i32) -> (i32, i32) {
    %c0_i32 = arith.constant 0 : i32
    %c0_i32_0 = arith.constant 0 : i32
    %c0_i32_1 = arith.constant 0 : i32
    return %c0_i32, %c0_i32_0 : i32, i32
  }
  func.func @transform_11(%arg0: i32) -> (i32, i32) {
    %c0_i32 = arith.constant 0 : i32
    %c0_i32_0 = arith.constant 0 : i32
    return %arg0, %c0_i32 : i32, i32
  }
  func.func @transform_12(%arg0: i32) -> (i32, i32) {
    %c0_i32 = arith.constant 0 : i32
    %c0_i32_0 = arith.constant 0 : i32
    return %arg0, %c0_i32 : i32, i32
  }
  func.func @transform_13(%arg0: i32) -> (i32, i32) {
    %c0_i32 = arith.constant 0 : i32
    %c0_i32_0 = arith.constant 0 : i32
    return %arg0, %c0_i32 : i32, i32
  }
  func.func @transform_14(%arg0: i32) -> (i32, i32) {
    %c0_i32 = arith.constant 0 : i32
    %c0_i32_0 = arith.constant 0 : i32
    return %arg0, %c0_i32 : i32, i32
  }
}

</mosaic_0001>

<bundles_post_ra>
// kernel: vqvae_forward.1
= control target key start
LH: loop header
LB: loop body
LE: loop exit
PB: predicated region body
PF: predicated region fallthrough
CT: control target
= control target key end

     0   :  { %s2948_s29 = smov 0   ;;  %s3633_s0 = inlined_call_operand.vmem [shape: bf16[256,128], index: 0, kind: input, shape index: {}]   ;;  %s3634_s1 = inlined_call_operand.vmem [shape: bf16[128,128], index: 1, kind: input, shape index: {}]   ;;  %s3635_s2 = inlined_call_operand.vmem [shape: f32[1,128], index: 2, kind: input, shape index: {}]   ;;  %s3636_s3 = inlined_call_operand.vmem [shape: bf16[128,128], index: 3, kind: input, shape index: {}]   ;;  %s3637_s4 = inlined_call_operand.vmem [shape: f32[1,128], index: 4, kind: input, shape index: {}]   ;;  %s3638_s5 = inlined_call_operand.vmem [shape: f32[128,128], index: 5, kind: input, shape index: {}]   ;;  %s3639_s6 = inlined_call_operand.vmem [shape: f32[1,128], index: 6, kind: input, shape index: {}]   ;;  %s3640_s7 = inlined_call_operand.vmem [shape: bf16[128,128], index: 7, kind: input, shape index: {}]   ;;  %s3641_s8 = inlined_call_operand.vmem [shape: f32[1,128], index: 8, kind: input, shape index: {}]   ;;  %s3642_s9 = inlined_call_operand.vmem [shape: bf16[128,128], index: 9, kind: input, shape index: {}]   ;;  %s3643_s10 = inlined_call_operand.vmem [shape: f32[1,128], index: 10, kind: input, shape index: {}]   ;;  %s3644_s11 = inlined_call_operand.vmem [shape: f32[256,128], index: 11, kind: output, shape index: {0}]   ;;  %s3645_s12 = inlined_call_operand.vmem [shape: f32[256,128], index: 12, kind: output, shape index: {1}]   ;;  %s3646_s13 = inlined_call_operand.vmem [shape: f32[256,128], index: 13, kind: output, shape index: {2}]   ;;  %s3647_s14 = inlined_call_operand.vmem [shape: s32[256,128], index: 14, kind: output, shape index: {3}]  }
   0x1 LB: > { %s2273_s30 = sadd.s32 4294967295, %s2870_s29   ;;  %p2277_p0 = scmp.ge.s32.totalorder %s2870_s29, 1  ;;  %s2870_s29 = sphi %s2948_s29, %s25_s29  }
   0x2   : > { %p420_p1 = scmp.lt.s32.totalorder %s2870_s29, 3 }
   0x4   : > { %p421_p2 = pnand %p2277_p0, %p420_p1 }
   0x5   : > { %v2824_v0 = vld [vmem:[%s3634_s1] sm:$0xff] (!%p421_p2)   ;;  %s2278_s17 = sshll.u32 (!%p421_p2), %s2273_s30, 4  ;;  %v2825_v1 = vld [vmem:[%s3634_s1 + $0x8] sm:$0xff] (!%p421_p2)   ;;  %v2826_v2 = vld [vmem:[%s3634_s1 + $0x10] sm:$0xff] (!%p421_p2)  }
   0x6   : > { %424 = sbr.rel (%p421_p2) target bundleno = 1817 (0x719), region = 64  ;;  %p482_p3 = scmp.lt.s32.totalorder (!%p421_p2), %s2278_s17, 31  ;;  %2495 = vmatprep.subr.bf16.mxu0 (!%p421_p2), %v2824_v0  ;;  %v2827_v3 = vld [vmem:[%s3634_s1 + $0x18] sm:$0xff] (!%p421_p2)   ;;  %v2828_v5 = vld [vmem:[%s3634_s1 + $0x20] sm:$0xff] (!%p421_p2)   ;;  %v2829_v6 = vld [vmem:[%s3634_s1 + $0x28] sm:$0xff] (!%p421_p2)  }
   0x7   : > { %2496 = vmatpush3.bf16.msra.mxu0 (!%p421_p2), %v2824_v0  ;;  %v2840_v7 = vld [vmem:[%s3636_s3] sm:$0xff] (!%p421_p2)   ;;  %v2841_v8 = vld [vmem:[%s3636_s3 + $0x8] sm:$0xff] (!%p421_p2)   ;;  %v2830_v9 = vld [vmem:[%s3634_s1 + $0x30] sm:$0xff] (!%p421_p2)  }
   0x8   : > { %2497 = vmatprep.subr.bf16.mxu0 (!%p421_p2), %v2825_v1  ;;  %2527 = vmatprep.subr.bf16.mxu1 (!%p421_p2), %v2840_v7  ;;  %v2842_v10 = vld [vmem:[%s3636_s3 + $0x10] sm:$0xff] (!%p421_p2)   ;;  %v2831_v11 = vld [vmem:[%s3634_s1 + $0x38] sm:$0xff] (!%p421_p2)   ;;  %v2844_v13 = vld [vmem:[%s3636_s3 + $0x20] sm:$0xff] (!%p421_p2)  }
   0x9   : > { %2528 = vmatpush3.bf16.msra.mxu1 (!%p421_p2), %v2840_v7  ;;  %v2843_v12 = vld [vmem:[%s3636_s3 + $0x18] sm:$0xff] (!%p421_p2)   ;;  %v2845_v16 = vld [vmem:[%s3636_s3 + $0x28] sm:$0xff] (!%p421_p2)   ;;  %v2846_v22 = vld [vmem:[%s3636_s3 + $0x30] sm:$0xff] (!%p421_p2)  }
   0xa   : > { %2529 = vmatprep.subr.bf16.mxu1 (!%p421_p2), %v2841_v8  ;;  %v2847_v23 = vld [vmem:[%s3636_s3 + $0x38] sm:$0xff] (!%p421_p2)   ;;  %v952_v24 = vld [vmem:[%s3638_s5] sm:$0xff] (!%p421_p2)  ;;  %v953_v25 = vld [vmem:[%s3638_s5 + $0x8] sm:$0xff] (!%p421_p2) }
   0xb   : > { %2498 = vmatpush3.bf16.msra.mxu0 (!%p421_p2), %v2825_v1  ;;  %v954_v26 = vld [vmem:[%s3638_s5 + $0x10] sm:$0xff] (!%p421_p2)  ;;  %v3029_v27 = vpack.c.bf16 (!%p421_p2), %v953_v25, %v952_v24  ;;  %v955_v28 = vld [vmem:[%s3638_s5 + $0x18] sm:$0xff] (!%p421_p2)  ;;  %v956_v30 = vld [vmem:[%s3638_s5 + $0x20] sm:$0xff] (!%p421_p2) }
   0xc   : > { %2499 = vmatprep.subr.bf16.mxu0 (!%p421_p2), %v2826_v2  ;;  %v3034_v29 = vpack.c.bf16 (!%p421_p2), %v955_v28, %v954_v26  ;;  %v957_v31 = vld [vmem:[%s3638_s5 + $0x28] sm:$0xff] (!%p421_p2)  ;;  %v958_v33 = vld [vmem:[%s3638_s5 + $0x30] sm:$0xff] (!%p421_p2)  ;;  %v959_v34 = vld [vmem:[%s3638_s5 + $0x38] sm:$0xff] (!%p421_p2) }
   0xd   : > { %s3649_s17 = smov (!%p482_p3, %s2278_s17), 31  ;;  %2530 = vmatpush3.bf16.msra.mxu1 %v2841_v8  ;;  %v3046_v32 = vpack.c.bf16 %v957_v31, %v956_v30  ;;  %v3056_v35 = vpack.c.bf16 %v959_v34, %v958_v33  ;;  %v960_v36 = vld [vmem:[%s3638_s5 + $0x40] sm:$0xff]  ;;  %v961_v37 = vld [vmem:[%s3638_s5 + $0x48] sm:$0xff]  ;;  %v962_v39 = vld [vmem:[%s3638_s5 + $0x50] sm:$0xff] }
   0xe   : > { %s2279_s22 = sshll.u32 %s3649_s17, 2  ;;  %2531 = vmatprep.subr.bf16.mxu1 %v2842_v10  ;;  %v3066_v38 = vpack.c.bf16 %v961_v37, %v960_v36  ;;  %v963_v40 = vld [vmem:[%s3638_s5 + $0x58] sm:$0xff]  ;;  %v964_v42 = vld [vmem:[%s3638_s5 + $0x60] sm:$0xff]  ;;  %v965_v43 = vld [vmem:[%s3638_s5 + $0x68] sm:$0xff]  ;;  %s3138_s16 = sshll.u32 %s3649_s17, 3 }
   0xf   : > { %s2971_s25 = scalar_lea.vmem %s3633_s0, %s2279_s22  ;;  %2500 = vmatpush3.bf16.msra.mxu0 %v2826_v2  ;;  %v3076_v41 = vpack.c.bf16 %v963_v40, %v962_v39  ;;  %v3086_v44 = vpack.c.bf16 %v965_v43, %v964_v42  ;;  %v966_v45 = vld [vmem:[%s3638_s5 + $0x70] sm:$0xff]  ;;  %v967_v46 = vld [vmem:[%s3638_s5 + $0x78] sm:$0xff]  ;;  %v3104_v48 = vld [vmem:[%s3635_s2] ss:$0 sm:$0xff]  ;;  %s3149_s22 = scalar_lea.vmem %s3645_s12, %s3138_s16 }
  0x10   : > { %v2832_v4 = vld [vmem:[%s2971_s25] sm:$0xff]   ;;  %2501 = vmatprep.subr.bf16.mxu0 %v2827_v3  ;;  %v2833_v14 = vld [vmem:[%s2971_s25 + $0x8] sm:$0xff]   ;;  %v2834_v15 = vld [vmem:[%s2971_s25 + $0x10] sm:$0xff]   ;;  %v3096_v47 = vpack.c.bf16 %v967_v46, %v966_v45  ;;  %s3473_s30 = scalar_lea.vmem %s3647_s14, %s3138_s16  ;;  %s3578_s15 = scalar_lea.vmem %s3646_s13, %s3138_s16 }
  0x11   : > { %2511 = vmatprep.mubr.bf16.mxu0 %v2832_v4  ;;  %2532 = vmatpush3.bf16.msra.mxu1 %v2842_v10  ;;  %v2835_v17 = vld [vmem:[%s2971_s25 + $0x18] sm:$0xff]   ;;  %v2836_v18 = vld [vmem:[%s2971_s25 + $0x20] sm:$0xff]   ;;  %v2837_v19 = vld [vmem:[%s2971_s25 + $0x28] sm:$0xff]   ;;  %s3612_s27 = scalar_lea.vmem %s3644_s11, %s3138_s16 }
  0x12   : > { %2533 = vmatprep.subr.bf16.mxu1 %v2843_v12  ;;  %v2838_v20 = vld [vmem:[%s2971_s25 + $0x30] sm:$0xff]   ;;  %v2839_v21 = vld [vmem:[%s2971_s25 + $0x38] sm:$0xff]  }
  0x13   : > { %2502 = vmatpush3.bf16.msra.mxu0 %v2827_v3 }
  0x14   : > { %2503 = vmatprep.subr.bf16.mxu0 %v2828_v5 }
  0x15   : > { %2534 = vmatpush3.bf16.msra.mxu1 %v2843_v12 }
  0x16   : > { %2535 = vmatprep.subr.bf16.mxu1 %v2844_v13 }
  0x17   : > { %2504 = vmatpush3.bf16.msra.mxu0 %v2828_v5 }
  0x18   : > { %2505 = vmatprep.subr.bf16.mxu0 %v2829_v6 }
  0x19   : > { %2536 = vmatpush3.bf16.msra.mxu1 %v2844_v13 }
  0x1a   : > { %2537 = vmatprep.subr.bf16.mxu1 %v2845_v16 }
  0x1b   : > { %2506 = vmatpush3.bf16.msra.mxu0 %v2829_v6 }
  0x1c   : > { %2507 = vmatprep.subr.bf16.mxu0 %v2830_v9 }
  0x1d   : > { %2538 = vmatpush3.bf16.msra.mxu1 %v2845_v16 }
  0x1e   : > { %2539 = vmatprep.subr.bf16.mxu1 %v2846_v22 }
  0x1f   : > { %2508 = vmatpush3.bf16.msra.mxu0 %v2830_v9 }
  0x20   : > { %2509 = vmatprep.subr.bf16.mxu0 %v2831_v11 }
  0x21   : > { %2540 = vmatpush3.bf16.msra.mxu1 %v2846_v22 }
  0x22   : > { %2541 = vmatprep.subr.bf16.mxu1 %v2847_v23 }
  0x23   : > { %2510 = vmatpush3.bf16.msra.mxu0 %v2831_v11 }
  0x24   : > { %2736 = vmatprep.subr.bf16.mxu0 %v3029_v27 }
  0x25   : > { %2542 = vmatpush3.bf16.msra.mxu1 %v2847_v23 }
  0x26   : > { %2512 = vmatmul.mubr.bf16.vlgmr.msra.gmra.mrb[0].mxu0 %v2833_v14  ;;  %2768 = vmatprep.subr.bf16.mxu1 %v3029_v27 }
  0x27   : > { %2515 = vmatprep.mubr.bf16.mxu0 %v2834_v15 }
  0x2c   : > { %2738 = vmatpush3.bf16.xpose.msra.mxu0 %v3029_v27 }
  0x2d   : > { %2740 = vmatprep.subr.bf16.mxu0 %v3034_v29 }
  0x2e   : > { %2516 = vmatmul.mubr.bf16.gmra.mrb[4].mxu0 %v2835_v17 }
  0x2f   : > { %2519 = vmatprep.mubr.bf16.mxu0 %v2836_v18 }
  0x34   : > { %2742 = vmatpush3.bf16.xpose.msra.mxu0 %v3034_v29 }
  0x35   : > { %2744 = vmatprep.subr.bf16.mxu0 %v3046_v32 }
  0x36   : > { %2520 = vmatmul.mubr.bf16.gmra.mrb[8].mxu0 %v2837_v19 }
  0x37   : > { %2523 = vmatprep.mubr.bf16.mxu0 %v2838_v20 }
  0x3c   : > { %2746 = vmatpush3.bf16.xpose.msra.mxu0 %v3046_v32 }
  0x3d   : > { %2748 = vmatprep.subr.bf16.mxu0 %v3056_v35 }
  0x3e   : > { %2524 = vmatmul.mubr.bf16.gmra.mrb[12].mxu0 %v2839_v21 }
  0x44   : > { %2750 = vmatpush3.bf16.xpose.msra.mxu0 %v3056_v35 }
  0x45   : > { %2752 = vmatprep.subr.bf16.mxu0 %v3066_v38 }
  0x4c   : > { %2754 = vmatpush3.bf16.xpose.msra.mxu0 %v3066_v38 }
  0x4d   : > { %2756 = vmatprep.subr.bf16.mxu0 %v3076_v41 }
  0x54   : > { %2758 = vmatpush3.bf16.xpose.msra.mxu0 %v3076_v41 }
  0x55   : > { %2760 = vmatprep.subr.bf16.mxu0 %v3086_v44 }
  0x5c   : > { %2762 = vmatpush3.bf16.xpose.msra.mxu0 %v3086_v44 }
  0x5d   : > { %2764 = vmatprep.subr.bf16.mxu0 %v3096_v47 }
  0x64   : > { %2766 = vmatpush3.bf16.xpose.msra.mxu0 %v3096_v47 }
  0xf9   : > { %v2513_v49 = vpop.f32.mrb[0].mxu0 }
  0xfa   : > { %v690_v50 = vadd.f32 %v2513_v49, %v3104_v48  ;;  %v681_v51 = vpop.f32.mrb[1].mxu0 }
  0xfb   : > { %v682_v52 = vadd.f32 %v3104_v48, %v681_v51  ;;  %v2514_v53 = vpop.f32.mrb[2].mxu0 }
  0xfc   : > { %v693_v54 = vadd.f32 %v2514_v53, %v3104_v48  ;;  %v684_v55 = vpop.f32.mrb[3].mxu0  ;;  %v746_v57 = vmax.f32 %v690_v50, 0.0 }
  0xfd   : > { %v685_v56 = vadd.f32 %v3104_v48, %v684_v55  ;;  %v744_v59 = vmax.f32 %v682_v52, 0.0 }
  0xfe   : > { %v747_v58 = vmax.f32 %v693_v54, 0.0 }
  0xff   : > { %v745_v60 = vmax.f32 %v685_v56, 0.0 }
 0x100   : > { %v761_v61 = vpack.c.bf16 %v747_v58, %v746_v57 }
 0x101   : > { %v2517_v62 = vpop.f32.mrb[4].mxu0  ;;  %v760_v63 = vpack.c.bf16 %v745_v60, %v744_v59 }
 0x102   : > { %v706_v0 = vadd.f32 %v2517_v62, %v3104_v48  ;;  %v697_v1 = vpop.f32.mrb[5].mxu0 }
 0x103   : > { %v698_v2 = vadd.f32 %v3104_v48, %v697_v1  ;;  %v2518_v3 = vpop.f32.mrb[6].mxu0  ;;  %2543 = vmatprep.mubr.bf16.mxu1 %v760_v63 }
 0x104   : > { %v709_v4 = vadd.f32 %v2518_v3, %v3104_v48  ;;  %v700_v5 = vpop.f32.mrb[7].mxu0  ;;  %2544 = vmatmul.mubr.bf16.vlgmr.msra.gmra.mrb[0].mxu1 %v761_v61  ;;  %v750_v7 = vmax.f32 %v706_v0, 0.0 }
 0x105   : > { %v701_v6 = vadd.f32 %v3104_v48, %v700_v5  ;;  %2770 = vmatpush3.bf16.msra.mxu1 %v3029_v27  ;;  %v748_v9 = vmax.f32 %v698_v2, 0.0 }
 0x106   : > { %v751_v8 = vmax.f32 %v709_v4, 0.0  ;;  %2772 = vmatprep.subr.bf16.mxu1 %v3034_v29 }
 0x107   : > { %v749_v10 = vmax.f32 %v701_v6, 0.0 }
 0x108   : > { %v763_v11 = vpack.c.bf16 %v751_v8, %v750_v7 }
 0x109   : > { %v762_v12 = vpack.c.bf16 %v749_v10, %v748_v9  ;;  %v2521_v13 = vpop.f32.mrb[8].mxu0  ;;  %2774 = vmatpush3.bf16.msra.mxu1 %v3034_v29 }
 0x10a   : > { %v722_v14 = vadd.f32 %v2521_v13, %v3104_v48  ;;  %v713_v15 = vpop.f32.mrb[9].mxu0  ;;  %2776 = vmatprep.subr.bf16.mxu1 %v3046_v32 }
 0x10b   : > { %v714_v16 = vadd.f32 %v3104_v48, %v713_v15  ;;  %v2522_v17 = vpop.f32.mrb[10].mxu0  ;;  %2547 = vmatprep.mubr.bf16.mxu1 %v762_v12 }
 0x10c   : > { %v725_v18 = vadd.f32 %v2522_v17, %v3104_v48  ;;  %v716_v19 = vpop.f32.mrb[11].mxu0  ;;  %2548 = vmatmul.mubr.bf16.gmra.mrb[4].mxu1 %v763_v11  ;;  %v754_v21 = vmax.f32 %v722_v14, 0.0 }
 0x10d   : > { %v717_v20 = vadd.f32 %v3104_v48, %v716_v19  ;;  %2778 = vmatpush3.bf16.msra.mxu1 %v3046_v32  ;;  %v752_v23 = vmax.f32 %v714_v16, 0.0 }
 0x10e   : > { %v755_v22 = vmax.f32 %v725_v18, 0.0  ;;  %2780 = vmatprep.subr.bf16.mxu1 %v3056_v35 }
 0x10f   : > { %v753_v24 = vmax.f32 %v717_v20, 0.0 }
 0x110   : > { %v765_v25 = vpack.c.bf16 %v755_v22, %v754_v21 }
 0x111   : > { %v764_v26 = vpack.c.bf16 %v753_v24, %v752_v23  ;;  %v2525_v27 = vpop.f32.mrb[12].mxu0  ;;  %2782 = vmatpush3.bf16.msra.mxu1 %v3056_v35 }
 0x112   : > { %v738_v28 = vadd.f32 %v2525_v27, %v3104_v48  ;;  %v729_v29 = vpop.f32.mrb[13].mxu0  ;;  %2784 = vmatprep.subr.bf16.mxu1 %v3066_v38 }
 0x113   : > { %v730_v30 = vadd.f32 %v3104_v48, %v729_v29  ;;  %v2526_v31 = vpop.f32.mrb[14].mxu0  ;;  %2551 = vmatprep.mubr.bf16.mxu1 %v764_v26 }
 0x114   : > { %v741_v32 = vadd.f32 %v2526_v31, %v3104_v48  ;;  %v732_v33 = vpop.f32.mrb[15].mxu0  ;;  %2552 = vmatmul.mubr.bf16.gmra.mrb[8].mxu1 %v765_v25  ;;  %v758_v36 = vmax.f32 %v738_v28, 0.0 }
 0x115   : > { %v733_v34 = vadd.f32 %v3104_v48, %v732_v33  ;;  %2786 = vmatpush3.bf16.msra.mxu1 %v3066_v38  ;;  %v756_v37 = vmax.f32 %v730_v30, 0.0  ;;  %v3143_v38 = vld [vmem:[%s3637_s4] ss:$0 sm:$0xff] }
 0x116   : > { %v759_v35 = vmax.f32 %v741_v32, 0.0  ;;  %2788 = vmatprep.subr.bf16.mxu1 %v3076_v41  ;;  %v3186_v32 = vld [vmem:[%s3639_s6] ss:$0 sm:$0xff] }
 0x117   : > { %v757_v39 = vmax.f32 %v733_v34, 0.0 }
 0x118   : > { %v767_v40 = vpack.c.bf16 %v759_v35, %v758_v36 }
 0x119   : > { %v766_v42 = vpack.c.bf16 %v757_v39, %v756_v37  ;;  %2790 = vmatpush3.bf16.msra.mxu1 %v3076_v41 }
 0x11a   : > { %2792 = vmatprep.subr.bf16.mxu1 %v3086_v44 }
 0x11b   : > { %2555 = vmatprep.mubr.bf16.mxu1 %v766_v42 }
 0x11c   : > { %2556 = vmatmul.mubr.bf16.gmra.mrb[12].mxu1 %v767_v40 }
 0x11d   : > { %2794 = vmatpush3.bf16.msra.mxu1 %v3086_v44 }
 0x11e   : > { %2796 = vmatprep.subr.bf16.mxu1 %v3096_v47 }
 0x121   : > { %2798 = vmatpush3.bf16.msra.mxu1 %v3096_v47 }
 0x1d7   : > { %v2545_v41 = vpop.f32.mrb[0].mxu1 }
 0x1d8   : > { %v882_v43 = vadd.f32 %v2545_v41, %v3143_v38  ;;  %v873_v44 = vpop.f32.mrb[1].mxu1 }
 0x1d9   : > { %v874_v45 = vadd.f32 %v3143_v38, %v873_v44  ;;  %v2546_v46 = vpop.f32.mrb[2].mxu1 }
 0x1da   : > { %938 = vst [vmem:[%s3149_s22 + $0x10] sm:$0xff] %v882_v43  ;;  %v885_v47 = vadd.f32 %v2546_v46, %v3143_v38  ;;  %v876_v48 = vpop.f32.mrb[3].mxu1  ;;  %v970_v49 = vmul.f32 %v882_v43, %v882_v43 }
 0x1db   : > { %936 = vst [vmem:[%s3149_s22] sm:$0xff] %v874_v45  ;;  %v877_v50 = vadd.f32 %v3143_v38, %v876_v48  ;;  %2591 = vmatprep.mubr.f32.mxu0 %v874_v45  ;;  %v968_v51 = vmul.f32 %v874_v45, %v874_v45 }
 0x1dc   : > { %939 = vst [vmem:[%s3149_s22 + $0x18] sm:$0xff] %v885_v47  ;;  %988 = vadd.xlane.f32.xlu1 %v970_v49  ;;  %v971_v52 = vmul.f32 %v885_v47, %v885_v47 }
 0x1dd   : > { %937 = vst [vmem:[%s3149_s22 + $0x8] sm:$0xff] %v877_v50  ;;  %2592 = vmatmul.mubr.f32.vlgmr.msra.gmra.mrb[16].mxu0 %v877_v50  ;;  %984 = vadd.xlane.f32.xlu0 %v968_v51  ;;  %v969_v54 = vmul.f32 %v877_v50, %v877_v50 }
 0x1de   : > { %2594 = vmatprep.mubr.f32.mxu0 %v882_v43 }
 0x1df   : > { %v2549_v53 = vpop.f32.mrb[4].mxu1 }
 0x1e0   : > { %v898_v55 = vadd.f32 %v2549_v53, %v3143_v38  ;;  %990 = vadd.xlane.f32.xlu1 %v971_v52  ;;  %v889_v56 = vpop.f32.mrb[5].mxu1 }
 0x1e1   : > { %v890_v57 = vadd.f32 %v3143_v38, %v889_v56  ;;  %v2550_v58 = vpop.f32.mrb[6].mxu1  ;;  %2595 = vmatmul.mubr.f32.gmra.mrb[18].mxu0 %v885_v47  ;;  %986 = vadd.xlane.f32.xlu0 %v969_v54 }
 0x1e2   : > { %942 = vst [vmem:[%s3149_s22 + $0x30] sm:$0xff] %v898_v55  ;;  %v901_v59 = vadd.f32 %v2550_v58, %v3143_v38  ;;  %v892_v60 = vpop.f32.mrb[7].mxu1  ;;  %v974_v1 = vmul.f32 %v898_v55, %v898_v55 }
 0x1e3   : > { %940 = vst [vmem:[%s3149_s22 + $0x20] sm:$0xff] %v890_v57  ;;  %v893_v61 = vadd.f32 %v3143_v38, %v892_v60  ;;  %2597 = vmatprep.mubr.f32.mxu0 %v890_v57  ;;  %v972_v62 = vmul.f32 %v890_v57, %v890_v57 }
 0x1e4   : > { %943 = vst [vmem:[%s3149_s22 + $0x38] sm:$0xff] %v901_v59  ;;  %v975_v6 = vmul.f32 %v901_v59, %v901_v59 }
 0x1e5   : > { %941 = vst [vmem:[%s3149_s22 + $0x28] sm:$0xff] %v893_v61  ;;  %2598 = vmatmul.mubr.f32.gmra.mrb[20].mxu0 %v893_v61  ;;  %992 = vadd.xlane.f32.xlu0 %v972_v62  ;;  %v973_v63 = vmul.f32 %v893_v61, %v893_v61 }
 0x1e6   : > { %2600 = vmatprep.mubr.f32.mxu0 %v898_v55 }
 0x1e7   : > { %v2553_v0 = vpop.f32.mrb[8].mxu1  ;;  %994 = vadd.xlane.f32.xlu1 %v973_v63 }
 0x1e8   : > { %v914_v2 = vadd.f32 %v2553_v0, %v3143_v38  ;;  %v905_v3 = vpop.f32.mrb[9].mxu1 }
 0x1e9   : > { %v906_v4 = vadd.f32 %v3143_v38, %v905_v3  ;;  %v2554_v5 = vpop.f32.mrb[10].mxu1  ;;  %2601 = vmatmul.mubr.f32.gmra.mrb[22].mxu0 %v901_v59  ;;  %996 = vadd.xlane.f32.xlu0 %v974_v1 }
 0x1ea   : > { %946 = vst [vmem:[%s3149_s22 + $0x50] sm:$0xff] %v914_v2  ;;  %v917_v7 = vadd.f32 %v2554_v5, %v3143_v38  ;;  %v908_v8 = vpop.f32.mrb[11].mxu1  ;;  %v978_v13 = vmul.f32 %v914_v2, %v914_v2 }
 0x1eb   : > { %944 = vst [vmem:[%s3149_s22 + $0x40] sm:$0xff] %v906_v4  ;;  %v909_v9 = vadd.f32 %v3143_v38, %v908_v8  ;;  %998 = vadd.xlane.f32.xlu1 %v975_v6  ;;  %2603 = vmatprep.mubr.f32.mxu0 %v906_v4  ;;  %v976_v10 = vmul.f32 %v906_v4, %v906_v4 }
 0x1ec   : > { %947 = vst [vmem:[%s3149_s22 + $0x58] sm:$0xff] %v917_v7  ;;  %v979_v18 = vmul.f32 %v917_v7, %v917_v7 }
 0x1ed   : > { %945 = vst [vmem:[%s3149_s22 + $0x48] sm:$0xff] %v909_v9  ;;  %2604 = vmatmul.mubr.f32.gmra.mrb[24].mxu0 %v909_v9  ;;  %1000 = vadd.xlane.f32.xlu0 %v976_v10  ;;  %v977_v11 = vmul.f32 %v909_v9, %v909_v9 }
 0x1ee   : > { %2606 = vmatprep.mubr.f32.mxu0 %v914_v2 }
 0x1ef   : > { %v2557_v12 = vpop.f32.mrb[12].mxu1  ;;  %1002 = vadd.xlane.f32.xlu1 %v977_v11 }
 0x1f0   : > { %v930_v14 = vadd.f32 %v2557_v12, %v3143_v38  ;;  %v921_v15 = vpop.f32.mrb[13].mxu1 }
 0x1f1   : > { %v922_v16 = vadd.f32 %v3143_v38, %v921_v15  ;;  %v2558_v17 = vpop.f32.mrb[14].mxu1  ;;  %2607 = vmatmul.mubr.f32.gmra.mrb[26].mxu0 %v917_v7  ;;  %1004 = vadd.xlane.f32.xlu0 %v978_v13 }
 0x1f2   : > { %950 = vst [vmem:[%s3149_s22 + $0x70] sm:$0xff] %v930_v14  ;;  %v933_v19 = vadd.f32 %v2558_v17, %v3143_v38  ;;  %v924_v20 = vpop.f32.mrb[15].mxu1  ;;  %v982_v24 = vmul.f32 %v930_v14, %v930_v14 }
 0x1f3   : > { %948 = vst [vmem:[%s3149_s22 + $0x60] sm:$0xff] %v922_v16  ;;  %v925_v21 = vadd.f32 %v3143_v38, %v924_v20  ;;  %1006 = vadd.xlane.f32.xlu1 %v979_v18  ;;  %2609 = vmatprep.mubr.f32.mxu0 %v922_v16  ;;  %v980_v22 = vmul.f32 %v922_v16, %v922_v16 }
 0x1f4   : > { %951 = vst [vmem:[%s3149_s22 + $0x78] sm:$0xff] %v933_v19  ;;  %v983_v25 = vmul.f32 %v933_v19, %v933_v19 }
 0x1f5   : > { %949 = vst [vmem:[%s3149_s22 + $0x68] sm:$0xff] %v925_v21  ;;  %2610 = vmatmul.mubr.f32.gmra.mrb[28].mxu0 %v925_v21  ;;  %1008 = vadd.xlane.f32.xlu0 %v980_v22  ;;  %v981_v23 = vmul.f32 %v925_v21, %v925_v21 }
 0x1f6   : > { %2612 = vmatprep.mubr.f32.mxu0 %v930_v14 }
 0x1f7   : > { %1010 = vadd.xlane.f32.xlu1 %v981_v23 }
 0x1f9   : > { %2613 = vmatmul.mubr.f32.gmra.mrb[30].mxu0 %v933_v19  ;;  %1012 = vadd.xlane.f32.xlu0 %v982_v24 }
 0x1fb   : > { %1014 = vadd.xlane.f32.xlu1 %v983_v25 }
 0x269   : > { %v989_v27 = vpop.xlane.xlu1 %988 }
 0x26a   : > { %v985_v26 = vpop.xlane.xlu0 %984  ;;  %v1170_v47 = vadd.f32 %v3186_v32, %v989_v27 }
 0x26b   : > { %v1168_v37 = vadd.f32 %v3186_v32, %v985_v26 }
 0x26d   : > { %v991_v29 = vpop.xlane.xlu1 %990 }
 0x26e   : > { %v987_v28 = vpop.xlane.xlu0 %986  ;;  %v1171_v44 = vadd.f32 %v3186_v32, %v991_v29 }
 0x26f   : > { %v1169_v34 = vadd.f32 %v3186_v32, %v987_v28 }
 0x272   : > { %v993_v31 = vpop.xlane.xlu0 %992 }
 0x273   : > { %v1172_v57 = vadd.f32 %v3186_v32, %v993_v31 }
 0x274   : > { %v995_v30 = vpop.xlane.xlu1 %994 }
 0x275   : > { %v1173_v53 = vadd.f32 %v3186_v32, %v995_v30 }
 0x276   : > { %v997_v42 = vpop.xlane.xlu0 %996 }
 0x277   : > { %v1174_v1 = vadd.f32 %v3186_v32, %v997_v42 }
 0x278   : > { %v999_v39 = vpop.xlane.xlu1 %998 }
 0x279   : > { %v1175_v62 = vadd.f32 %v3186_v32, %v999_v39 }
 0x27a   : > { %v1001_v54 = vpop.xlane.xlu0 %1000 }
 0x27b   : > { %v1176_v11 = vadd.f32 %v3186_v32, %v1001_v54 }
 0x27c   : > { %v1003_v50 = vpop.xlane.xlu1 %1002 }
 0x27d   : > { %v1177_v8 = vadd.f32 %v3186_v32, %v1003_v50 }
 0x27e   : > { %v1005_v4 = vpop.xlane.xlu0 %1004 }
 0x27f   : > { %v1178_v21 = vadd.f32 %v3186_v32, %v1005_v4 }
 0x280   : > { %v1007_v2 = vpop.xlane.xlu1 %1006 }
 0x281   : > { %v1179_v17 = vadd.f32 %v3186_v32, %v1007_v2 }
 0x282   : > { %v1009_v18 = vpop.xlane.xlu0 %1008 }
 0x283   : > { %v1180_v29 = vadd.f32 %v3186_v32, %v1009_v18 }
 0x284   : > { %v1011_v14 = vpop.xlane.xlu1 %1010 }
 0x285   : > { %v1181_v26 = vadd.f32 %v3186_v32, %v1011_v14 }
 0x288   : > { %v1015_v30 = vpop.xlane.xlu1 %1014 }
 0x2b0   : > { %v2593_v33 = vpop.f32.mrb[16].mxu0 }
 0x2b1   : > { %v1185_v36 = vmul.f32 2.0, %v2593_v33  ;;  %v1082_v35 = vpop.f32.mrb[17].mxu0  ;;  %v1013_v33 = vpop.xlane.xlu0 %1012 }
 0x2b2   : > { %v1184_v40 = vmul.f32 2.0, %v1082_v35  ;;  %v1182_v42 = vadd.f32 %v3186_v32, %v1013_v33 }
 0x2b3   : > { %v3190_v38 = vsub.f32 %v1169_v34, %v1185_v36 }
 0x2b4   : > { %v2596_v41 = vpop.f32.mrb[18].mxu0  ;;  %v3192_v43 = vsub.f32 %v1168_v37, %v1184_v40  ;;  %v1183_v37 = vadd.f32 %v3186_v32, %v1015_v30 }
 0x2b5   : > { %v1187_v45 = vmul.f32 2.0, %v2596_v41  ;;  %v1092_v46 = vpop.f32.mrb[19].mxu0  ;;  %1220 = vmin.xlane.f32.xlu1 %v3190_v38 }
 0x2b6   : > { %v1186_v48 = vmul.f32 2.0, %v1092_v46  ;;  %1218 = vmin.xlane.f32.xlu0 %v3192_v43  ;;  %v1216_v46 = vlaneseq }
 0x2b7   : > { %v3198_v49 = vsub.f32 %v1171_v44, %v1187_v45 }
 0x2b8   : > { %v2599_v51 = vpop.f32.mrb[20].mxu0  ;;  %v3200_v52 = vsub.f32 %v1170_v47, %v1186_v48  ;;  %v3252_v47 = vand.u32 127, %v1216_v46 }
 0x2b9   : > { %v1189_v55 = vmul.f32 2.0, %v2599_v51  ;;  %v1102_v56 = vpop.f32.mrb[21].mxu0  ;;  %1224 = vmin.xlane.f32.xlu1 %v3198_v49 }
 0x2ba   : > { %v1188_v58 = vmul.f32 2.0, %v1102_v56  ;;  %1222 = vmin.xlane.f32.xlu0 %v3200_v52 }
 0x2bb   : > { %v3206_v59 = vsub.f32 %v1173_v53, %v1189_v55 }
 0x2bc   : > { %v2602_v60 = vpop.f32.mrb[22].mxu0  ;;  %v3208_v61 = vsub.f32 %v1172_v57, %v1188_v58 }
 0x2bd   : > { %v1191_v63 = vmul.f32 2.0, %v2602_v60  ;;  %v1112_v0 = vpop.f32.mrb[23].mxu0  ;;  %1228 = vmin.xlane.f32.xlu1 %v3206_v59 }
 0x2be   : > { %v1190_v3 = vmul.f32 2.0, %v1112_v0  ;;  %1226 = vmin.xlane.f32.xlu0 %v3208_v61 }
 0x2bf   : > { %v3214_v5 = vsub.f32 %v1175_v62, %v1191_v63 }
 0x2c0   : > { %v2605_v6 = vpop.f32.mrb[24].mxu0  ;;  %v3216_v7 = vsub.f32 %v1174_v1, %v1190_v3 }
 0x2c1   : > { %v1193_v9 = vmul.f32 2.0, %v2605_v6  ;;  %v1122_v10 = vpop.f32.mrb[25].mxu0  ;;  %1232 = vmin.xlane.f32.xlu1 %v3214_v5 }
 0x2c2   : > { %v1192_v12 = vmul.f32 2.0, %v1122_v10  ;;  %1230 = vmin.xlane.f32.xlu0 %v3216_v7 }
 0x2c3   : > { %v3222_v13 = vsub.f32 %v1177_v8, %v1193_v9 }
 0x2c4   : > { %v2608_v15 = vpop.f32.mrb[26].mxu0  ;;  %v3224_v16 = vsub.f32 %v1176_v11, %v1192_v12 }
 0x2c5   : > { %v1195_v19 = vmul.f32 2.0, %v2608_v15  ;;  %v1132_v20 = vpop.f32.mrb[27].mxu0  ;;  %1236 = vmin.xlane.f32.xlu1 %v3222_v13 }
 0x2c6   : > { %v1194_v22 = vmul.f32 2.0, %v1132_v20  ;;  %1234 = vmin.xlane.f32.xlu0 %v3224_v16 }
 0x2c7   : > { %v3230_v23 = vsub.f32 %v1179_v17, %v1195_v19 }
 0x2c8   : > { %v2611_v24 = vpop.f32.mrb[28].mxu0  ;;  %v3232_v25 = vsub.f32 %v1178_v21, %v1194_v22 }
 0x2c9   : > { %v1197_v27 = vmul.f32 2.0, %v2611_v24  ;;  %v1142_v28 = vpop.f32.mrb[29].mxu0  ;;  %1240 = vmin.xlane.f32.xlu1 %v3230_v23 }
 0x2ca   : > { %v1196_v31 = vmul.f32 2.0, %v1142_v28  ;;  %1238 = vmin.xlane.f32.xlu0 %v3232_v25 }
 0x2cb   : > { %v3238_v34 = vsub.f32 %v1181_v26, %v1197_v27 }
 0x2cc   : > { %v2614_v36 = vpop.f32.mrb[30].mxu0  ;;  %v3240_v35 = vsub.f32 %v1180_v29, %v1196_v31 }
 0x2cd   : > { %v1199_v39 = vmul.f32 2.0, %v2614_v36  ;;  %v1152_v40 = vpop.f32.mrb[31].mxu0  ;;  %1244 = vmin.xlane.f32.xlu1 %v3238_v34 }
 0x2ce   : > { %v1198_v41 = vmul.f32 2.0, %v1152_v40  ;;  %1242 = vmin.xlane.f32.xlu0 %v3240_v35 }
 0x2cf   : > { %v3246_v44 = vsub.f32 %v1183_v37, %v1199_v39 }
 0x2d0   : > { %v3248_v45 = vsub.f32 %v1182_v42, %v1198_v41 }
 0x2d1   : > { %1248 = vmin.xlane.f32.xlu1 %v3246_v44 }
 0x2d2   : > { %1246 = vmin.xlane.f32.xlu0 %v3248_v45 }
 0x342   : > { %v1221_v48 = vpop.xlane.xlu1 %1220 }
 0x343   : > { %vm1251_vm0 = vcmp.le.f32.partialorder %v3190_v38, %v1221_v48  ;;  %v1219_v50 = vpop.xlane.xlu0 %1218 }
 0x344   : > { %v3256_v32 = vsel %vm1251_vm0, %v3252_v47, 128  ;;  %vm1250_vm1 = vcmp.le.f32.partialorder %v3192_v43, %v1219_v50 }
 0x345   : > { %v3260_v51 = vsel %vm1250_vm1, %v3252_v47, 128  ;;  %v1297_v53 = vshra.s32 %v3256_v32, 16 }
 0x346   : > { %v1225_v54 = vpop.xlane.xlu1 %1224  ;;  %v1283_v55 = vshra.s32 %v3260_v51, 16 }
 0x347   : > { %vm1253_vm2 = vcmp.le.f32.partialorder %v3198_v49, %v1225_v54  ;;  %v1223_v56 = vpop.xlane.xlu0 %1222  ;;  %v3265_v57 = vcvt.s32.f32 %v1297_v53  ;;  %v1282_v53 = vand.u32 65535, %v3260_v51 }
 0x348   : > { %v3268_v38 = vsel %vm1253_vm2, %v3252_v47, 128  ;;  %vm1252_vm3 = vcmp.le.f32.partialorder %v3200_v52, %v1223_v56  ;;  %v3271_v58 = vcvt.s32.f32 %v1283_v55 }
 0x349   : > { %v3274_v43 = vsel %vm1252_vm3, %v3252_v47, 128  ;;  %1300 = vmin.xlane.f32.xlu1 %v3265_v57  ;;  %v1325_v60 = vshra.s32 %v3268_v38, 16  ;;  %v1324_v54 = vand.u32 65535, %v3268_v38 }
 0x34a   : > { %v1229_v62 = vpop.xlane.xlu1 %1228  ;;  %1286 = vmin.xlane.f32.xlu0 %v3271_v58  ;;  %v1311_v49 = vshra.s32 %v3274_v43, 16 }
 0x34b   : > { %vm1255_vm4 = vcmp.le.f32.partialorder %v3206_v59, %v1229_v62  ;;  %v1227_v63 = vpop.xlane.xlu0 %1226  ;;  %v3281_v0 = vcvt.s32.f32 %v1325_v60  ;;  %v1310_v60 = vand.u32 65535, %v3274_v43 }
 0x34c   : > { %v3284_v52 = vsel %vm1255_vm4, %v3252_v47, 128  ;;  %vm1254_vm5 = vcmp.le.f32.partialorder %v3208_v61, %v1227_v63  ;;  %v3287_v1 = vcvt.s32.f32 %v1311_v49  ;;  %v1284_v49 = vcvt.s32.f32 %v1282_v53 }
 0x34d   : > { %v3290_v2 = vsel %vm1254_vm5, %v3252_v47, 128  ;;  %1328 = vmin.xlane.f32.xlu1 %v3281_v0  ;;  %v1353_v3 = vshra.s32 %v3284_v52, 16  ;;  %v1352_v51 = vand.u32 65535, %v3284_v52 }
 0x34e   : > { %v1233_v4 = vpop.xlane.xlu1 %1232  ;;  %1314 = vmin.xlane.f32.xlu0 %v3287_v1  ;;  %v1339_v59 = vshra.s32 %v3290_v2, 16  ;;  %v1338_v43 = vand.u32 65535, %v3290_v2 }
 0x34f   : > { %vm1257_vm6 = vcmp.le.f32.partialorder %v3214_v5, %v1233_v4  ;;  %v1231_v6 = vpop.xlane.xlu0 %1230  ;;  %v3297_v8 = vcvt.s32.f32 %v1353_v3  ;;  %v1326_v3 = vcvt.s32.f32 %v1324_v54 }
 0x350   : > { %v3300_v61 = vsel %vm1257_vm6, %v3252_v47, 128  ;;  %vm1256_vm7 = vcmp.le.f32.partialorder %v3216_v7, %v1231_v6  ;;  %v3303_v9 = vcvt.s32.f32 %v1339_v59 }
 0x351   : > { %v3306_v10 = vsel %vm1256_vm7, %v3252_v47, 128  ;;  %1356 = vmin.xlane.f32.xlu1 %v3297_v8  ;;  %v1381_v11 = vshra.s32 %v3300_v61, 16  ;;  %v1380_v52 = vand.u32 65535, %v3300_v61 }
 0x352   : > { %v1237_v12 = vpop.xlane.xlu1 %1236  ;;  %1342 = vmin.xlane.f32.xlu0 %v3303_v9  ;;  %v1367_v5 = vshra.s32 %v3306_v10, 16  ;;  %v1366_v2 = vand.u32 65535, %v3306_v10 }
 0x353   : > { %vm1259_vm8 = vcmp.le.f32.partialorder %v3222_v13, %v1237_v12  ;;  %v1235_v14 = vpop.xlane.xlu0 %1234  ;;  %v3313_v15 = vcvt.s32.f32 %v1381_v11  ;;  %v1354_v11 = vcvt.s32.f32 %v1352_v51 }
 0x354   : > { %v3316_v7 = vsel %vm1259_vm8, %v3252_v47, 128  ;;  %vm1258_vm9 = vcmp.le.f32.partialorder %v3224_v16, %v1235_v14  ;;  %v3319_v17 = vcvt.s32.f32 %v1367_v5 }
 0x355   : > { %v3322_v18 = vsel %vm1258_vm9, %v3252_v47, 128  ;;  %1384 = vmin.xlane.f32.xlu1 %v3313_v15  ;;  %v1409_v19 = vshra.s32 %v3316_v7, 16  ;;  %v1408_v61 = vand.u32 65535, %v3316_v7 }
 0x356   : > { %v1241_v20 = vpop.xlane.xlu1 %1240  ;;  %1370 = vmin.xlane.f32.xlu0 %v3319_v17  ;;  %v1395_v13 = vshra.s32 %v3322_v18, 16  ;;  %v1394_v10 = vand.u32 65535, %v3322_v18 }
 0x357   : > { %vm1261_vm10 = vcmp.le.f32.partialorder %v3230_v23, %v1241_v20  ;;  %v1239_v21 = vpop.xlane.xlu0 %1238  ;;  %v3329_v22 = vcvt.s32.f32 %v1409_v19  ;;  %v1382_v19 = vcvt.s32.f32 %v1380_v52 }
 0x358   : > { %v3332_v16 = vsel %vm1261_vm10, %v3252_v47, 128  ;;  %vm1260_vm11 = vcmp.le.f32.partialorder %v3232_v25, %v1239_v21  ;;  %v3335_v24 = vcvt.s32.f32 %v1395_v13 }
 0x359   : > { %v3338_v26 = vsel %vm1260_vm11, %v3252_v47, 128  ;;  %1412 = vmin.xlane.f32.xlu1 %v3329_v22  ;;  %v1437_v27 = vshra.s32 %v3332_v16, 16  ;;  %v1436_v7 = vand.u32 65535, %v3332_v16 }
 0x35a   : > { %v1245_v28 = vpop.xlane.xlu1 %1244  ;;  %1398 = vmin.xlane.f32.xlu0 %v3335_v24  ;;  %v1423_v23 = vshra.s32 %v3338_v26, 16  ;;  %v1422_v18 = vand.u32 65535, %v3338_v26 }
 0x35b   : > { %vm1263_vm12 = vcmp.le.f32.partialorder %v3238_v34, %v1245_v28  ;;  %v1243_v29 = vpop.xlane.xlu0 %1242  ;;  %v3345_v30 = vcvt.s32.f32 %v1437_v27  ;;  %v1410_v27 = vcvt.s32.f32 %v1408_v61 }
 0x35c   : > { %v3348_v25 = vsel %vm1263_vm12, %v3252_v47, 128  ;;  %vm1262_vm13 = vcmp.le.f32.partialorder %v3240_v35, %v1243_v29  ;;  %v3351_v31 = vcvt.s32.f32 %v1423_v23 }
 0x35d   : > { %v3354_v33 = vsel %vm1262_vm13, %v3252_v47, 128  ;;  %1440 = vmin.xlane.f32.xlu1 %v3345_v30  ;;  %v1465_v36 = vshra.s32 %v3348_v25, 16  ;;  %v1464_v16 = vand.u32 65535, %v3348_v25 }
 0x35e   : > { %v1249_v37 = vpop.xlane.xlu1 %1248  ;;  %1426 = vmin.xlane.f32.xlu0 %v3351_v31  ;;  %v1451_v34 = vshra.s32 %v3354_v33, 16  ;;  %v1450_v26 = vand.u32 65535, %v3354_v33 }
 0x35f   : > { %vm1265_vm14 = vcmp.le.f32.partialorder %v3246_v44, %v1249_v37  ;;  %v1247_v39 = vpop.xlane.xlu0 %1246  ;;  %v3361_v40 = vcvt.s32.f32 %v1465_v36  ;;  %v1438_v36 = vcvt.s32.f32 %v1436_v7 }
 0x360   : > { %v3364_v35 = vsel %vm1265_vm14, %v3252_v47, 128  ;;  %vm1264_vm15 = vcmp.le.f32.partialorder %v3248_v45, %v1247_v39  ;;  %v3367_v42 = vcvt.s32.f32 %v1451_v34  ;;  %v1296_v45 = vand.u32 65535, %v3256_v32 }
 0x361   : > { %v3370_v41 = vsel %vm1264_vm15, %v3252_v47, 128  ;;  %1468 = vmin.xlane.f32.xlu1 %v3361_v40  ;;  %v1493_v46 = vshra.s32 %v3364_v35, 16  ;;  %v1492_v25 = vand.u32 65535, %v3364_v35 }
 0x362   : > { %1454 = vmin.xlane.f32.xlu0 %v3367_v42  ;;  %v1479_v44 = vshra.s32 %v3370_v41, 16  ;;  %v1298_v56 = vcvt.s32.f32 %v1296_v45  ;;  %v1478_v33 = vand.u32 65535, %v3370_v41 }
 0x363   : > { %v3376_v48 = vcvt.s32.f32 %v1493_v46  ;;  %v1466_v46 = vcvt.s32.f32 %v1464_v16  ;;  %v1494_v35 = vcvt.s32.f32 %v1492_v25 }
 0x364   : > { %v3378_v50 = vcvt.s32.f32 %v1479_v44  ;;  %v1480_v41 = vcvt.s32.f32 %v1478_v33 }
 0x365   : > { %1496 = vmin.xlane.f32.xlu1 %v3376_v48 }
 0x366   : > { %1482 = vmin.xlane.f32.xlu0 %v3378_v50 }
 0x3d6   : > { %v3385_v55 = vpop.xlane.xlu1 %1300 }
 0x3d7   : > { %v3388_v62 = vpop.xlane.xlu0 %1286  ;;  %vm1302_vm0 = vcmp.eq.f32.partialorder %v3265_v57, %v3385_v55  ;;  %v1312_v57 = vcvt.s32.f32 %v1310_v60  ;;  %v1307_v60 = vcvt.f32.s32 %v3385_v55 }
 0x3d8   : > { %v1303_v63 = vsel %vm1302_vm0, %v1298_v56, inf  ;;  %vm1288_vm1 = vcmp.eq.f32.partialorder %v3271_v58, %v3388_v62 }
 0x3d9   : > { %1304 = vmin.xlane.f32.xlu1 %v1303_v63  ;;  %v1289_v32 = vsel %vm1288_vm1, %v1284_v49, inf  ;;  %v1293_v49 = vcvt.f32.s32 %v3388_v62 }
 0x3da   : > { %v3395_v38 = vpop.xlane.xlu1 %1328  ;;  %1290 = vmin.xlane.f32.xlu0 %v1289_v32 }
 0x3db   : > { %v3398_v4 = vpop.xlane.xlu0 %1314  ;;  %vm1330_vm2 = vcmp.eq.f32.partialorder %v3281_v0, %v3395_v38  ;;  %v1340_v0 = vcvt.s32.f32 %v1338_v43  ;;  %v1335_v32 = vcvt.f32.s32 %v3395_v38  ;;  %v1294_v43 = vshll.u32 %v1293_v49, 16 }
 0x3dc   : > { %v1331_v59 = vsel %vm1330_vm2, %v1326_v3, inf  ;;  %vm1316_vm3 = vcmp.eq.f32.partialorder %v3287_v1, %v3398_v4 }
 0x3dd   : > { %1332 = vmin.xlane.f32.xlu1 %v1331_v59  ;;  %v1317_v58 = vsel %vm1316_vm3, %v1312_v57, inf }
 0x3de   : > { %v3405_v6 = vpop.xlane.xlu1 %1356  ;;  %1318 = vmin.xlane.f32.xlu0 %v1317_v58  ;;  %v1336_v58 = vshll.u32 %v1335_v32, 16 }
 0x3df   : > { %v3408_v12 = vpop.xlane.xlu0 %1342  ;;  %vm1358_vm4 = vcmp.eq.f32.partialorder %v3297_v8, %v3405_v6  ;;  %v1368_v8 = vcvt.s32.f32 %v1366_v2  ;;  %v1363_v52 = vcvt.f32.s32 %v3405_v6  ;;  %v2872_v6 = vmov 1.0  }
 0x3e0   : > { %v1359_v5 = vsel %vm1358_vm4, %v1354_v11, inf  ;;  %vm1344_vm5 = vcmp.eq.f32.partialorder %v3303_v9, %v3408_v12 }
 0x3e1   : > { %1360 = vmin.xlane.f32.xlu1 %v1359_v5  ;;  %v1345_v1 = vsel %vm1344_vm5, %v1340_v0, inf  ;;  %v2849_v5 = vld [vmem:[%s3640_s7 + $0x8] sm:$0xff]  }
 0x3e2   : > { %v3415_v14 = vpop.xlane.xlu1 %1384  ;;  %1346 = vmin.xlane.f32.xlu0 %v1345_v1 }
 0x3e3   : > { %v3418_v20 = vpop.xlane.xlu0 %1370  ;;  %vm1386_vm6 = vcmp.eq.f32.partialorder %v3313_v15, %v3415_v14  ;;  %v1396_v15 = vcvt.s32.f32 %v1394_v10  ;;  %v1391_v10 = vcvt.f32.s32 %v3415_v14 }
 0x3e4   : > { %v1387_v13 = vsel %vm1386_vm6, %v1382_v19, inf  ;;  %vm1372_vm7 = vcmp.eq.f32.partialorder %v3319_v17, %v3418_v20  ;;  %v1377_v7 = vcvt.f32.s32 %v3418_v20 }
 0x3e5   : > { %1388 = vmin.xlane.f32.xlu1 %v1387_v13  ;;  %v1373_v9 = vsel %vm1372_vm7, %v1368_v8, inf  ;;  %v1392_v20 = vshll.u32 %v1391_v10, 16  ;;  %v2856_v10 = vld [vmem:[%s3642_s9] sm:$0xff]  }
 0x3e6   : > { %v3425_v21 = vpop.xlane.xlu1 %1412  ;;  %1374 = vmin.xlane.f32.xlu0 %v1373_v9  ;;  %2703 = vmatprep.subr.bf16.mxu0 %v2856_v10 }
 0x3e7   : > { %v3428_v28 = vpop.xlane.xlu0 %1398  ;;  %vm1414_vm8 = vcmp.eq.f32.partialorder %v3329_v22, %v3425_v21  ;;  %v1424_v22 = vcvt.s32.f32 %v1422_v18  ;;  %v2850_v18 = vld [vmem:[%s3640_s7 + $0x10] sm:$0xff]   ;;  %2704 = vmatpush3.bf16.msra.mxu0 %v2856_v10 }
 0x3e8   : > { %v1415_v23 = vsel %vm1414_vm8, %v1410_v27, inf  ;;  %vm1400_vm9 = vcmp.eq.f32.partialorder %v3335_v24, %v3428_v28 }
 0x3e9   : > { %1416 = vmin.xlane.f32.xlu1 %v1415_v23  ;;  %v1401_v17 = vsel %vm1400_vm9, %v1396_v15, inf }
 0x3ea   : > { %v3435_v29 = vpop.xlane.xlu1 %1440  ;;  %1402 = vmin.xlane.f32.xlu0 %v1401_v17  ;;  %v1419_v17 = vcvt.f32.s32 %v3425_v21 }
 0x3eb   : > { %v3438_v37 = vpop.xlane.xlu0 %1426  ;;  %vm1442_vm10 = vcmp.eq.f32.partialorder %v3345_v30, %v3435_v29  ;;  %v1452_v30 = vcvt.s32.f32 %v1450_v26  ;;  %v1378_v26 = vshll.u32 %v1377_v7, 16  ;;  %v1447_v33 = vcvt.f32.s32 %v3435_v29 }
 0x3ec   : > { %v1443_v34 = vsel %vm1442_vm10, %v1438_v36, inf  ;;  %vm1428_vm11 = vcmp.eq.f32.partialorder %v3351_v31, %v3438_v37 }
 0x3ed   : > { %1444 = vmin.xlane.f32.xlu1 %v1443_v34  ;;  %v1429_v24 = vsel %vm1428_vm11, %v1424_v22, inf  ;;  %v1405_v22 = vcvt.f32.s32 %v3428_v28  ;;  %v1420_v28 = vshll.u32 %v1419_v17, 16 }
 0x3ee   : > { %v3445_v39 = vpop.xlane.xlu1 %1468  ;;  %1430 = vmin.xlane.f32.xlu0 %v1429_v24  ;;  %v2851_v24 = vld [vmem:[%s3640_s7 + $0x18] sm:$0xff]  }
 0x3ef   : > { %v3448_v44 = vpop.xlane.xlu0 %1454  ;;  %vm1470_vm12 = vcmp.eq.f32.partialorder %v3361_v40, %v3445_v39 }
 0x3f0   : > { %v1471_v45 = vsel %vm1470_vm12, %v1466_v46, inf  ;;  %vm1456_vm13 = vcmp.eq.f32.partialorder %v3367_v42, %v3448_v44  ;;  %v2848_v42 = vld [vmem:[%s3640_s7] sm:$0xff]   ;;  %v1461_v32 = vcvt.f32.s32 %v3448_v44 }
 0x3f1   : > { %1472 = vmin.xlane.f32.xlu1 %v1471_v45  ;;  %v1457_v31 = vsel %vm1456_vm13, %v1452_v30, inf  ;;  %2671 = vmatprep.subr.bf16.mxu1 %v2848_v42 }
 0x3f2   : > { %v3454_v53 = vpop.xlane.xlu1 %1496  ;;  %1458 = vmin.xlane.f32.xlu0 %v1457_v31  ;;  %v1406_v31 = vshll.u32 %v1405_v22, 16 }
 0x3f3   : > { %v3456_v54 = vpop.xlane.xlu0 %1482  ;;  %vm1498_vm14 = vcmp.eq.f32.partialorder %v3376_v48, %v3454_v53  ;;  %v1308_v48 = vshll.u32 %v1307_v60, 16  ;;  %v1475_v60 = vcvt.f32.s32 %v3445_v39 }
 0x3f4   : > { %v1499_v56 = vsel %vm1498_vm14, %v1494_v35, inf  ;;  %vm1484_vm15 = vcmp.eq.f32.partialorder %v3378_v50, %v3456_v54  ;;  %v1321_v50 = vcvt.f32.s32 %v3398_v4  ;;  %v1349_v4 = vcvt.f32.s32 %v3408_v12 }
 0x3f5   : > { %1500 = vmin.xlane.f32.xlu1 %v1499_v56  ;;  %v1485_v40 = vsel %vm1484_vm15, %v1480_v41, inf  ;;  %v1364_v12 = vshll.u32 %v1363_v52, 16  ;;  %v1433_v35 = vcvt.f32.s32 %v3438_v37  ;;  %v2852_v56 = vld [vmem:[%s3640_s7 + $0x20] sm:$0xff]   ;;  %v1448_v37 = vshll.u32 %v1447_v33, 16 }
 0x3f6   : > { %1486 = vmin.xlane.f32.xlu0 %v1485_v40  ;;  %v1322_v2 = vshll.u32 %v1321_v50, 16  ;;  %v1350_v9 = vshll.u32 %v1349_v4, 16  ;;  %v1476_v44 = vshll.u32 %v1475_v60, 16 }
 0x466   : > { %v1305_v63 = vpop.xlane.xlu1 %1304 }
 0x467   : > { %v1306_v51 = vcvt.f32.s32 %v1305_v63  ;;  %v1291_v3 = vpop.xlane.xlu0 %1290 }
 0x468   : > { %v1292_v57 = vcvt.f32.s32 %v1291_v3  ;;  %v2853_v3 = vld [vmem:[%s3640_s7 + $0x28] sm:$0xff]  }
 0x469   : > { %v1309_v55 = vadd.s32 %v1308_v48, %v1306_v51  ;;  %v1434_v48 = vshll.u32 %v1433_v35, 16 }
 0x46a   : > { %v1295_v59 = vadd.s32 %v1294_v43, %v1292_v57  ;;  %v1333_v62 = vpop.xlane.xlu1 %1332  ;;  %v1503_v57 = vcvt.f32.s32 %v3454_v53 }
 0x46b   : > { %1507 = vst [vmem:[%s3473_s30 + $0x8] sm:$0xff] %v1309_v55  ;;  %v1334_v38 = vcvt.f32.s32 %v1333_v62  ;;  %v1319_v11 = vpop.xlane.xlu0 %1318  ;;  %vm1523_vm1 = vcmp.eq.s32.totalorder %v3252_v47, %v1309_v55  ;;  %v1462_v62 = vshll.u32 %v1461_v32, 16 }
 0x46c   : > { %1506 = vst [vmem:[%s3473_s30] sm:$0xff] %v1295_v59  ;;  %v1320_v0 = vcvt.f32.s32 %v1319_v11  ;;  %vm1522_vm0 = vcmp.eq.s32.totalorder %v3252_v47, %v1295_v59 }
 0x46d   : > { %v1337_v1 = vadd.s32 %v1336_v58, %v1334_v38  ;;  %2647 = vmatprep.mubr.msk.f32.mxu1 %vm1522_vm0, %v2872_v6  ;;  %v1489_v58 = vcvt.f32.s32 %v3456_v54  ;;  %v2854_v38 = vld [vmem:[%s3640_s7 + $0x30] sm:$0xff]   ;;  %v1504_v54 = vshll.u32 %v1503_v57, 16 }
 0x46e   : > { %v1323_v61 = vadd.s32 %v1322_v2, %v1320_v0  ;;  %v1361_v19 = vpop.xlane.xlu1 %1360  ;;  %2648 = vmatmul.mubr.msk.f32.vlgmr.msra.gmra.mrb[16].mxu1 %vm1523_vm1, %v2872_v6 }
 0x46f   : > { %1509 = vst [vmem:[%s3473_s30 + $0x18] sm:$0xff] %v1337_v1  ;;  %v1362_v8 = vcvt.f32.s32 %v1361_v19  ;;  %v1347_v13 = vpop.xlane.xlu0 %1346  ;;  %2672 = vmatpush3.bf16.msra.mxu1 %v2848_v42  ;;  %vm1525_vm3 = vcmp.eq.s32.totalorder %v3252_v47, %v1337_v1 }
 0x470   : > { %1508 = vst [vmem:[%s3473_s30 + $0x10] sm:$0xff] %v1323_v61  ;;  %v1348_v27 = vcvt.f32.s32 %v1347_v13  ;;  %vm1524_vm2 = vcmp.eq.s32.totalorder %v3252_v47, %v1323_v61  ;;  %2673 = vmatprep.subr.bf16.mxu1 %v2849_v5  ;;  %v2860_v13 = vld [vmem:[%s3642_s9 + $0x20] sm:$0xff]  }
 0x471   : > { %v1365_v15 = vadd.s32 %v1364_v12, %v1362_v8  ;;  %2650 = vmatprep.mubr.msk.f32.mxu1 %vm1524_vm2, %v2872_v6  ;;  %v2855_v12 = vld [vmem:[%s3640_s7 + $0x38] sm:$0xff]   ;;  %v2857_v8 = vld [vmem:[%s3642_s9 + $0x8] sm:$0xff]  }
 0x472   : > { %v1351_v14 = vadd.s32 %v1350_v9, %v1348_v27  ;;  %v1389_v23 = vpop.xlane.xlu1 %1388  ;;  %2651 = vmatmul.mubr.msk.f32.gmra.mrb[18].mxu1 %vm1525_vm3, %v2872_v6  ;;  %2705 = vmatprep.subr.bf16.mxu0 %v2857_v8  ;;  %v2861_v9 = vld [vmem:[%s3642_s9 + $0x28] sm:$0xff]  }
 0x473   : > { %1511 = vst [vmem:[%s3473_s30 + $0x28] sm:$0xff] %v1365_v15  ;;  %v1390_v16 = vcvt.f32.s32 %v1389_v23  ;;  %v1375_v36 = vpop.xlane.xlu0 %1374  ;;  %2674 = vmatpush3.bf16.msra.mxu1 %v2849_v5  ;;  %vm1527_vm5 = vcmp.eq.s32.totalorder %v3252_v47, %v1365_v15  ;;  %v1490_v5 = vshll.u32 %v1489_v58, 16  ;;  %2706 = vmatpush3.bf16.msra.mxu0 %v2857_v8 }
 0x474   : > { %1510 = vst [vmem:[%s3473_s30 + $0x20] sm:$0xff] %v1351_v14  ;;  %v1376_v34 = vcvt.f32.s32 %v1375_v36  ;;  %vm1526_vm4 = vcmp.eq.s32.totalorder %v3252_v47, %v1351_v14  ;;  %2675 = vmatprep.subr.bf16.mxu1 %v2850_v18 }
 0x475   : > { %v1393_v25 = vadd.s32 %v1392_v20, %v1390_v16  ;;  %2653 = vmatprep.mubr.msk.f32.mxu1 %vm1526_vm4, %v2872_v6 }
 0x476   : > { %v1379_v21 = vadd.s32 %v1378_v26, %v1376_v34  ;;  %v1417_v46 = vpop.xlane.xlu1 %1416  ;;  %2654 = vmatmul.mubr.msk.f32.gmra.mrb[20].mxu1 %vm1527_vm5, %v2872_v6 }
 0x477   : > { %1513 = vst [vmem:[%s3473_s30 + $0x38] sm:$0xff] %v1393_v25  ;;  %v1418_v30 = vcvt.f32.s32 %v1417_v46  ;;  %v1403_v45 = vpop.xlane.xlu0 %1402  ;;  %2676 = vmatpush3.bf16.msra.mxu1 %v2850_v18  ;;  %vm1529_vm7 = vcmp.eq.s32.totalorder %v3252_v47, %v1393_v25 }
 0x478   : > { %1512 = vst [vmem:[%s3473_s30 + $0x30] sm:$0xff] %v1379_v21  ;;  %v1404_v41 = vcvt.f32.s32 %v1403_v45  ;;  %vm1528_vm6 = vcmp.eq.s32.totalorder %v3252_v47, %v1379_v21  ;;  %2677 = vmatprep.subr.bf16.mxu1 %v2851_v24 }
 0x479   : > { %v1421_v40 = vadd.s32 %v1420_v28, %v1418_v30  ;;  %2656 = vmatprep.mubr.msk.f32.mxu1 %vm1528_vm6, %v2872_v6 }
 0x47a   : > { %v1407_v29 = vadd.s32 %v1406_v31, %v1404_v41  ;;  %v1445_v42 = vpop.xlane.xlu1 %1444  ;;  %2657 = vmatmul.mubr.msk.f32.gmra.mrb[22].mxu1 %vm1529_vm7, %v2872_v6 }
 0x47b   : > { %1515 = vst [vmem:[%s3473_s30 + $0x48] sm:$0xff] %v1421_v40  ;;  %v1446_v49 = vcvt.f32.s32 %v1445_v42  ;;  %v1431_v63 = vpop.xlane.xlu0 %1430  ;;  %2678 = vmatpush3.bf16.msra.mxu1 %v2851_v24  ;;  %vm1531_vm9 = vcmp.eq.s32.totalorder %v3252_v47, %v1421_v40  ;;  %v2863_v40 = vld [vmem:[%s3642_s9 + $0x38] sm:$0xff]  }
 0x47c   : > { %1514 = vst [vmem:[%s3473_s30 + $0x40] sm:$0xff] %v1407_v29  ;;  %v1432_v51 = vcvt.f32.s32 %v1431_v63  ;;  %vm1530_vm8 = vcmp.eq.s32.totalorder %v3252_v47, %v1407_v29  ;;  %2679 = vmatprep.subr.bf16.mxu1 %v2852_v56  ;;  %v2347_v29 = vld [vmem:[%s3641_s8] ss:$0 sm:$0xff] }
 0x47d   : > { %v1449_v43 = vadd.s32 %v1448_v37, %v1446_v49  ;;  %2659 = vmatprep.mubr.msk.f32.mxu1 %vm1530_vm8, %v2872_v6 }
 0x47e   : > { %v1435_v39 = vadd.s32 %v1434_v48, %v1432_v51  ;;  %v1473_v50 = vpop.xlane.xlu1 %1472  ;;  %2660 = vmatmul.mubr.msk.f32.gmra.mrb[24].mxu1 %vm1531_vm9, %v2872_v6 }
 0x47f   : > { %1517 = vst [vmem:[%s3473_s30 + $0x58] sm:$0xff] %v1449_v43  ;;  %v1474_v55 = vcvt.f32.s32 %v1473_v50  ;;  %v1459_v59 = vpop.xlane.xlu0 %1458  ;;  %2680 = vmatpush3.bf16.msra.mxu1 %v2852_v56  ;;  %vm1533_vm11 = vcmp.eq.s32.totalorder %v3252_v47, %v1449_v43  ;;  %v2862_v56 = vld [vmem:[%s3642_s9 + $0x30] sm:$0xff]  }
 0x480   : > { %1516 = vst [vmem:[%s3473_s30 + $0x50] sm:$0xff] %v1435_v39  ;;  %v1460_v52 = vcvt.f32.s32 %v1459_v59  ;;  %vm1532_vm10 = vcmp.eq.s32.totalorder %v3252_v47, %v1435_v39  ;;  %2681 = vmatprep.subr.bf16.mxu1 %v2853_v3 }
 0x481   : > { %v1477_v11 = vadd.s32 %v1476_v44, %v1474_v55  ;;  %2662 = vmatprep.mubr.msk.f32.mxu1 %vm1532_vm10, %v2872_v6 }
 0x482   : > { %v1463_v53 = vadd.s32 %v1462_v62, %v1460_v52  ;;  %v1501_v2 = vpop.xlane.xlu1 %1500  ;;  %2663 = vmatmul.mubr.msk.f32.gmra.mrb[26].mxu1 %vm1533_vm11, %v2872_v6 }
 0x483   : > { %1519 = vst [vmem:[%s3473_s30 + $0x68] sm:$0xff] %v1477_v11  ;;  %v1502_v4 = vcvt.f32.s32 %v1501_v2  ;;  %v1487_v0 = vpop.xlane.xlu0 %1486  ;;  %2682 = vmatpush3.bf16.msra.mxu1 %v2853_v3  ;;  %vm1535_vm13 = vcmp.eq.s32.totalorder %v3252_v47, %v1477_v11 }
 0x484   : > { %1518 = vst [vmem:[%s3473_s30 + $0x60] sm:$0xff] %v1463_v53  ;;  %v1488_v1 = vcvt.f32.s32 %v1487_v0  ;;  %vm1534_vm12 = vcmp.eq.s32.totalorder %v3252_v47, %v1463_v53  ;;  %2683 = vmatprep.subr.bf16.mxu1 %v2854_v38 }
 0x485   : > { %v1505_v61 = vadd.s32 %v1504_v54, %v1502_v4  ;;  %2665 = vmatprep.mubr.msk.f32.mxu1 %vm1534_vm12, %v2872_v6 }
 0x486   : > { %v1491_v19 = vadd.s32 %v1490_v5, %v1488_v1  ;;  %2666 = vmatmul.mubr.msk.f32.gmra.mrb[28].mxu1 %vm1535_vm13, %v2872_v6 }
 0x487   : > { %1521 = vst [vmem:[%s3473_s30 + $0x78] sm:$0xff] %v1505_v61  ;;  %2684 = vmatpush3.bf16.msra.mxu1 %v2854_v38  ;;  %vm1537_vm15 = vcmp.eq.s32.totalorder %v3252_v47, %v1505_v61 }
 0x488   : > { %1520 = vst [vmem:[%s3473_s30 + $0x70] sm:$0xff] %v1491_v19  ;;  %vm1536_vm14 = vcmp.eq.s32.totalorder %v3252_v47, %v1491_v19  ;;  %2685 = vmatprep.subr.bf16.mxu1 %v2855_v12  ;;  %v2858_v47 = vld [vmem:[%s3642_s9 + $0x10] sm:$0xff]  }
 0x489   : > { %2668 = vmatprep.mubr.msk.f32.mxu1 %vm1536_vm14, %v2872_v6  ;;  %2707 = vmatprep.subr.bf16.mxu0 %v2858_v47 }
 0x48a   : > { %2669 = vmatmul.mubr.msk.f32.gmra.mrb[30].mxu1 %vm1537_vm15, %v2872_v6  ;;  %v2859_v6 = vld [vmem:[%s3642_s9 + $0x18] sm:$0xff]   ;;  %2708 = vmatpush3.bf16.msra.mxu0 %v2858_v47 }
 0x48b   : > { %2686 = vmatpush3.bf16.msra.mxu1 %v2855_v12  ;;  %2709 = vmatprep.subr.bf16.mxu0 %v2859_v6 }
 0x48c   : > { %2799 = vmatprep.subr.bf16.mxu1 %v2856_v10 }
 0x48e   : > { %2710 = vmatpush3.bf16.msra.mxu0 %v2859_v6 }
 0x48f   : > { %2711 = vmatprep.subr.bf16.mxu0 %v2860_v13 }
 0x492   : > { %2712 = vmatpush3.bf16.msra.mxu0 %v2860_v13 }
 0x493   : > { %2713 = vmatprep.subr.bf16.mxu0 %v2861_v9 }
 0x496   : > { %2714 = vmatpush3.bf16.msra.mxu0 %v2861_v9 }
 0x497   : > { %2715 = vmatprep.subr.bf16.mxu0 %v2862_v56 }
 0x49a   : > { %2716 = vmatpush3.bf16.msra.mxu0 %v2862_v56 }
 0x49b   : > { %2717 = vmatprep.subr.bf16.mxu0 %v2863_v40 }
 0x49e   : > { %2718 = vmatpush3.bf16.msra.mxu0 %v2863_v40 }
 0x541   : > { %v2649_v7 = vpop.f32.mrb[16].mxu1 }
 0x542   : > { %1716 = vst [vmem:[%s3578_s15 + $0x8] sm:$0xff] %v2649_v7  ;;  %v1636_v27 = vpop.f32.mrb[17].mxu1 }
 0x543   : > { %1715 = vst [vmem:[%s3578_s15] sm:$0xff] %v1636_v27  ;;  %v1731_v18 = vpack.c.bf16 %v2649_v7, %v1636_v27 }
 0x545   : > { %v2652_v15 = vpop.f32.mrb[18].mxu1  ;;  %2687 = vmatprep.mubr.bf16.mxu1 %v1731_v18 }
 0x546   : > { %1718 = vst [vmem:[%s3578_s15 + $0x18] sm:$0xff] %v2652_v15  ;;  %v1646_v14 = vpop.f32.mrb[19].mxu1 }
 0x547   : > { %1717 = vst [vmem:[%s3578_s15 + $0x10] sm:$0xff] %v1646_v14  ;;  %v1732_v23 = vpack.c.bf16 %v2652_v15, %v1646_v14 }
 0x549   : > { %v2655_v20 = vpop.f32.mrb[20].mxu1  ;;  %2688 = vmatmul.mubr.bf16.vlgmr.msra.gmra.mrb[32].mxu1 %v1732_v23 }
 0x54a   : > { %1720 = vst [vmem:[%s3578_s15 + $0x28] sm:$0xff] %v2655_v20  ;;  %v1656_v17 = vpop.f32.mrb[21].mxu1  ;;  %2807 = vmatpush3.bf16.msra.mxu1 %v2856_v10 }
 0x54b   : > { %1719 = vst [vmem:[%s3578_s15 + $0x20] sm:$0xff] %v1656_v17  ;;  %v1733_v16 = vpack.c.bf16 %v2655_v20, %v1656_v17  ;;  %2800 = vmatprep.subr.bf16.mxu1 %v2857_v8 }
 0x54d   : > { %v2658_v36 = vpop.f32.mrb[22].mxu1  ;;  %2691 = vmatprep.mubr.bf16.mxu1 %v1733_v16 }
 0x54e   : > { %1722 = vst [vmem:[%s3578_s15 + $0x38] sm:$0xff] %v2658_v36  ;;  %v1666_v26 = vpop.f32.mrb[23].mxu1  ;;  %2808 = vmatpush3.bf16.msra.mxu1 %v2857_v8 }
 0x54f   : > { %1721 = vst [vmem:[%s3578_s15 + $0x30] sm:$0xff] %v1666_v26  ;;  %v1734_v22 = vpack.c.bf16 %v2658_v36, %v1666_v26  ;;  %2801 = vmatprep.subr.bf16.mxu1 %v2858_v47 }
 0x551   : > { %v2661_v34 = vpop.f32.mrb[24].mxu1  ;;  %2692 = vmatmul.mubr.bf16.gmra.mrb[36].mxu1 %v1734_v22 }
 0x552   : > { %1724 = vst [vmem:[%s3578_s15 + $0x48] sm:$0xff] %v2661_v34  ;;  %v1676_v24 = vpop.f32.mrb[25].mxu1  ;;  %2809 = vmatpush3.bf16.msra.mxu1 %v2858_v47 }
 0x553   : > { %1723 = vst [vmem:[%s3578_s15 + $0x40] sm:$0xff] %v1676_v24  ;;  %v1735_v25 = vpack.c.bf16 %v2661_v34, %v1676_v24  ;;  %2802 = vmatprep.subr.bf16.mxu1 %v2859_v6 }
 0x555   : > { %v2664_v21 = vpop.f32.mrb[26].mxu1  ;;  %2695 = vmatprep.mubr.bf16.mxu1 %v1735_v25 }
 0x556   : > { %1726 = vst [vmem:[%s3578_s15 + $0x58] sm:$0xff] %v2664_v21  ;;  %v1686_v46 = vpop.f32.mrb[27].mxu1  ;;  %2810 = vmatpush3.bf16.msra.mxu1 %v2859_v6 }
 0x557   : > { %1725 = vst [vmem:[%s3578_s15 + $0x50] sm:$0xff] %v1686_v46  ;;  %v1736_v28 = vpack.c.bf16 %v2664_v21, %v1686_v46  ;;  %2803 = vmatprep.subr.bf16.mxu1 %v2860_v13 }
 0x559   : > { %v2667_v33 = vpop.f32.mrb[28].mxu1  ;;  %2696 = vmatmul.mubr.bf16.gmra.mrb[40].mxu1 %v1736_v28 }
 0x55a   : > { %1728 = vst [vmem:[%s3578_s15 + $0x68] sm:$0xff] %v2667_v33  ;;  %v1696_v30 = vpop.f32.mrb[29].mxu1  ;;  %2811 = vmatpush3.bf16.msra.mxu1 %v2860_v13 }
 0x55b   : > { %1727 = vst [vmem:[%s3578_s15 + $0x60] sm:$0xff] %v1696_v30  ;;  %v1737_v45 = vpack.c.bf16 %v2667_v33, %v1696_v30  ;;  %2804 = vmatprep.subr.bf16.mxu1 %v2861_v9  ;;  %v2356_v30 = vld [vmem:[%s3643_s10] ss:$0 sm:$0xff] }
 0x55d   : > { %v2670_v31 = vpop.f32.mrb[30].mxu1  ;;  %2699 = vmatprep.mubr.bf16.mxu1 %v1737_v45 }
 0x55e   : > { %1730 = vst [vmem:[%s3578_s15 + $0x78] sm:$0xff] %v2670_v31  ;;  %v1706_v35 = vpop.f32.mrb[31].mxu1  ;;  %2812 = vmatpush3.bf16.msra.mxu1 %v2861_v9 }
 0x55f   : > { %1729 = vst [vmem:[%s3578_s15 + $0x70] sm:$0xff] %v1706_v35  ;;  %v1738_v41 = vpack.c.bf16 %v2670_v31, %v1706_v35  ;;  %2805 = vmatprep.subr.bf16.mxu1 %v2862_v56 }
 0x561   : > { %2700 = vmatmul.mubr.bf16.gmra.mrb[44].mxu1 %v1738_v41 }
 0x562   : > { %2813 = vmatpush3.bf16.msra.mxu1 %v2862_v56 }
 0x563   : > { %2806 = vmatprep.subr.bf16.mxu1 %v2863_v40 }
 0x566   : > { %2814 = vmatpush3.bf16.msra.mxu1 %v2863_v40 }
 0x61c   : > { %v2689_v42 = vpop.f32.mrb[32].mxu1 }
 0x61d   : > { %v1853_v37 = vadd.f32 %v2689_v42, %v2347_v29  ;;  %v1844_v60 = vpop.f32.mrb[33].mxu1 }
 0x61e   : > { %v1845_v49 = vadd.f32 %v2347_v29, %v1844_v60  ;;  %v2690_v63 = vpop.f32.mrb[34].mxu1 }
 0x61f   : > { %v1856_v48 = vadd.f32 %v2690_v63, %v2347_v29  ;;  %v1847_v32 = vpop.f32.mrb[35].mxu1  ;;  %v1909_v3 = vmax.f32 %v1853_v37, 0.0 }
 0x620   : > { %v1848_v51 = vadd.f32 %v2347_v29, %v1847_v32  ;;  %v1907_v39 = vmax.f32 %v1845_v49, 0.0 }
 0x621   : > { %v1910_v43 = vmax.f32 %v1856_v48, 0.0 }
 0x622   : > { %v1908_v50 = vmax.f32 %v1848_v51, 0.0 }
 0x623   : > { %v1924_v44 = vpack.c.bf16 %v1910_v43, %v1909_v3 }
 0x624   : > { %v1923_v57 = vpack.c.bf16 %v1908_v50, %v1907_v39  ;;  %v2693_v55 = vpop.f32.mrb[36].mxu1 }
 0x625   : > { %v1869_v59 = vadd.f32 %v2693_v55, %v2347_v29  ;;  %v1860_v62 = vpop.f32.mrb[37].mxu1 }
 0x626   : > { %v1861_v58 = vadd.f32 %v2347_v29, %v1860_v62  ;;  %v2694_v52 = vpop.f32.mrb[38].mxu1  ;;  %2719 = vmatprep.mubr.bf16.mxu0 %v1923_v57 }
 0x627   : > { %v1872_v38 = vadd.f32 %v2694_v52, %v2347_v29  ;;  %v1863_v11 = vpop.f32.mrb[39].mxu1  ;;  %2720 = vmatmul.mubr.bf16.vlgmr.msra.gmra.mrb[32].mxu0 %v1924_v44  ;;  %v1913_v2 = vmax.f32 %v1869_v59, 0.0 }
 0x628   : > { %v1864_v53 = vadd.f32 %v2347_v29, %v1863_v11  ;;  %v1911_v4 = vmax.f32 %v1861_v58, 0.0 }
 0x629   : > { %v1914_v54 = vmax.f32 %v1872_v38, 0.0 }
 0x62a   : > { %v1912_v0 = vmax.f32 %v1864_v53, 0.0 }
 0x62b   : > { %v1926_v5 = vpack.c.bf16 %v1914_v54, %v1913_v2 }
 0x62c   : > { %v1925_v1 = vpack.c.bf16 %v1912_v0, %v1911_v4  ;;  %v2697_v61 = vpop.f32.mrb[40].mxu1 }
 0x62d   : > { %v1885_v19 = vadd.f32 %v2697_v61, %v2347_v29  ;;  %v1876_v12 = vpop.f32.mrb[41].mxu1 }
 0x62e   : > { %v1877_v10 = vadd.f32 %v2347_v29, %v1876_v12  ;;  %v2698_v8 = vpop.f32.mrb[42].mxu1  ;;  %2723 = vmatprep.mubr.bf16.mxu0 %v1925_v1 }
 0x62f   : > { %v1888_v47 = vadd.f32 %v2698_v8, %v2347_v29  ;;  %v1879_v6 = vpop.f32.mrb[43].mxu1  ;;  %2724 = vmatmul.mubr.bf16.gmra.mrb[36].mxu0 %v1926_v5  ;;  %v1917_v9 = vmax.f32 %v1885_v19, 0.0 }
 0x630   : > { %v1880_v13 = vadd.f32 %v2347_v29, %v1879_v6  ;;  %v1915_v27 = vmax.f32 %v1877_v10, 0.0 }
 0x631   : > { %v1918_v7 = vmax.f32 %v1888_v47, 0.0 }
 0x632   : > { %v1916_v18 = vmax.f32 %v1880_v13, 0.0 }
 0x633   : > { %v1928_v15 = vpack.c.bf16 %v1918_v7, %v1917_v9 }
 0x634   : > { %v1927_v14 = vpack.c.bf16 %v1916_v18, %v1915_v27  ;;  %v2701_v23 = vpop.f32.mrb[44].mxu1 }
 0x635   : > { %v1901_v20 = vadd.f32 %v2701_v23, %v2347_v29  ;;  %v1892_v17 = vpop.f32.mrb[45].mxu1 }
 0x636   : > { %v1893_v16 = vadd.f32 %v2347_v29, %v1892_v17  ;;  %v2702_v36 = vpop.f32.mrb[46].mxu1  ;;  %2727 = vmatprep.mubr.bf16.mxu1 %v1927_v14 }
 0x637   : > { %v1904_v26 = vadd.f32 %v2702_v36, %v2347_v29  ;;  %v1895_v22 = vpop.f32.mrb[47].mxu1  ;;  %2728 = vmatmul.mubr.bf16.vlgmr.msra.gmra.mrb[48].mxu1 %v1928_v15  ;;  %v1921_v24 = vmax.f32 %v1901_v20, 0.0 }
 0x638   : > { %v1896_v34 = vadd.f32 %v2347_v29, %v1895_v22  ;;  %v1919_v21 = vmax.f32 %v1893_v16, 0.0 }
 0x639   : > { %v1922_v25 = vmax.f32 %v1904_v26, 0.0 }
 0x63a   : > { %v1920_v46 = vmax.f32 %v1896_v34, 0.0 }
 0x63b   : > { %v1930_v28 = vpack.c.bf16 %v1922_v25, %v1921_v24 }
 0x63c   : > { %v1929_v33 = vpack.c.bf16 %v1920_v46, %v1919_v21 }
 0x63e   : > { %2731 = vmatprep.mubr.bf16.mxu1 %v1929_v33 }
 0x63f   : > { %2732 = vmatmul.mubr.bf16.gmra.mrb[52].mxu1 %v1930_v28 }
 0x6fa   : > { %v2721_v45 = vpop.f32.mrb[32].mxu0 }
 0x6fb   : > { %v2045_v31 = vadd.f32 %v2721_v45, %v2356_v30  ;;  %v2036_v35 = vpop.f32.mrb[33].mxu0 }
 0x6fc   : > { %v2037_v41 = vadd.f32 %v2356_v30, %v2036_v35  ;;  %v2722_v56 = vpop.f32.mrb[34].mxu0 }
 0x6fd   : > { %2101 = vst [vmem:[%s3612_s27 + $0x10] sm:$0xff] %v2045_v31  ;;  %v2048_v40 = vadd.f32 %v2722_v56, %v2356_v30  ;;  %v2039_v29 = vpop.f32.mrb[35].mxu0 }
 0x6fe   : > { %2099 = vst [vmem:[%s3612_s27] sm:$0xff] %v2037_v41  ;;  %v2040_v42 = vadd.f32 %v2356_v30, %v2039_v29 }
 0x6ff   : > { %2102 = vst [vmem:[%s3612_s27 + $0x18] sm:$0xff] %v2048_v40 }
 0x700   : > { %2100 = vst [vmem:[%s3612_s27 + $0x8] sm:$0xff] %v2040_v42 }
 0x702   : > { %v2725_v37 = vpop.f32.mrb[36].mxu0 }
 0x703   : > { %v2061_v60 = vadd.f32 %v2725_v37, %v2356_v30  ;;  %v2052_v49 = vpop.f32.mrb[37].mxu0 }
 0x704   : > { %v2053_v63 = vadd.f32 %v2356_v30, %v2052_v49  ;;  %v2726_v48 = vpop.f32.mrb[38].mxu0 }
 0x705   : > { %2105 = vst [vmem:[%s3612_s27 + $0x30] sm:$0xff] %v2061_v60  ;;  %v2064_v32 = vadd.f32 %v2726_v48, %v2356_v30  ;;  %v2055_v51 = vpop.f32.mrb[39].mxu0 }
 0x706   : > { %2103 = vst [vmem:[%s3612_s27 + $0x20] sm:$0xff] %v2053_v63  ;;  %v2056_v3 = vadd.f32 %v2356_v30, %v2055_v51 }
 0x707   : > { %2106 = vst [vmem:[%s3612_s27 + $0x38] sm:$0xff] %v2064_v32 }
 0x708   : > { %2104 = vst [vmem:[%s3612_s27 + $0x28] sm:$0xff] %v2056_v3 }
 0x70a   : > { %v2729_v43 = vpop.f32.mrb[48].mxu1 }
 0x70b   : > { %v2077_v39 = vadd.f32 %v2729_v43, %v2356_v30  ;;  %v2068_v50 = vpop.f32.mrb[49].mxu1 }
 0x70c   : > { %v2069_v44 = vadd.f32 %v2356_v30, %v2068_v50  ;;  %v2730_v57 = vpop.f32.mrb[50].mxu1 }
 0x70d   : > { %2109 = vst [vmem:[%s3612_s27 + $0x50] sm:$0xff] %v2077_v39  ;;  %v2080_v55 = vadd.f32 %v2730_v57, %v2356_v30  ;;  %v2071_v59 = vpop.f32.mrb[51].mxu1 }
 0x70e   : > { %2107 = vst [vmem:[%s3612_s27 + $0x40] sm:$0xff] %v2069_v44  ;;  %v2072_v62 = vadd.f32 %v2356_v30, %v2071_v59 }
 0x70f   : > { %2110 = vst [vmem:[%s3612_s27 + $0x58] sm:$0xff] %v2080_v55 }
 0x710   : > { %2108 = vst [vmem:[%s3612_s27 + $0x48] sm:$0xff] %v2072_v62 }
 0x712   : > { %v2733_v58 = vpop.f32.mrb[52].mxu1 }
 0x713   : > { %v2093_v52 = vadd.f32 %v2733_v58, %v2356_v30  ;;  %v2084_v38 = vpop.f32.mrb[53].mxu1 }
 0x714   : > { %v2085_v11 = vadd.f32 %v2356_v30, %v2084_v38  ;;  %v2734_v53 = vpop.f32.mrb[54].mxu1 }
 0x715   : > { %2113 = vst [vmem:[%s3612_s27 + $0x70] sm:$0xff] %v2093_v52  ;;  %v2096_v2 = vadd.f32 %v2734_v53, %v2356_v30  ;;  %v2087_v54 = vpop.f32.mrb[55].mxu1 }
 0x716   : > { %2111 = vst [vmem:[%s3612_s27 + $0x60] sm:$0xff] %v2085_v11  ;;  %v2088_v4 = vadd.f32 %v2356_v30, %v2087_v54 }
 0x717   : > { %2114 = vst [vmem:[%s3612_s27 + $0x78] sm:$0xff] %v2096_v2 }
 0x718   : > { %2112 = vst [vmem:[%s3612_s27 + $0x68] sm:$0xff] %v2088_v4 }
 0x719 PF: > { %s25_s29 = sadd.s32 1, %s2870_s29  }
 0x71a   : > { %p22_p4 = scmp.ge.s32.totalorder %s25_s29, 4  }
 0x71c   :  { %24 = sbr.rel (!%p22_p4) target bundleno = 1 (0x1), region = 130 }

// kernel: vqvae_forward.1
= control target key start
LH: loop header
LB: loop body
LE: loop exit
PB: predicated region body
PF: predicated region fallthrough
CT: control target
= control target key end

     0   :  { %s2948_s29 = smov 0   ;;  %s3633_s0 = inlined_call_operand.vmem [shape: bf16[256,128], index: 0, kind: input, shape index: {}]   ;;  %s3634_s1 = inlined_call_operand.vmem [shape: bf16[128,128], index: 1, kind: input, shape index: {}]   ;;  %s3635_s2 = inlined_call_operand.vmem [shape: f32[1,128], index: 2, kind: input, shape index: {}]   ;;  %s3636_s3 = inlined_call_operand.vmem [shape: bf16[128,128], index: 3, kind: input, shape index: {}]   ;;  %s3637_s4 = inlined_call_operand.vmem [shape: f32[1,128], index: 4, kind: input, shape index: {}]   ;;  %s3638_s5 = inlined_call_operand.vmem [shape: f32[128,128], index: 5, kind: input, shape index: {}]   ;;  %s3639_s6 = inlined_call_operand.vmem [shape: f32[1,128], index: 6, kind: input, shape index: {}]   ;;  %s3640_s7 = inlined_call_operand.vmem [shape: bf16[128,128], index: 7, kind: input, shape index: {}]   ;;  %s3641_s8 = inlined_call_operand.vmem [shape: f32[1,128], index: 8, kind: input, shape index: {}]   ;;  %s3642_s9 = inlined_call_operand.vmem [shape: bf16[128,128], index: 9, kind: input, shape index: {}]   ;;  %s3643_s10 = inlined_call_operand.vmem [shape: f32[1,128], index: 10, kind: input, shape index: {}]   ;;  %s3644_s11 = inlined_call_operand.vmem [shape: f32[256,128], index: 11, kind: output, shape index: {0}]   ;;  %s3645_s12 = inlined_call_operand.vmem [shape: f32[256,128], index: 12, kind: output, shape index: {1}]   ;;  %s3646_s13 = inlined_call_operand.vmem [shape: f32[256,128], index: 13, kind: output, shape index: {2}]   ;;  %s3647_s14 = inlined_call_operand.vmem [shape: s32[256,128], index: 14, kind: output, shape index: {3}]  }
   0x1 LB: > { %s2273_s30 = sadd.s32 4294967295, %s2870_s29   ;;  %p2277_p0 = scmp.ge.s32.totalorder %s2870_s29, 1  ;;  %s2870_s29 = sphi %s2948_s29, %s25_s29  }
   0x2   : > { %p420_p1 = scmp.lt.s32.totalorder %s2870_s29, 3 }
   0x4   : > { %p421_p2 = pnand %p2277_p0, %p420_p1 }
   0x5   : > { %v2824_v0 = vld [vmem:[%s3634_s1] sm:$0xff] (!%p421_p2)   ;;  %s2278_s17 = sshll.u32 (!%p421_p2), %s2273_s30, 4  ;;  %v2825_v1 = vld [vmem:[%s3634_s1 + $0x8] sm:$0xff] (!%p421_p2)   ;;  %v2826_v2 = vld [vmem:[%s3634_s1 + $0x10] sm:$0xff] (!%p421_p2)  }
   0x6   : > { %424 = sbr.rel (%p421_p2) target bundleno = 1817 (0x719), region = 64  ;;  %p482_p3 = scmp.lt.s32.totalorder (!%p421_p2), %s2278_s17, 31  ;;  %2495 = vmatprep.subr.bf16.mxu0 (!%p421_p2), %v2824_v0  ;;  %v2827_v3 = vld [vmem:[%s3634_s1 + $0x18] sm:$0xff] (!%p421_p2)   ;;  %v2828_v5 = vld [vmem:[%s3634_s1 + $0x20] sm:$0xff] (!%p421_p2)   ;;  %v2829_v6 = vld [vmem:[%s3634_s1 + $0x28] sm:$0xff] (!%p421_p2)  }
   0x7   : > { %2496 = vmatpush3.bf16.msra.mxu0 (!%p421_p2), %v2824_v0  ;;  %v2840_v7 = vld [vmem:[%s3636_s3] sm:$0xff] (!%p421_p2)   ;;  %v2841_v8 = vld [vmem:[%s3636_s3 + $0x8] sm:$0xff] (!%p421_p2)   ;;  %v2830_v9 = vld [vmem:[%s3634_s1 + $0x30] sm:$0xff] (!%p421_p2)  }
   0x8   : > { %2497 = vmatprep.subr.bf16.mxu0 (!%p421_p2), %v2825_v1  ;;  %2527 = vmatprep.subr.bf16.mxu1 (!%p421_p2), %v2840_v7  ;;  %v2842_v10 = vld [vmem:[%s3636_s3 + $0x10] sm:$0xff] (!%p421_p2)   ;;  %v2831_v11 = vld [vmem:[%s3634_s1 + $0x38] sm:$0xff] (!%p421_p2)   ;;  %v2844_v13 = vld [vmem:[%s3636_s3 + $0x20] sm:$0xff] (!%p421_p2)  }
   0x9   : > { %2528 = vmatpush3.bf16.msra.mxu1 (!%p421_p2), %v2840_v7  ;;  %v2843_v12 = vld [vmem:[%s3636_s3 + $0x18] sm:$0xff] (!%p421_p2)   ;;  %v2845_v16 = vld [vmem:[%s3636_s3 + $0x28] sm:$0xff] (!%p421_p2)   ;;  %v2846_v22 = vld [vmem:[%s3636_s3 + $0x30] sm:$0xff] (!%p421_p2)  }
   0xa   : > { %2529 = vmatprep.subr.bf16.mxu1 (!%p421_p2), %v2841_v8  ;;  %v2847_v23 = vld [vmem:[%s3636_s3 + $0x38] sm:$0xff] (!%p421_p2)   ;;  %v952_v24 = vld [vmem:[%s3638_s5] sm:$0xff] (!%p421_p2)  ;;  %v953_v25 = vld [vmem:[%s3638_s5 + $0x8] sm:$0xff] (!%p421_p2) }
   0xb   : > { %2498 = vmatpush3.bf16.msra.mxu0 (!%p421_p2), %v2825_v1  ;;  %v954_v26 = vld [vmem:[%s3638_s5 + $0x10] sm:$0xff] (!%p421_p2)  ;;  %v3029_v27 = vpack.c.bf16 (!%p421_p2), %v953_v25, %v952_v24  ;;  %v955_v28 = vld [vmem:[%s3638_s5 + $0x18] sm:$0xff] (!%p421_p2)  ;;  %v956_v30 = vld [vmem:[%s3638_s5 + $0x20] sm:$0xff] (!%p421_p2) }
   0xc   : > { %2499 = vmatprep.subr.bf16.mxu0 (!%p421_p2), %v2826_v2  ;;  %v3034_v29 = vpack.c.bf16 (!%p421_p2), %v955_v28, %v954_v26  ;;  %v957_v31 = vld [vmem:[%s3638_s5 + $0x28] sm:$0xff] (!%p421_p2)  ;;  %v958_v33 = vld [vmem:[%s3638_s5 + $0x30] sm:$0xff] (!%p421_p2)  ;;  %v959_v34 = vld [vmem:[%s3638_s5 + $0x38] sm:$0xff] (!%p421_p2) }
   0xd   : > { %s3649_s17 = smov (!%p482_p3, %s2278_s17), 31  ;;  %2530 = vmatpush3.bf16.msra.mxu1 %v2841_v8  ;;  %v3046_v32 = vpack.c.bf16 %v957_v31, %v956_v30  ;;  %v3056_v35 = vpack.c.bf16 %v959_v34, %v958_v33  ;;  %v960_v36 = vld [vmem:[%s3638_s5 + $0x40] sm:$0xff]  ;;  %v961_v37 = vld [vmem:[%s3638_s5 + $0x48] sm:$0xff]  ;;  %v962_v39 = vld [vmem:[%s3638_s5 + $0x50] sm:$0xff] }
   0xe   : > { %s2279_s22 = sshll.u32 %s3649_s17, 2  ;;  %2531 = vmatprep.subr.bf16.mxu1 %v2842_v10  ;;  %v3066_v38 = vpack.c.bf16 %v961_v37, %v960_v36  ;;  %v963_v40 = vld [vmem:[%s3638_s5 + $0x58] sm:$0xff]  ;;  %v964_v42 = vld [vmem:[%s3638_s5 + $0x60] sm:$0xff]  ;;  %v965_v43 = vld [vmem:[%s3638_s5 + $0x68] sm:$0xff]  ;;  %s3138_s16 = sshll.u32 %s3649_s17, 3 }
   0xf   : > { %s2971_s25 = scalar_lea.vmem %s3633_s0, %s2279_s22  ;;  %2500 = vmatpush3.bf16.msra.mxu0 %v2826_v2  ;;  %v3076_v41 = vpack.c.bf16 %v963_v40, %v962_v39  ;;  %v3086_v44 = vpack.c.bf16 %v965_v43, %v964_v42  ;;  %v966_v45 = vld [vmem:[%s3638_s5 + $0x70] sm:$0xff]  ;;  %v967_v46 = vld [vmem:[%s3638_s5 + $0x78] sm:$0xff]  ;;  %v3104_v48 = vld [vmem:[%s3635_s2] ss:$0 sm:$0xff]  ;;  %s3149_s22 = scalar_lea.vmem %s3645_s12, %s3138_s16 }
  0x10   : > { %v2832_v4 = vld [vmem:[%s2971_s25] sm:$0xff]   ;;  %2501 = vmatprep.subr.bf16.mxu0 %v2827_v3  ;;  %v2833_v14 = vld [vmem:[%s2971_s25 + $0x8] sm:$0xff]   ;;  %v2834_v15 = vld [vmem:[%s2971_s25 + $0x10] sm:$0xff]   ;;  %v3096_v47 = vpack.c.bf16 %v967_v46, %v966_v45  ;;  %s3473_s30 = scalar_lea.vmem %s3647_s14, %s3138_s16  ;;  %s3578_s15 = scalar_lea.vmem %s3646_s13, %s3138_s16 }
  0x11   : > { %2511 = vmatprep.mubr.bf16.mxu0 %v2832_v4  ;;  %2532 = vmatpush3.bf16.msra.mxu1 %v2842_v10  ;;  %v2835_v17 = vld [vmem:[%s2971_s25 + $0x18] sm:$0xff]   ;;  %v2836_v18 = vld [vmem:[%s2971_s25 + $0x20] sm:$0xff]   ;;  %v2837_v19 = vld [vmem:[%s2971_s25 + $0x28] sm:$0xff]   ;;  %s3612_s27 = scalar_lea.vmem %s3644_s11, %s3138_s16 }
  0x12   : > { %2533 = vmatprep.subr.bf16.mxu1 %v2843_v12  ;;  %v2838_v20 = vld [vmem:[%s2971_s25 + $0x30] sm:$0xff]   ;;  %v2839_v21 = vld [vmem:[%s2971_s25 + $0x38] sm:$0xff]  }
  0x13   : > { %2502 = vmatpush3.bf16.msra.mxu0 %v2827_v3 }
  0x14   : > { %2503 = vmatprep.subr.bf16.mxu0 %v2828_v5 }
  0x15   : > { %2534 = vmatpush3.bf16.msra.mxu1 %v2843_v12 }
  0x16   : > { %2535 = vmatprep.subr.bf16.mxu1 %v2844_v13 }
  0x17   : > { %2504 = vmatpush3.bf16.msra.mxu0 %v2828_v5 }
  0x18   : > { %2505 = vmatprep.subr.bf16.mxu0 %v2829_v6 }
  0x19   : > { %2536 = vmatpush3.bf16.msra.mxu1 %v2844_v13 }
  0x1a   : > { %2537 = vmatprep.subr.bf16.mxu1 %v2845_v16 }
  0x1b   : > { %2506 = vmatpush3.bf16.msra.mxu0 %v2829_v6 }
  0x1c   : > { %2507 = vmatprep.subr.bf16.mxu0 %v2830_v9 }
  0x1d   : > { %2538 = vmatpush3.bf16.msra.mxu1 %v2845_v16 }
  0x1e   : > { %2539 = vmatprep.subr.bf16.mxu1 %v2846_v22 }
  0x1f   : > { %2508 = vmatpush3.bf16.msra.mxu0 %v2830_v9 }
  0x20   : > { %2509 = vmatprep.subr.bf16.mxu0 %v2831_v11 }
  0x21   : > { %2540 = vmatpush3.bf16.msra.mxu1 %v2846_v22 }
  0x22   : > { %2541 = vmatprep.subr.bf16.mxu1 %v2847_v23 }
  0x23   : > { %2510 = vmatpush3.bf16.msra.mxu0 %v2831_v11 }
  0x24   : > { %2736 = vmatprep.subr.bf16.mxu0 %v3029_v27 }
  0x25   : > { %2542 = vmatpush3.bf16.msra.mxu1 %v2847_v23 }
  0x26   : > { %2512 = vmatmul.mubr.bf16.vlgmr.msra.gmra.mrb[0].mxu0 %v2833_v14  ;;  %2768 = vmatprep.subr.bf16.mxu1 %v3029_v27 }
  0x27   : > { %2515 = vmatprep.mubr.bf16.mxu0 %v2834_v15 }
  0x2c   : > { %2738 = vmatpush3.bf16.xpose.msra.mxu0 %v3029_v27 }
  0x2d   : > { %2740 = vmatprep.subr.bf16.mxu0 %v3034_v29 }
  0x2e   : > { %2516 = vmatmul.mubr.bf16.gmra.mrb[4].mxu0 %v2835_v17 }
  0x2f   : > { %2519 = vmatprep.mubr.bf16.mxu0 %v2836_v18 }
  0x34   : > { %2742 = vmatpush3.bf16.xpose.msra.mxu0 %v3034_v29 }
  0x35   : > { %2744 = vmatprep.subr.bf16.mxu0 %v3046_v32 }
  0x36   : > { %2520 = vmatmul.mubr.bf16.gmra.mrb[8].mxu0 %v2837_v19 }
  0x37   : > { %2523 = vmatprep.mubr.bf16.mxu0 %v2838_v20 }
  0x3c   : > { %2746 = vmatpush3.bf16.xpose.msra.mxu0 %v3046_v32 }
  0x3d   : > { %2748 = vmatprep.subr.bf16.mxu0 %v3056_v35 }
  0x3e   : > { %2524 = vmatmul.mubr.bf16.gmra.mrb[12].mxu0 %v2839_v21 }
  0x44   : > { %2750 = vmatpush3.bf16.xpose.msra.mxu0 %v3056_v35 }
  0x45   : > { %2752 = vmatprep.subr.bf16.mxu0 %v3066_v38 }
  0x4c   : > { %2754 = vmatpush3.bf16.xpose.msra.mxu0 %v3066_v38 }
  0x4d   : > { %2756 = vmatprep.subr.bf16.mxu0 %v3076_v41 }
  0x54   : > { %2758 = vmatpush3.bf16.xpose.msra.mxu0 %v3076_v41 }
  0x55   : > { %2760 = vmatprep.subr.bf16.mxu0 %v3086_v44 }
  0x5c   : > { %2762 = vmatpush3.bf16.xpose.msra.mxu0 %v3086_v44 }
  0x5d   : > { %2764 = vmatprep.subr.bf16.mxu0 %v3096_v47 }
  0x64   : > { %2766 = vmatpush3.bf16.xpose.msra.mxu0 %v3096_v47 }
  0xf9   : > { %v2513_v49 = vpop.f32.mrb[0].mxu0 }
  0xfa   : > { %v690_v50 = vadd.f32 %v2513_v49, %v3104_v48  ;;  %v681_v51 = vpop.f32.mrb[1].mxu0 }
  0xfb   : > { %v682_v52 = vadd.f32 %v3104_v48, %v681_v51  ;;  %v2514_v53 = vpop.f32.mrb[2].mxu0 }
  0xfc   : > { %v693_v54 = vadd.f32 %v2514_v53, %v3104_v48  ;;  %v684_v55 = vpop.f32.mrb[3].mxu0  ;;  %v746_v57 = vmax.f32 %v690_v50, 0.0 }
  0xfd   : > { %v685_v56 = vadd.f32 %v3104_v48, %v684_v55  ;;  %v744_v59 = vmax.f32 %v682_v52, 0.0 }
  0xfe   : > { %v747_v58 = vmax.f32 %v693_v54, 0.0 }
  0xff   : > { %v745_v60 = vmax.f32 %v685_v56, 0.0 }
 0x100   : > { %v761_v61 = vpack.c.bf16 %v747_v58, %v746_v57 }
 0x101   : > { %v2517_v62 = vpop.f32.mrb[4].mxu0  ;;  %v760_v63 = vpack.c.bf16 %v745_v60, %v744_v59 }
 0x102   : > { %v706_v0 = vadd.f32 %v2517_v62, %v3104_v48  ;;  %v697_v1 = vpop.f32.mrb[5].mxu0 }
 0x103   : > { %v698_v2 = vadd.f32 %v3104_v48, %v697_v1  ;;  %v2518_v3 = vpop.f32.mrb[6].mxu0  ;;  %2543 = vmatprep.mubr.bf16.mxu1 %v760_v63 }
 0x104   : > { %v709_v4 = vadd.f32 %v2518_v3, %v3104_v48  ;;  %v700_v5 = vpop.f32.mrb[7].mxu0  ;;  %2544 = vmatmul.mubr.bf16.vlgmr.msra.gmra.mrb[0].mxu1 %v761_v61  ;;  %v750_v7 = vmax.f32 %v706_v0, 0.0 }
 0x105   : > { %v701_v6 = vadd.f32 %v3104_v48, %v700_v5  ;;  %2770 = vmatpush3.bf16.msra.mxu1 %v3029_v27  ;;  %v748_v9 = vmax.f32 %v698_v2, 0.0 }
 0x106   : > { %v751_v8 = vmax.f32 %v709_v4, 0.0  ;;  %2772 = vmatprep.subr.bf16.mxu1 %v3034_v29 }
 0x107   : > { %v749_v10 = vmax.f32 %v701_v6, 0.0 }
 0x108   : > { %v763_v11 = vpack.c.bf16 %v751_v8, %v750_v7 }
 0x109   : > { %v762_v12 = vpack.c.bf16 %v749_v10, %v748_v9  ;;  %v2521_v13 = vpop.f32.mrb[8].mxu0  ;;  %2774 = vmatpush3.bf16.msra.mxu1 %v3034_v29 }
 0x10a   : > { %v722_v14 = vadd.f32 %v2521_v13, %v3104_v48  ;;  %v713_v15 = vpop.f32.mrb[9].mxu0  ;;  %2776 = vmatprep.subr.bf16.mxu1 %v3046_v32 }
 0x10b   : > { %v714_v16 = vadd.f32 %v3104_v48, %v713_v15  ;;  %v2522_v17 = vpop.f32.mrb[10].mxu0  ;;  %2547 = vmatprep.mubr.bf16.mxu1 %v762_v12 }
 0x10c   : > { %v725_v18 = vadd.f32 %v2522_v17, %v3104_v48  ;;  %v716_v19 = vpop.f32.mrb[11].mxu0  ;;  %2548 = vmatmul.mubr.bf16.gmra.mrb[4].mxu1 %v763_v11  ;;  %v754_v21 = vmax.f32 %v722_v14, 0.0 }
 0x10d   : > { %v717_v20 = vadd.f32 %v3104_v48, %v716_v19  ;;  %2778 = vmatpush3.bf16.msra.mxu1 %v3046_v32  ;;  %v752_v23 = vmax.f32 %v714_v16, 0.0 }
 0x10e   : > { %v755_v22 = vmax.f32 %v725_v18, 0.0  ;;  %2780 = vmatprep.subr.bf16.mxu1 %v3056_v35 }
 0x10f   : > { %v753_v24 = vmax.f32 %v717_v20, 0.0 }
 0x110   : > { %v765_v25 = vpack.c.bf16 %v755_v22, %v754_v21 }
 0x111   : > { %v764_v26 = vpack.c.bf16 %v753_v24, %v752_v23  ;;  %v2525_v27 = vpop.f32.mrb[12].mxu0  ;;  %2782 = vmatpush3.bf16.msra.mxu1 %v3056_v35 }
 0x112   : > { %v738_v28 = vadd.f32 %v2525_v27, %v3104_v48  ;;  %v729_v29 = vpop.f32.mrb[13].mxu0  ;;  %2784 = vmatprep.subr.bf16.mxu1 %v3066_v38 }
 0x113   : > { %v730_v30 = vadd.f32 %v3104_v48, %v729_v29  ;;  %v2526_v31 = vpop.f32.mrb[14].mxu0  ;;  %2551 = vmatprep.mubr.bf16.mxu1 %v764_v26 }
 0x114   : > { %v741_v32 = vadd.f32 %v2526_v31, %v3104_v48  ;;  %v732_v33 = vpop.f32.mrb[15].mxu0  ;;  %2552 = vmatmul.mubr.bf16.gmra.mrb[8].mxu1 %v765_v25  ;;  %v758_v36 = vmax.f32 %v738_v28, 0.0 }
 0x115   : > { %v733_v34 = vadd.f32 %v3104_v48, %v732_v33  ;;  %2786 = vmatpush3.bf16.msra.mxu1 %v3066_v38  ;;  %v756_v37 = vmax.f32 %v730_v30, 0.0  ;;  %v3143_v38 = vld [vmem:[%s3637_s4] ss:$0 sm:$0xff] }
 0x116   : > { %v759_v35 = vmax.f32 %v741_v32, 0.0  ;;  %2788 = vmatprep.subr.bf16.mxu1 %v3076_v41  ;;  %v3186_v32 = vld [vmem:[%s3639_s6] ss:$0 sm:$0xff] }
 0x117   : > { %v757_v39 = vmax.f32 %v733_v34, 0.0 }
 0x118   : > { %v767_v40 = vpack.c.bf16 %v759_v35, %v758_v36 }
 0x119   : > { %v766_v42 = vpack.c.bf16 %v757_v39, %v756_v37  ;;  %2790 = vmatpush3.bf16.msra.mxu1 %v3076_v41 }
 0x11a   : > { %2792 = vmatprep.subr.bf16.mxu1 %v3086_v44 }
 0x11b   : > { %2555 = vmatprep.mubr.bf16.mxu1 %v766_v42 }
 0x11c   : > { %2556 = vmatmul.mubr.bf16.gmra.mrb[12].mxu1 %v767_v40 }
 0x11d   : > { %2794 = vmatpush3.bf16.msra.mxu1 %v3086_v44 }
 0x11e   : > { %2796 = vmatprep.subr.bf16.mxu1 %v3096_v47 }
 0x121   : > { %2798 = vmatpush3.bf16.msra.mxu1 %v3096_v47 }
 0x1d7   : > { %v2545_v41 = vpop.f32.mrb[0].mxu1 }
 0x1d8   : > { %v882_v43 = vadd.f32 %v2545_v41, %v3143_v38  ;;  %v873_v44 = vpop.f32.mrb[1].mxu1 }
 0x1d9   : > { %v874_v45 = vadd.f32 %v3143_v38, %v873_v44  ;;  %v2546_v46 = vpop.f32.mrb[2].mxu1 }
 0x1da   : > { %938 = vst [vmem:[%s3149_s22 + $0x10] sm:$0xff] %v882_v43  ;;  %v885_v47 = vadd.f32 %v2546_v46, %v3143_v38  ;;  %v876_v48 = vpop.f32.mrb[3].mxu1  ;;  %v970_v49 = vmul.f32 %v882_v43, %v882_v43 }
 0x1db   : > { %936 = vst [vmem:[%s3149_s22] sm:$0xff] %v874_v45  ;;  %v877_v50 = vadd.f32 %v3143_v38, %v876_v48  ;;  %2591 = vmatprep.mubr.f32.mxu0 %v874_v45  ;;  %v968_v51 = vmul.f32 %v874_v45, %v874_v45 }
 0x1dc   : > { %939 = vst [vmem:[%s3149_s22 + $0x18] sm:$0xff] %v885_v47  ;;  %988 = vadd.xlane.f32.xlu1 %v970_v49  ;;  %v971_v52 = vmul.f32 %v885_v47, %v885_v47 }
 0x1dd   : > { %937 = vst [vmem:[%s3149_s22 + $0x8] sm:$0xff] %v877_v50  ;;  %2592 = vmatmul.mubr.f32.vlgmr.msra.gmra.mrb[16].mxu0 %v877_v50  ;;  %984 = vadd.xlane.f32.xlu0 %v968_v51  ;;  %v969_v54 = vmul.f32 %v877_v50, %v877_v50 }
 0x1de   : > { %2594 = vmatprep.mubr.f32.mxu0 %v882_v43 }
 0x1df   : > { %v2549_v53 = vpop.f32.mrb[4].mxu1 }
 0x1e0   : > { %v898_v55 = vadd.f32 %v2549_v53, %v3143_v38  ;;  %990 = vadd.xlane.f32.xlu1 %v971_v52  ;;  %v889_v56 = vpop.f32.mrb[5].mxu1 }
 0x1e1   : > { %v890_v57 = vadd.f32 %v3143_v38, %v889_v56  ;;  %v2550_v58 = vpop.f32.mrb[6].mxu1  ;;  %2595 = vmatmul.mubr.f32.gmra.mrb[18].mxu0 %v885_v47  ;;  %986 = vadd.xlane.f32.xlu0 %v969_v54 }
 0x1e2   : > { %942 = vst [vmem:[%s3149_s22 + $0x30] sm:$0xff] %v898_v55  ;;  %v901_v59 = vadd.f32 %v2550_v58, %v3143_v38  ;;  %v892_v60 = vpop.f32.mrb[7].mxu1  ;;  %v974_v1 = vmul.f32 %v898_v55, %v898_v55 }
 0x1e3   : > { %940 = vst [vmem:[%s3149_s22 + $0x20] sm:$0xff] %v890_v57  ;;  %v893_v61 = vadd.f32 %v3143_v38, %v892_v60  ;;  %2597 = vmatprep.mubr.f32.mxu0 %v890_v57  ;;  %v972_v62 = vmul.f32 %v890_v57, %v890_v57 }
 0x1e4   : > { %943 = vst [vmem:[%s3149_s22 + $0x38] sm:$0xff] %v901_v59  ;;  %v975_v6 = vmul.f32 %v901_v59, %v901_v59 }
 0x1e5   : > { %941 = vst [vmem:[%s3149_s22 + $0x28] sm:$0xff] %v893_v61  ;;  %2598 = vmatmul.mubr.f32.gmra.mrb[20].mxu0 %v893_v61  ;;  %992 = vadd.xlane.f32.xlu0 %v972_v62  ;;  %v973_v63 = vmul.f32 %v893_v61, %v893_v61 }
 0x1e6   : > { %2600 = vmatprep.mubr.f32.mxu0 %v898_v55 }
 0x1e7   : > { %v2553_v0 = vpop.f32.mrb[8].mxu1  ;;  %994 = vadd.xlane.f32.xlu1 %v973_v63 }
 0x1e8   : > { %v914_v2 = vadd.f32 %v2553_v0, %v3143_v38  ;;  %v905_v3 = vpop.f32.mrb[9].mxu1 }
 0x1e9   : > { %v906_v4 = vadd.f32 %v3143_v38, %v905_v3  ;;  %v2554_v5 = vpop.f32.mrb[10].mxu1  ;;  %2601 = vmatmul.mubr.f32.gmra.mrb[22].mxu0 %v901_v59  ;;  %996 = vadd.xlane.f32.xlu0 %v974_v1 }
 0x1ea   : > { %946 = vst [vmem:[%s3149_s22 + $0x50] sm:$0xff] %v914_v2  ;;  %v917_v7 = vadd.f32 %v2554_v5, %v3143_v38  ;;  %v908_v8 = vpop.f32.mrb[11].mxu1  ;;  %v978_v13 = vmul.f32 %v914_v2, %v914_v2 }
 0x1eb   : > { %944 = vst [vmem:[%s3149_s22 + $0x40] sm:$0xff] %v906_v4  ;;  %v909_v9 = vadd.f32 %v3143_v38, %v908_v8  ;;  %998 = vadd.xlane.f32.xlu1 %v975_v6  ;;  %2603 = vmatprep.mubr.f32.mxu0 %v906_v4  ;;  %v976_v10 = vmul.f32 %v906_v4, %v906_v4 }
 0x1ec   : > { %947 = vst [vmem:[%s3149_s22 + $0x58] sm:$0xff] %v917_v7  ;;  %v979_v18 = vmul.f32 %v917_v7, %v917_v7 }
 0x1ed   : > { %945 = vst [vmem:[%s3149_s22 + $0x48] sm:$0xff] %v909_v9  ;;  %2604 = vmatmul.mubr.f32.gmra.mrb[24].mxu0 %v909_v9  ;;  %1000 = vadd.xlane.f32.xlu0 %v976_v10  ;;  %v977_v11 = vmul.f32 %v909_v9, %v909_v9 }
 0x1ee   : > { %2606 = vmatprep.mubr.f32.mxu0 %v914_v2 }
 0x1ef   : > { %v2557_v12 = vpop.f32.mrb[12].mxu1  ;;  %1002 = vadd.xlane.f32.xlu1 %v977_v11 }
 0x1f0   : > { %v930_v14 = vadd.f32 %v2557_v12, %v3143_v38  ;;  %v921_v15 = vpop.f32.mrb[13].mxu1 }
 0x1f1   : > { %v922_v16 = vadd.f32 %v3143_v38, %v921_v15  ;;  %v2558_v17 = vpop.f32.mrb[14].mxu1  ;;  %2607 = vmatmul.mubr.f32.gmra.mrb[26].mxu0 %v917_v7  ;;  %1004 = vadd.xlane.f32.xlu0 %v978_v13 }
 0x1f2   : > { %950 = vst [vmem:[%s3149_s22 + $0x70] sm:$0xff] %v930_v14  ;;  %v933_v19 = vadd.f32 %v2558_v17, %v3143_v38  ;;  %v924_v20 = vpop.f32.mrb[15].mxu1  ;;  %v982_v24 = vmul.f32 %v930_v14, %v930_v14 }
 0x1f3   : > { %948 = vst [vmem:[%s3149_s22 + $0x60] sm:$0xff] %v922_v16  ;;  %v925_v21 = vadd.f32 %v3143_v38, %v924_v20  ;;  %1006 = vadd.xlane.f32.xlu1 %v979_v18  ;;  %2609 = vmatprep.mubr.f32.mxu0 %v922_v16  ;;  %v980_v22 = vmul.f32 %v922_v16, %v922_v16 }
 0x1f4   : > { %951 = vst [vmem:[%s3149_s22 + $0x78] sm:$0xff] %v933_v19  ;;  %v983_v25 = vmul.f32 %v933_v19, %v933_v19 }
 0x1f5   : > { %949 = vst [vmem:[%s3149_s22 + $0x68] sm:$0xff] %v925_v21  ;;  %2610 = vmatmul.mubr.f32.gmra.mrb[28].mxu0 %v925_v21  ;;  %1008 = vadd.xlane.f32.xlu0 %v980_v22  ;;  %v981_v23 = vmul.f32 %v925_v21, %v925_v21 }
 0x1f6   : > { %2612 = vmatprep.mubr.f32.mxu0 %v930_v14 }
 0x1f7   : > { %1010 = vadd.xlane.f32.xlu1 %v981_v23 }
 0x1f9   : > { %2613 = vmatmul.mubr.f32.gmra.mrb[30].mxu0 %v933_v19  ;;  %1012 = vadd.xlane.f32.xlu0 %v982_v24 }
 0x1fb   : > { %1014 = vadd.xlane.f32.xlu1 %v983_v25 }
 0x269   : > { %v989_v27 = vpop.xlane.xlu1 %988 }
 0x26a   : > { %v985_v26 = vpop.xlane.xlu0 %984  ;;  %v1170_v47 = vadd.f32 %v3186_v32, %v989_v27 }
 0x26b   : > { %v1168_v37 = vadd.f32 %v3186_v32, %v985_v26 }
 0x26d   : > { %v991_v29 = vpop.xlane.xlu1 %990 }
 0x26e   : > { %v987_v28 = vpop.xlane.xlu0 %986  ;;  %v1171_v44 = vadd.f32 %v3186_v32, %v991_v29 }
 0x26f   : > { %v1169_v34 = vadd.f32 %v3186_v32, %v987_v28 }
 0x272   : > { %v993_v31 = vpop.xlane.xlu0 %992 }
 0x273   : > { %v1172_v57 = vadd.f32 %v3186_v32, %v993_v31 }
 0x274   : > { %v995_v30 = vpop.xlane.xlu1 %994 }
 0x275   : > { %v1173_v53 = vadd.f32 %v3186_v32, %v995_v30 }
 0x276   : > { %v997_v42 = vpop.xlane.xlu0 %996 }
 0x277   : > { %v1174_v1 = vadd.f32 %v3186_v32, %v997_v42 }
 0x278   : > { %v999_v39 = vpop.xlane.xlu1 %998 }
 0x279   : > { %v1175_v62 = vadd.f32 %v3186_v32, %v999_v39 }
 0x27a   : > { %v1001_v54 = vpop.xlane.xlu0 %1000 }
 0x27b   : > { %v1176_v11 = vadd.f32 %v3186_v32, %v1001_v54 }
 0x27c   : > { %v1003_v50 = vpop.xlane.xlu1 %1002 }
 0x27d   : > { %v1177_v8 = vadd.f32 %v3186_v32, %v1003_v50 }
 0x27e   : > { %v1005_v4 = vpop.xlane.xlu0 %1004 }
 0x27f   : > { %v1178_v21 = vadd.f32 %v3186_v32, %v1005_v4 }
 0x280   : > { %v1007_v2 = vpop.xlane.xlu1 %1006 }
 0x281   : > { %v1179_v17 = vadd.f32 %v3186_v32, %v1007_v2 }
 0x282   : > { %v1009_v18 = vpop.xlane.xlu0 %1008 }
 0x283   : > { %v1180_v29 = vadd.f32 %v3186_v32, %v1009_v18 }
 0x284   : > { %v1011_v14 = vpop.xlane.xlu1 %1010 }
 0x285   : > { %v1181_v26 = vadd.f32 %v3186_v32, %v1011_v14 }
 0x288   : > { %v1015_v30 = vpop.xlane.xlu1 %1014 }
 0x2b0   : > { %v2593_v33 = vpop.f32.mrb[16].mxu0 }
 0x2b1   : > { %v1185_v36 = vmul.f32 2.0, %v2593_v33  ;;  %v1082_v35 = vpop.f32.mrb[17].mxu0  ;;  %v1013_v33 = vpop.xlane.xlu0 %1012 }
 0x2b2   : > { %v1184_v40 = vmul.f32 2.0, %v1082_v35  ;;  %v1182_v42 = vadd.f32 %v3186_v32, %v1013_v33 }
 0x2b3   : > { %v3190_v38 = vsub.f32 %v1169_v34, %v1185_v36 }
 0x2b4   : > { %v2596_v41 = vpop.f32.mrb[18].mxu0  ;;  %v3192_v43 = vsub.f32 %v1168_v37, %v1184_v40  ;;  %v1183_v37 = vadd.f32 %v3186_v32, %v1015_v30 }
 0x2b5   : > { %v1187_v45 = vmul.f32 2.0, %v2596_v41  ;;  %v1092_v46 = vpop.f32.mrb[19].mxu0  ;;  %1220 = vmin.xlane.f32.xlu1 %v3190_v38 }
 0x2b6   : > { %v1186_v48 = vmul.f32 2.0, %v1092_v46  ;;  %1218 = vmin.xlane.f32.xlu0 %v3192_v43  ;;  %v1216_v46 = vlaneseq }
 0x2b7   : > { %v3198_v49 = vsub.f32 %v1171_v44, %v1187_v45 }
 0x2b8   : > { %v2599_v51 = vpop.f32.mrb[20].mxu0  ;;  %v3200_v52 = vsub.f32 %v1170_v47, %v1186_v48  ;;  %v3252_v47 = vand.u32 127, %v1216_v46 }
 0x2b9   : > { %v1189_v55 = vmul.f32 2.0, %v2599_v51  ;;  %v1102_v56 = vpop.f32.mrb[21].mxu0  ;;  %1224 = vmin.xlane.f32.xlu1 %v3198_v49 }
 0x2ba   : > { %v1188_v58 = vmul.f32 2.0, %v1102_v56  ;;  %1222 = vmin.xlane.f32.xlu0 %v3200_v52 }
 0x2bb   : > { %v3206_v59 = vsub.f32 %v1173_v53, %v1189_v55 }
 0x2bc   : > { %v2602_v60 = vpop.f32.mrb[22].mxu0  ;;  %v3208_v61 = vsub.f32 %v1172_v57, %v1188_v58 }
 0x2bd   : > { %v1191_v63 = vmul.f32 2.0, %v2602_v60  ;;  %v1112_v0 = vpop.f32.mrb[23].mxu0  ;;  %1228 = vmin.xlane.f32.xlu1 %v3206_v59 }
 0x2be   : > { %v1190_v3 = vmul.f32 2.0, %v1112_v0  ;;  %1226 = vmin.xlane.f32.xlu0 %v3208_v61 }
 0x2bf   : > { %v3214_v5 = vsub.f32 %v1175_v62, %v1191_v63 }
 0x2c0   : > { %v2605_v6 = vpop.f32.mrb[24].mxu0  ;;  %v3216_v7 = vsub.f32 %v1174_v1, %v1190_v3 }
 0x2c1   : > { %v1193_v9 = vmul.f32 2.0, %v2605_v6  ;;  %v1122_v10 = vpop.f32.mrb[25].mxu0  ;;  %1232 = vmin.xlane.f32.xlu1 %v3214_v5 }
 0x2c2   : > { %v1192_v12 = vmul.f32 2.0, %v1122_v10  ;;  %1230 = vmin.xlane.f32.xlu0 %v3216_v7 }
 0x2c3   : > { %v3222_v13 = vsub.f32 %v1177_v8, %v1193_v9 }
 0x2c4   : > { %v2608_v15 = vpop.f32.mrb[26].mxu0  ;;  %v3224_v16 = vsub.f32 %v1176_v11, %v1192_v12 }
 0x2c5   : > { %v1195_v19 = vmul.f32 2.0, %v2608_v15  ;;  %v1132_v20 = vpop.f32.mrb[27].mxu0  ;;  %1236 = vmin.xlane.f32.xlu1 %v3222_v13 }
 0x2c6   : > { %v1194_v22 = vmul.f32 2.0, %v1132_v20  ;;  %1234 = vmin.xlane.f32.xlu0 %v3224_v16 }
 0x2c7   : > { %v3230_v23 = vsub.f32 %v1179_v17, %v1195_v19 }
 0x2c8   : > { %v2611_v24 = vpop.f32.mrb[28].mxu0  ;;  %v3232_v25 = vsub.f32 %v1178_v21, %v1194_v22 }
 0x2c9   : > { %v1197_v27 = vmul.f32 2.0, %v2611_v24  ;;  %v1142_v28 = vpop.f32.mrb[29].mxu0  ;;  %1240 = vmin.xlane.f32.xlu1 %v3230_v23 }
 0x2ca   : > { %v1196_v31 = vmul.f32 2.0, %v1142_v28  ;;  %1238 = vmin.xlane.f32.xlu0 %v3232_v25 }
 0x2cb   : > { %v3238_v34 = vsub.f32 %v1181_v26, %v1197_v27 }
 0x2cc   : > { %v2614_v36 = vpop.f32.mrb[30].mxu0  ;;  %v3240_v35 = vsub.f32 %v1180_v29, %v1196_v31 }
 0x2cd   : > { %v1199_v39 = vmul.f32 2.0, %v2614_v36  ;;  %v1152_v40 = vpop.f32.mrb[31].mxu0  ;;  %1244 = vmin.xlane.f32.xlu1 %v3238_v34 }
 0x2ce   : > { %v1198_v41 = vmul.f32 2.0, %v1152_v40  ;;  %1242 = vmin.xlane.f32.xlu0 %v3240_v35 }
 0x2cf   : > { %v3246_v44 = vsub.f32 %v1183_v37, %v1199_v39 }
 0x2d0   : > { %v3248_v45 = vsub.f32 %v1182_v42, %v1198_v41 }
 0x2d1   : > { %1248 = vmin.xlane.f32.xlu1 %v3246_v44 }
 0x2d2   : > { %1246 = vmin.xlane.f32.xlu0 %v3248_v45 }
 0x342   : > { %v1221_v48 = vpop.xlane.xlu1 %1220 }
 0x343   : > { %vm1251_vm0 = vcmp.le.f32.partialorder %v3190_v38, %v1221_v48  ;;  %v1219_v50 = vpop.xlane.xlu0 %1218 }
 0x344   : > { %v3256_v32 = vsel %vm1251_vm0, %v3252_v47, 128  ;;  %vm1250_vm1 = vcmp.le.f32.partialorder %v3192_v43, %v1219_v50 }
 0x345   : > { %v3260_v51 = vsel %vm1250_vm1, %v3252_v47, 128  ;;  %v1297_v53 = vshra.s32 %v3256_v32, 16 }
 0x346   : > { %v1225_v54 = vpop.xlane.xlu1 %1224  ;;  %v1283_v55 = vshra.s32 %v3260_v51, 16 }
 0x347   : > { %vm1253_vm2 = vcmp.le.f32.partialorder %v3198_v49, %v1225_v54  ;;  %v1223_v56 = vpop.xlane.xlu0 %1222  ;;  %v3265_v57 = vcvt.s32.f32 %v1297_v53  ;;  %v1282_v53 = vand.u32 65535, %v3260_v51 }
 0x348   : > { %v3268_v38 = vsel %vm1253_vm2, %v3252_v47, 128  ;;  %vm1252_vm3 = vcmp.le.f32.partialorder %v3200_v52, %v1223_v56  ;;  %v3271_v58 = vcvt.s32.f32 %v1283_v55 }
 0x349   : > { %v3274_v43 = vsel %vm1252_vm3, %v3252_v47, 128  ;;  %1300 = vmin.xlane.f32.xlu1 %v3265_v57  ;;  %v1325_v60 = vshra.s32 %v3268_v38, 16  ;;  %v1324_v54 = vand.u32 65535, %v3268_v38 }
 0x34a   : > { %v1229_v62 = vpop.xlane.xlu1 %1228  ;;  %1286 = vmin.xlane.f32.xlu0 %v3271_v58  ;;  %v1311_v49 = vshra.s32 %v3274_v43, 16 }
 0x34b   : > { %vm1255_vm4 = vcmp.le.f32.partialorder %v3206_v59, %v1229_v62  ;;  %v1227_v63 = vpop.xlane.xlu0 %1226  ;;  %v3281_v0 = vcvt.s32.f32 %v1325_v60  ;;  %v1310_v60 = vand.u32 65535, %v3274_v43 }
 0x34c   : > { %v3284_v52 = vsel %vm1255_vm4, %v3252_v47, 128  ;;  %vm1254_vm5 = vcmp.le.f32.partialorder %v3208_v61, %v1227_v63  ;;  %v3287_v1 = vcvt.s32.f32 %v1311_v49  ;;  %v1284_v49 = vcvt.s32.f32 %v1282_v53 }
 0x34d   : > { %v3290_v2 = vsel %vm1254_vm5, %v3252_v47, 128  ;;  %1328 = vmin.xlane.f32.xlu1 %v3281_v0  ;;  %v1353_v3 = vshra.s32 %v3284_v52, 16  ;;  %v1352_v51 = vand.u32 65535, %v3284_v52 }
 0x34e   : > { %v1233_v4 = vpop.xlane.xlu1 %1232  ;;  %1314 = vmin.xlane.f32.xlu0 %v3287_v1  ;;  %v1339_v59 = vshra.s32 %v3290_v2, 16  ;;  %v1338_v43 = vand.u32 65535, %v3290_v2 }
 0x34f   : > { %vm1257_vm6 = vcmp.le.f32.partialorder %v3214_v5, %v1233_v4  ;;  %v1231_v6 = vpop.xlane.xlu0 %1230  ;;  %v3297_v8 = vcvt.s32.f32 %v1353_v3  ;;  %v1326_v3 = vcvt.s32.f32 %v1324_v54 }
 0x350   : > { %v3300_v61 = vsel %vm1257_vm6, %v3252_v47, 128  ;;  %vm1256_vm7 = vcmp.le.f32.partialorder %v3216_v7, %v1231_v6  ;;  %v3303_v9 = vcvt.s32.f32 %v1339_v59 }
 0x351   : > { %v3306_v10 = vsel %vm1256_vm7, %v3252_v47, 128  ;;  %1356 = vmin.xlane.f32.xlu1 %v3297_v8  ;;  %v1381_v11 = vshra.s32 %v3300_v61, 16  ;;  %v1380_v52 = vand.u32 65535, %v3300_v61 }
 0x352   : > { %v1237_v12 = vpop.xlane.xlu1 %1236  ;;  %1342 = vmin.xlane.f32.xlu0 %v3303_v9  ;;  %v1367_v5 = vshra.s32 %v3306_v10, 16  ;;  %v1366_v2 = vand.u32 65535, %v3306_v10 }
 0x353   : > { %vm1259_vm8 = vcmp.le.f32.partialorder %v3222_v13, %v1237_v12  ;;  %v1235_v14 = vpop.xlane.xlu0 %1234  ;;  %v3313_v15 = vcvt.s32.f32 %v1381_v11  ;;  %v1354_v11 = vcvt.s32.f32 %v1352_v51 }
 0x354   : > { %v3316_v7 = vsel %vm1259_vm8, %v3252_v47, 128  ;;  %vm1258_vm9 = vcmp.le.f32.partialorder %v3224_v16, %v1235_v14  ;;  %v3319_v17 = vcvt.s32.f32 %v1367_v5 }
 0x355   : > { %v3322_v18 = vsel %vm1258_vm9, %v3252_v47, 128  ;;  %1384 = vmin.xlane.f32.xlu1 %v3313_v15  ;;  %v1409_v19 = vshra.s32 %v3316_v7, 16  ;;  %v1408_v61 = vand.u32 65535, %v3316_v7 }
 0x356   : > { %v1241_v20 = vpop.xlane.xlu1 %1240  ;;  %1370 = vmin.xlane.f32.xlu0 %v3319_v17  ;;  %v1395_v13 = vshra.s32 %v3322_v18, 16  ;;  %v1394_v10 = vand.u32 65535, %v3322_v18 }
 0x357   : > { %vm1261_vm10 = vcmp.le.f32.partialorder %v3230_v23, %v1241_v20  ;;  %v1239_v21 = vpop.xlane.xlu0 %1238  ;;  %v3329_v22 = vcvt.s32.f32 %v1409_v19  ;;  %v1382_v19 = vcvt.s32.f32 %v1380_v52 }
 0x358   : > { %v3332_v16 = vsel %vm1261_vm10, %v3252_v47, 128  ;;  %vm1260_vm11 = vcmp.le.f32.partialorder %v3232_v25, %v1239_v21  ;;  %v3335_v24 = vcvt.s32.f32 %v1395_v13 }
 0x359   : > { %v3338_v26 = vsel %vm1260_vm11, %v3252_v47, 128  ;;  %1412 = vmin.xlane.f32.xlu1 %v3329_v22  ;;  %v1437_v27 = vshra.s32 %v3332_v16, 16  ;;  %v1436_v7 = vand.u32 65535, %v3332_v16 }
 0x35a   : > { %v1245_v28 = vpop.xlane.xlu1 %1244  ;;  %1398 = vmin.xlane.f32.xlu0 %v3335_v24  ;;  %v1423_v23 = vshra.s32 %v3338_v26, 16  ;;  %v1422_v18 = vand.u32 65535, %v3338_v26 }
 0x35b   : > { %vm1263_vm12 = vcmp.le.f32.partialorder %v3238_v34, %v1245_v28  ;;  %v1243_v29 = vpop.xlane.xlu0 %1242  ;;  %v3345_v30 = vcvt.s32.f32 %v1437_v27  ;;  %v1410_v27 = vcvt.s32.f32 %v1408_v61 }
 0x35c   : > { %v3348_v25 = vsel %vm1263_vm12, %v3252_v47, 128  ;;  %vm1262_vm13 = vcmp.le.f32.partialorder %v3240_v35, %v1243_v29  ;;  %v3351_v31 = vcvt.s32.f32 %v1423_v23 }
 0x35d   : > { %v3354_v33 = vsel %vm1262_vm13, %v3252_v47, 128  ;;  %1440 = vmin.xlane.f32.xlu1 %v3345_v30  ;;  %v1465_v36 = vshra.s32 %v3348_v25, 16  ;;  %v1464_v16 = vand.u32 65535, %v3348_v25 }
 0x35e   : > { %v1249_v37 = vpop.xlane.xlu1 %1248  ;;  %1426 = vmin.xlane.f32.xlu0 %v3351_v31  ;;  %v1451_v34 = vshra.s32 %v3354_v33, 16  ;;  %v1450_v26 = vand.u32 65535, %v3354_v33 }
 0x35f   : > { %vm1265_vm14 = vcmp.le.f32.partialorder %v3246_v44, %v1249_v37  ;;  %v1247_v39 = vpop.xlane.xlu0 %1246  ;;  %v3361_v40 = vcvt.s32.f32 %v1465_v36  ;;  %v1438_v36 = vcvt.s32.f32 %v1436_v7 }
 0x360   : > { %v3364_v35 = vsel %vm1265_vm14, %v3252_v47, 128  ;;  %vm1264_vm15 = vcmp.le.f32.partialorder %v3248_v45, %v1247_v39  ;;  %v3367_v42 = vcvt.s32.f32 %v1451_v34  ;;  %v1296_v45 = vand.u32 65535, %v3256_v32 }
 0x361   : > { %v3370_v41 = vsel %vm1264_vm15, %v3252_v47, 128  ;;  %1468 = vmin.xlane.f32.xlu1 %v3361_v40  ;;  %v1493_v46 = vshra.s32 %v3364_v35, 16  ;;  %v1492_v25 = vand.u32 65535, %v3364_v35 }
 0x362   : > { %1454 = vmin.xlane.f32.xlu0 %v3367_v42  ;;  %v1479_v44 = vshra.s32 %v3370_v41, 16  ;;  %v1298_v56 = vcvt.s32.f32 %v1296_v45  ;;  %v1478_v33 = vand.u32 65535, %v3370_v41 }
 0x363   : > { %v3376_v48 = vcvt.s32.f32 %v1493_v46  ;;  %v1466_v46 = vcvt.s32.f32 %v1464_v16  ;;  %v1494_v35 = vcvt.s32.f32 %v1492_v25 }
 0x364   : > { %v3378_v50 = vcvt.s32.f32 %v1479_v44  ;;  %v1480_v41 = vcvt.s32.f32 %v1478_v33 }
 0x365   : > { %1496 = vmin.xlane.f32.xlu1 %v3376_v48 }
 0x366   : > { %1482 = vmin.xlane.f32.xlu0 %v3378_v50 }
 0x3d6   : > { %v3385_v55 = vpop.xlane.xlu1 %1300 }
 0x3d7   : > { %v3388_v62 = vpop.xlane.xlu0 %1286  ;;  %vm1302_vm0 = vcmp.eq.f32.partialorder %v3265_v57, %v3385_v55  ;;  %v1312_v57 = vcvt.s32.f32 %v1310_v60  ;;  %v1307_v60 = vcvt.f32.s32 %v3385_v55 }
 0x3d8   : > { %v1303_v63 = vsel %vm1302_vm0, %v1298_v56, inf  ;;  %vm1288_vm1 = vcmp.eq.f32.partialorder %v3271_v58, %v3388_v62 }
 0x3d9   : > { %1304 = vmin.xlane.f32.xlu1 %v1303_v63  ;;  %v1289_v32 = vsel %vm1288_vm1, %v1284_v49, inf  ;;  %v1293_v49 = vcvt.f32.s32 %v3388_v62 }
 0x3da   : > { %v3395_v38 = vpop.xlane.xlu1 %1328  ;;  %1290 = vmin.xlane.f32.xlu0 %v1289_v32 }
 0x3db   : > { %v3398_v4 = vpop.xlane.xlu0 %1314  ;;  %vm1330_vm2 = vcmp.eq.f32.partialorder %v3281_v0, %v3395_v38  ;;  %v1340_v0 = vcvt.s32.f32 %v1338_v43  ;;  %v1335_v32 = vcvt.f32.s32 %v3395_v38  ;;  %v1294_v43 = vshll.u32 %v1293_v49, 16 }
 0x3dc   : > { %v1331_v59 = vsel %vm1330_vm2, %v1326_v3, inf  ;;  %vm1316_vm3 = vcmp.eq.f32.partialorder %v3287_v1, %v3398_v4 }
 0x3dd   : > { %1332 = vmin.xlane.f32.xlu1 %v1331_v59  ;;  %v1317_v58 = vsel %vm1316_vm3, %v1312_v57, inf }
 0x3de   : > { %v3405_v6 = vpop.xlane.xlu1 %1356  ;;  %1318 = vmin.xlane.f32.xlu0 %v1317_v58  ;;  %v1336_v58 = vshll.u32 %v1335_v32, 16 }
 0x3df   : > { %v3408_v12 = vpop.xlane.xlu0 %1342  ;;  %vm1358_vm4 = vcmp.eq.f32.partialorder %v3297_v8, %v3405_v6  ;;  %v1368_v8 = vcvt.s32.f32 %v1366_v2  ;;  %v1363_v52 = vcvt.f32.s32 %v3405_v6  ;;  %v2872_v6 = vmov 1.0  }
 0x3e0   : > { %v1359_v5 = vsel %vm1358_vm4, %v1354_v11, inf  ;;  %vm1344_vm5 = vcmp.eq.f32.partialorder %v3303_v9, %v3408_v12 }
 0x3e1   : > { %1360 = vmin.xlane.f32.xlu1 %v1359_v5  ;;  %v1345_v1 = vsel %vm1344_vm5, %v1340_v0, inf  ;;  %v2849_v5 = vld [vmem:[%s3640_s7 + $0x8] sm:$0xff]  }
 0x3e2   : > { %v3415_v14 = vpop.xlane.xlu1 %1384  ;;  %1346 = vmin.xlane.f32.xlu0 %v1345_v1 }
 0x3e3   : > { %v3418_v20 = vpop.xlane.xlu0 %1370  ;;  %vm1386_vm6 = vcmp.eq.f32.partialorder %v3313_v15, %v3415_v14  ;;  %v1396_v15 = vcvt.s32.f32 %v1394_v10  ;;  %v1391_v10 = vcvt.f32.s32 %v3415_v14 }
 0x3e4   : > { %v1387_v13 = vsel %vm1386_vm6, %v1382_v19, inf  ;;  %vm1372_vm7 = vcmp.eq.f32.partialorder %v3319_v17, %v3418_v20  ;;  %v1377_v7 = vcvt.f32.s32 %v3418_v20 }
 0x3e5   : > { %1388 = vmin.xlane.f32.xlu1 %v1387_v13  ;;  %v1373_v9 = vsel %vm1372_vm7, %v1368_v8, inf  ;;  %v1392_v20 = vshll.u32 %v1391_v10, 16  ;;  %v2856_v10 = vld [vmem:[%s3642_s9] sm:$0xff]  }
 0x3e6   : > { %v3425_v21 = vpop.xlane.xlu1 %1412  ;;  %1374 = vmin.xlane.f32.xlu0 %v1373_v9  ;;  %2703 = vmatprep.subr.bf16.mxu0 %v2856_v10 }
 0x3e7   : > { %v3428_v28 = vpop.xlane.xlu0 %1398  ;;  %vm1414_vm8 = vcmp.eq.f32.partialorder %v3329_v22, %v3425_v21  ;;  %v1424_v22 = vcvt.s32.f32 %v1422_v18  ;;  %v2850_v18 = vld [vmem:[%s3640_s7 + $0x10] sm:$0xff]   ;;  %2704 = vmatpush3.bf16.msra.mxu0 %v2856_v10 }
 0x3e8   : > { %v1415_v23 = vsel %vm1414_vm8, %v1410_v27, inf  ;;  %vm1400_vm9 = vcmp.eq.f32.partialorder %v3335_v24, %v3428_v28 }
 0x3e9   : > { %1416 = vmin.xlane.f32.xlu1 %v1415_v23  ;;  %v1401_v17 = vsel %vm1400_vm9, %v1396_v15, inf }
 0x3ea   : > { %v3435_v29 = vpop.xlane.xlu1 %1440  ;;  %1402 = vmin.xlane.f32.xlu0 %v1401_v17  ;;  %v1419_v17 = vcvt.f32.s32 %v3425_v21 }
 0x3eb   : > { %v3438_v37 = vpop.xlane.xlu0 %1426  ;;  %vm1442_vm10 = vcmp.eq.f32.partialorder %v3345_v30, %v3435_v29  ;;  %v1452_v30 = vcvt.s32.f32 %v1450_v26  ;;  %v1378_v26 = vshll.u32 %v1377_v7, 16  ;;  %v1447_v33 = vcvt.f32.s32 %v3435_v29 }
 0x3ec   : > { %v1443_v34 = vsel %vm1442_vm10, %v1438_v36, inf  ;;  %vm1428_vm11 = vcmp.eq.f32.partialorder %v3351_v31, %v3438_v37 }
 0x3ed   : > { %1444 = vmin.xlane.f32.xlu1 %v1443_v34  ;;  %v1429_v24 = vsel %vm1428_vm11, %v1424_v22, inf  ;;  %v1405_v22 = vcvt.f32.s32 %v3428_v28  ;;  %v1420_v28 = vshll.u32 %v1419_v17, 16 }
 0x3ee   : > { %v3445_v39 = vpop.xlane.xlu1 %1468  ;;  %1430 = vmin.xlane.f32.xlu0 %v1429_v24  ;;  %v2851_v24 = vld [vmem:[%s3640_s7 + $0x18] sm:$0xff]  }
 0x3ef   : > { %v3448_v44 = vpop.xlane.xlu0 %1454  ;;  %vm1470_vm12 = vcmp.eq.f32.partialorder %v3361_v40, %v3445_v39 }
 0x3f0   : > { %v1471_v45 = vsel %vm1470_vm12, %v1466_v46, inf  ;;  %vm1456_vm13 = vcmp.eq.f32.partialorder %v3367_v42, %v3448_v44  ;;  %v2848_v42 = vld [vmem:[%s3640_s7] sm:$0xff]   ;;  %v1461_v32 = vcvt.f32.s32 %v3448_v44 }
 0x3f1   : > { %1472 = vmin.xlane.f32.xlu1 %v1471_v45  ;;  %v1457_v31 = vsel %vm1456_vm13, %v1452_v30, inf  ;;  %2671 = vmatprep.subr.bf16.mxu1 %v2848_v42 }
 0x3f2   : > { %v3454_v53 = vpop.xlane.xlu1 %1496  ;;  %1458 = vmin.xlane.f32.xlu0 %v1457_v31  ;;  %v1406_v31 = vshll.u32 %v1405_v22, 16 }
 0x3f3   : > { %v3456_v54 = vpop.xlane.xlu0 %1482  ;;  %vm1498_vm14 = vcmp.eq.f32.partialorder %v3376_v48, %v3454_v53  ;;  %v1308_v48 = vshll.u32 %v1307_v60, 16  ;;  %v1475_v60 = vcvt.f32.s32 %v3445_v39 }
 0x3f4   : > { %v1499_v56 = vsel %vm1498_vm14, %v1494_v35, inf  ;;  %vm1484_vm15 = vcmp.eq.f32.partialorder %v3378_v50, %v3456_v54  ;;  %v1321_v50 = vcvt.f32.s32 %v3398_v4  ;;  %v1349_v4 = vcvt.f32.s32 %v3408_v12 }
 0x3f5   : > { %1500 = vmin.xlane.f32.xlu1 %v1499_v56  ;;  %v1485_v40 = vsel %vm1484_vm15, %v1480_v41, inf  ;;  %v1364_v12 = vshll.u32 %v1363_v52, 16  ;;  %v1433_v35 = vcvt.f32.s32 %v3438_v37  ;;  %v2852_v56 = vld [vmem:[%s3640_s7 + $0x20] sm:$0xff]   ;;  %v1448_v37 = vshll.u32 %v1447_v33, 16 }
 0x3f6   : > { %1486 = vmin.xlane.f32.xlu0 %v1485_v40  ;;  %v1322_v2 = vshll.u32 %v1321_v50, 16  ;;  %v1350_v9 = vshll.u32 %v1349_v4, 16  ;;  %v1476_v44 = vshll.u32 %v1475_v60, 16 }
 0x466   : > { %v1305_v63 = vpop.xlane.xlu1 %1304 }
 0x467   : > { %v1306_v51 = vcvt.f32.s32 %v1305_v63  ;;  %v1291_v3 = vpop.xlane.xlu0 %1290 }
 0x468   : > { %v1292_v57 = vcvt.f32.s32 %v1291_v3  ;;  %v2853_v3 = vld [vmem:[%s3640_s7 + $0x28] sm:$0xff]  }
 0x469   : > { %v1309_v55 = vadd.s32 %v1308_v48, %v1306_v51  ;;  %v1434_v48 = vshll.u32 %v1433_v35, 16 }
 0x46a   : > { %v1295_v59 = vadd.s32 %v1294_v43, %v1292_v57  ;;  %v1333_v62 = vpop.xlane.xlu1 %1332  ;;  %v1503_v57 = vcvt.f32.s32 %v3454_v53 }
 0x46b   : > { %1507 = vst [vmem:[%s3473_s30 + $0x8] sm:$0xff] %v1309_v55  ;;  %v1334_v38 = vcvt.f32.s32 %v1333_v62  ;;  %v1319_v11 = vpop.xlane.xlu0 %1318  ;;  %vm1523_vm1 = vcmp.eq.s32.totalorder %v3252_v47, %v1309_v55  ;;  %v1462_v62 = vshll.u32 %v1461_v32, 16 }
 0x46c   : > { %1506 = vst [vmem:[%s3473_s30] sm:$0xff] %v1295_v59  ;;  %v1320_v0 = vcvt.f32.s32 %v1319_v11  ;;  %vm1522_vm0 = vcmp.eq.s32.totalorder %v3252_v47, %v1295_v59 }
 0x46d   : > { %v1337_v1 = vadd.s32 %v1336_v58, %v1334_v38  ;;  %2647 = vmatprep.mubr.msk.f32.mxu1 %vm1522_vm0, %v2872_v6  ;;  %v1489_v58 = vcvt.f32.s32 %v3456_v54  ;;  %v2854_v38 = vld [vmem:[%s3640_s7 + $0x30] sm:$0xff]   ;;  %v1504_v54 = vshll.u32 %v1503_v57, 16 }
 0x46e   : > { %v1323_v61 = vadd.s32 %v1322_v2, %v1320_v0  ;;  %v1361_v19 = vpop.xlane.xlu1 %1360  ;;  %2648 = vmatmul.mubr.msk.f32.vlgmr.msra.gmra.mrb[16].mxu1 %vm1523_vm1, %v2872_v6 }
 0x46f   : > { %1509 = vst [vmem:[%s3473_s30 + $0x18] sm:$0xff] %v1337_v1  ;;  %v1362_v8 = vcvt.f32.s32 %v1361_v19  ;;  %v1347_v13 = vpop.xlane.xlu0 %1346  ;;  %2672 = vmatpush3.bf16.msra.mxu1 %v2848_v42  ;;  %vm1525_vm3 = vcmp.eq.s32.totalorder %v3252_v47, %v1337_v1 }
 0x470   : > { %1508 = vst [vmem:[%s3473_s30 + $0x10] sm:$0xff] %v1323_v61  ;;  %v1348_v27 = vcvt.f32.s32 %v1347_v13  ;;  %vm1524_vm2 = vcmp.eq.s32.totalorder %v3252_v47, %v1323_v61  ;;  %2673 = vmatprep.subr.bf16.mxu1 %v2849_v5  ;;  %v2860_v13 = vld [vmem:[%s3642_s9 + $0x20] sm:$0xff]  }
 0x471   : > { %v1365_v15 = vadd.s32 %v1364_v12, %v1362_v8  ;;  %2650 = vmatprep.mubr.msk.f32.mxu1 %vm1524_vm2, %v2872_v6  ;;  %v2855_v12 = vld [vmem:[%s3640_s7 + $0x38] sm:$0xff]   ;;  %v2857_v8 = vld [vmem:[%s3642_s9 + $0x8] sm:$0xff]  }
 0x472   : > { %v1351_v14 = vadd.s32 %v1350_v9, %v1348_v27  ;;  %v1389_v23 = vpop.xlane.xlu1 %1388  ;;  %2651 = vmatmul.mubr.msk.f32.gmra.mrb[18].mxu1 %vm1525_vm3, %v2872_v6  ;;  %2705 = vmatprep.subr.bf16.mxu0 %v2857_v8  ;;  %v2861_v9 = vld [vmem:[%s3642_s9 + $0x28] sm:$0xff]  }
 0x473   : > { %1511 = vst [vmem:[%s3473_s30 + $0x28] sm:$0xff] %v1365_v15  ;;  %v1390_v16 = vcvt.f32.s32 %v1389_v23  ;;  %v1375_v36 = vpop.xlane.xlu0 %1374  ;;  %2674 = vmatpush3.bf16.msra.mxu1 %v2849_v5  ;;  %vm1527_vm5 = vcmp.eq.s32.totalorder %v3252_v47, %v1365_v15  ;;  %v1490_v5 = vshll.u32 %v1489_v58, 16  ;;  %2706 = vmatpush3.bf16.msra.mxu0 %v2857_v8 }
 0x474   : > { %1510 = vst [vmem:[%s3473_s30 + $0x20] sm:$0xff] %v1351_v14  ;;  %v1376_v34 = vcvt.f32.s32 %v1375_v36  ;;  %vm1526_vm4 = vcmp.eq.s32.totalorder %v3252_v47, %v1351_v14  ;;  %2675 = vmatprep.subr.bf16.mxu1 %v2850_v18 }
 0x475   : > { %v1393_v25 = vadd.s32 %v1392_v20, %v1390_v16  ;;  %2653 = vmatprep.mubr.msk.f32.mxu1 %vm1526_vm4, %v2872_v6 }
 0x476   : > { %v1379_v21 = vadd.s32 %v1378_v26, %v1376_v34  ;;  %v1417_v46 = vpop.xlane.xlu1 %1416  ;;  %2654 = vmatmul.mubr.msk.f32.gmra.mrb[20].mxu1 %vm1527_vm5, %v2872_v6 }
 0x477   : > { %1513 = vst [vmem:[%s3473_s30 + $0x38] sm:$0xff] %v1393_v25  ;;  %v1418_v30 = vcvt.f32.s32 %v1417_v46  ;;  %v1403_v45 = vpop.xlane.xlu0 %1402  ;;  %2676 = vmatpush3.bf16.msra.mxu1 %v2850_v18  ;;  %vm1529_vm7 = vcmp.eq.s32.totalorder %v3252_v47, %v1393_v25 }
 0x478   : > { %1512 = vst [vmem:[%s3473_s30 + $0x30] sm:$0xff] %v1379_v21  ;;  %v1404_v41 = vcvt.f32.s32 %v1403_v45  ;;  %vm1528_vm6 = vcmp.eq.s32.totalorder %v3252_v47, %v1379_v21  ;;  %2677 = vmatprep.subr.bf16.mxu1 %v2851_v24 }
 0x479   : > { %v1421_v40 = vadd.s32 %v1420_v28, %v1418_v30  ;;  %2656 = vmatprep.mubr.msk.f32.mxu1 %vm1528_vm6, %v2872_v6 }
 0x47a   : > { %v1407_v29 = vadd.s32 %v1406_v31, %v1404_v41  ;;  %v1445_v42 = vpop.xlane.xlu1 %1444  ;;  %2657 = vmatmul.mubr.msk.f32.gmra.mrb[22].mxu1 %vm1529_vm7, %v2872_v6 }
 0x47b   : > { %1515 = vst [vmem:[%s3473_s30 + $0x48] sm:$0xff] %v1421_v40  ;;  %v1446_v49 = vcvt.f32.s32 %v1445_v42  ;;  %v1431_v63 = vpop.xlane.xlu0 %1430  ;;  %2678 = vmatpush3.bf16.msra.mxu1 %v2851_v24  ;;  %vm1531_vm9 = vcmp.eq.s32.totalorder %v3252_v47, %v1421_v40  ;;  %v2863_v40 = vld [vmem:[%s3642_s9 + $0x38] sm:$0xff]  }
 0x47c   : > { %1514 = vst [vmem:[%s3473_s30 + $0x40] sm:$0xff] %v1407_v29  ;;  %v1432_v51 = vcvt.f32.s32 %v1431_v63  ;;  %vm1530_vm8 = vcmp.eq.s32.totalorder %v3252_v47, %v1407_v29  ;;  %2679 = vmatprep.subr.bf16.mxu1 %v2852_v56  ;;  %v2347_v29 = vld [vmem:[%s3641_s8] ss:$0 sm:$0xff] }
 0x47d   : > { %v1449_v43 = vadd.s32 %v1448_v37, %v1446_v49  ;;  %2659 = vmatprep.mubr.msk.f32.mxu1 %vm1530_vm8, %v2872_v6 }
 0x47e   : > { %v1435_v39 = vadd.s32 %v1434_v48, %v1432_v51  ;;  %v1473_v50 = vpop.xlane.xlu1 %1472  ;;  %2660 = vmatmul.mubr.msk.f32.gmra.mrb[24].mxu1 %vm1531_vm9, %v2872_v6 }
 0x47f   : > { %1517 = vst [vmem:[%s3473_s30 + $0x58] sm:$0xff] %v1449_v43  ;;  %v1474_v55 = vcvt.f32.s32 %v1473_v50  ;;  %v1459_v59 = vpop.xlane.xlu0 %1458  ;;  %2680 = vmatpush3.bf16.msra.mxu1 %v2852_v56  ;;  %vm1533_vm11 = vcmp.eq.s32.totalorder %v3252_v47, %v1449_v43  ;;  %v2862_v56 = vld [vmem:[%s3642_s9 + $0x30] sm:$0xff]  }
 0x480   : > { %1516 = vst [vmem:[%s3473_s30 + $0x50] sm:$0xff] %v1435_v39  ;;  %v1460_v52 = vcvt.f32.s32 %v1459_v59  ;;  %vm1532_vm10 = vcmp.eq.s32.totalorder %v3252_v47, %v1435_v39  ;;  %2681 = vmatprep.subr.bf16.mxu1 %v2853_v3 }
 0x481   : > { %v1477_v11 = vadd.s32 %v1476_v44, %v1474_v55  ;;  %2662 = vmatprep.mubr.msk.f32.mxu1 %vm1532_vm10, %v2872_v6 }
 0x482   : > { %v1463_v53 = vadd.s32 %v1462_v62, %v1460_v52  ;;  %v1501_v2 = vpop.xlane.xlu1 %1500  ;;  %2663 = vmatmul.mubr.msk.f32.gmra.mrb[26].mxu1 %vm1533_vm11, %v2872_v6 }
 0x483   : > { %1519 = vst [vmem:[%s3473_s30 + $0x68] sm:$0xff] %v1477_v11  ;;  %v1502_v4 = vcvt.f32.s32 %v1501_v2  ;;  %v1487_v0 = vpop.xlane.xlu0 %1486  ;;  %2682 = vmatpush3.bf16.msra.mxu1 %v2853_v3  ;;  %vm1535_vm13 = vcmp.eq.s32.totalorder %v3252_v47, %v1477_v11 }
 0x484   : > { %1518 = vst [vmem:[%s3473_s30 + $0x60] sm:$0xff] %v1463_v53  ;;  %v1488_v1 = vcvt.f32.s32 %v1487_v0  ;;  %vm1534_vm12 = vcmp.eq.s32.totalorder %v3252_v47, %v1463_v53  ;;  %2683 = vmatprep.subr.bf16.mxu1 %v2854_v38 }
 0x485   : > { %v1505_v61 = vadd.s32 %v1504_v54, %v1502_v4  ;;  %2665 = vmatprep.mubr.msk.f32.mxu1 %vm1534_vm12, %v2872_v6 }
 0x486   : > { %v1491_v19 = vadd.s32 %v1490_v5, %v1488_v1  ;;  %2666 = vmatmul.mubr.msk.f32.gmra.mrb[28].mxu1 %vm1535_vm13, %v2872_v6 }
 0x487   : > { %1521 = vst [vmem:[%s3473_s30 + $0x78] sm:$0xff] %v1505_v61  ;;  %2684 = vmatpush3.bf16.msra.mxu1 %v2854_v38  ;;  %vm1537_vm15 = vcmp.eq.s32.totalorder %v3252_v47, %v1505_v61 }
 0x488   : > { %1520 = vst [vmem:[%s3473_s30 + $0x70] sm:$0xff] %v1491_v19  ;;  %vm1536_vm14 = vcmp.eq.s32.totalorder %v3252_v47, %v1491_v19  ;;  %2685 = vmatprep.subr.bf16.mxu1 %v2855_v12  ;;  %v2858_v47 = vld [vmem:[%s3642_s9 + $0x10] sm:$0xff]  }
 0x489   : > { %2668 = vmatprep.mubr.msk.f32.mxu1 %vm1536_vm14, %v2872_v6  ;;  %2707 = vmatprep.subr.bf16.mxu0 %v2858_v47 }
 0x48a   : > { %2669 = vmatmul.mubr.msk.f32.gmra.mrb[30].mxu1 %vm1537_vm15, %v2872_v6  ;;  %v2859_v6 = vld [vmem:[%s3642_s9 + $0x18] sm:$0xff]   ;;  %2708 = vmatpush3.bf16.msra.mxu0 %v2858_v47 }
 0x48b   : > { %2686 = vmatpush3.bf16.msra.mxu1 %v2855_v12  ;;  %2709 = vmatprep.subr.bf16.mxu0 %v2859_v6 }
 0x48c   : > { %2799 = vmatprep.subr.bf16.mxu1 %v2856_v10 }
 0x48e   : > { %2710 = vmatpush3.bf16.msra.mxu0 %v2859_v6 }
 0x48f   : > { %2711 = vmatprep.subr.bf16.mxu0 %v2860_v13 }
 0x492   : > { %2712 = vmatpush3.bf16.msra.mxu0 %v2860_v13 }
 0x493   : > { %2713 = vmatprep.subr.bf16.mxu0 %v2861_v9 }
 0x496   : > { %2714 = vmatpush3.bf16.msra.mxu0 %v2861_v9 }
 0x497   : > { %2715 = vmatprep.subr.bf16.mxu0 %v2862_v56 }
 0x49a   : > { %2716 = vmatpush3.bf16.msra.mxu0 %v2862_v56 }
 0x49b   : > { %2717 = vmatprep.subr.bf16.mxu0 %v2863_v40 }
 0x49e   : > { %2718 = vmatpush3.bf16.msra.mxu0 %v2863_v40 }
 0x541   : > { %v2649_v7 = vpop.f32.mrb[16].mxu1 }
 0x542   : > { %1716 = vst [vmem:[%s3578_s15 + $0x8] sm:$0xff] %v2649_v7  ;;  %v1636_v27 = vpop.f32.mrb[17].mxu1 }
 0x543   : > { %1715 = vst [vmem:[%s3578_s15] sm:$0xff] %v1636_v27  ;;  %v1731_v18 = vpack.c.bf16 %v2649_v7, %v1636_v27 }
 0x545   : > { %v2652_v15 = vpop.f32.mrb[18].mxu1  ;;  %2687 = vmatprep.mubr.bf16.mxu1 %v1731_v18 }
 0x546   : > { %1718 = vst [vmem:[%s3578_s15 + $0x18] sm:$0xff] %v2652_v15  ;;  %v1646_v14 = vpop.f32.mrb[19].mxu1 }
 0x547   : > { %1717 = vst [vmem:[%s3578_s15 + $0x10] sm:$0xff] %v1646_v14  ;;  %v1732_v23 = vpack.c.bf16 %v2652_v15, %v1646_v14 }
 0x549   : > { %v2655_v20 = vpop.f32.mrb[20].mxu1  ;;  %2688 = vmatmul.mubr.bf16.vlgmr.msra.gmra.mrb[32].mxu1 %v1732_v23 }
 0x54a   : > { %1720 = vst [vmem:[%s3578_s15 + $0x28] sm:$0xff] %v2655_v20  ;;  %v1656_v17 = vpop.f32.mrb[21].mxu1  ;;  %2807 = vmatpush3.bf16.msra.mxu1 %v2856_v10 }
 0x54b   : > { %1719 = vst [vmem:[%s3578_s15 + $0x20] sm:$0xff] %v1656_v17  ;;  %v1733_v16 = vpack.c.bf16 %v2655_v20, %v1656_v17  ;;  %2800 = vmatprep.subr.bf16.mxu1 %v2857_v8 }
 0x54d   : > { %v2658_v36 = vpop.f32.mrb[22].mxu1  ;;  %2691 = vmatprep.mubr.bf16.mxu1 %v1733_v16 }
 0x54e   : > { %1722 = vst [vmem:[%s3578_s15 + $0x38] sm:$0xff] %v2658_v36  ;;  %v1666_v26 = vpop.f32.mrb[23].mxu1  ;;  %2808 = vmatpush3.bf16.msra.mxu1 %v2857_v8 }
 0x54f   : > { %1721 = vst [vmem:[%s3578_s15 + $0x30] sm:$0xff] %v1666_v26  ;;  %v1734_v22 = vpack.c.bf16 %v2658_v36, %v1666_v26  ;;  %2801 = vmatprep.subr.bf16.mxu1 %v2858_v47 }
 0x551   : > { %v2661_v34 = vpop.f32.mrb[24].mxu1  ;;  %2692 = vmatmul.mubr.bf16.gmra.mrb[36].mxu1 %v1734_v22 }
 0x552   : > { %1724 = vst [vmem:[%s3578_s15 + $0x48] sm:$0xff] %v2661_v34  ;;  %v1676_v24 = vpop.f32.mrb[25].mxu1  ;;  %2809 = vmatpush3.bf16.msra.mxu1 %v2858_v47 }
 0x553   : > { %1723 = vst [vmem:[%s3578_s15 + $0x40] sm:$0xff] %v1676_v24  ;;  %v1735_v25 = vpack.c.bf16 %v2661_v34, %v1676_v24  ;;  %2802 = vmatprep.subr.bf16.mxu1 %v2859_v6 }
 0x555   : > { %v2664_v21 = vpop.f32.mrb[26].mxu1  ;;  %2695 = vmatprep.mubr.bf16.mxu1 %v1735_v25 }
 0x556   : > { %1726 = vst [vmem:[%s3578_s15 + $0x58] sm:$0xff] %v2664_v21  ;;  %v1686_v46 = vpop.f32.mrb[27].mxu1  ;;  %2810 = vmatpush3.bf16.msra.mxu1 %v2859_v6 }
 0x557   : > { %1725 = vst [vmem:[%s3578_s15 + $0x50] sm:$0xff] %v1686_v46  ;;  %v1736_v28 = vpack.c.bf16 %v2664_v21, %v1686_v46  ;;  %2803 = vmatprep.subr.bf16.mxu1 %v2860_v13 }
 0x559   : > { %v2667_v33 = vpop.f32.mrb[28].mxu1  ;;  %2696 = vmatmul.mubr.bf16.gmra.mrb[40].mxu1 %v1736_v28 }
 0x55a   : > { %1728 = vst [vmem:[%s3578_s15 + $0x68] sm:$0xff] %v2667_v33  ;;  %v1696_v30 = vpop.f32.mrb[29].mxu1  ;;  %2811 = vmatpush3.bf16.msra.mxu1 %v2860_v13 }
 0x55b   : > { %1727 = vst [vmem:[%s3578_s15 + $0x60] sm:$0xff] %v1696_v30  ;;  %v1737_v45 = vpack.c.bf16 %v2667_v33, %v1696_v30  ;;  %2804 = vmatprep.subr.bf16.mxu1 %v2861_v9  ;;  %v2356_v30 = vld [vmem:[%s3643_s10] ss:$0 sm:$0xff] }
 0x55d   : > { %v2670_v31 = vpop.f32.mrb[30].mxu1  ;;  %2699 = vmatprep.mubr.bf16.mxu1 %v1737_v45 }
 0x55e   : > { %1730 = vst [vmem:[%s3578_s15 + $0x78] sm:$0xff] %v2670_v31  ;;  %v1706_v35 = vpop.f32.mrb[31].mxu1  ;;  %2812 = vmatpush3.bf16.msra.mxu1 %v2861_v9 }
 0x55f   : > { %1729 = vst [vmem:[%s3578_s15 + $0x70] sm:$0xff] %v1706_v35  ;;  %v1738_v41 = vpack.c.bf16 %v2670_v31, %v1706_v35  ;;  %2805 = vmatprep.subr.bf16.mxu1 %v2862_v56 }
 0x561   : > { %2700 = vmatmul.mubr.bf16.gmra.mrb[44].mxu1 %v1738_v41 }
 0x562   : > { %2813 = vmatpush3.bf16.msra.mxu1 %v2862_v56 }
 0x563   : > { %2806 = vmatprep.subr.bf16.mxu1 %v2863_v40 }
 0x566   : > { %2814 = vmatpush3.bf16.msra.mxu1 %v2863_v40 }
 0x61c   : > { %v2689_v42 = vpop.f32.mrb[32].mxu1 }
 0x61d   : > { %v1853_v37 = vadd.f32 %v2689_v42, %v2347_v29  ;;  %v1844_v60 = vpop.f32.mrb[33].mxu1 }
 0x61e   : > { %v1845_v49 = vadd.f32 %v2347_v29, %v1844_v60  ;;  %v2690_v63 = vpop.f32.mrb[34].mxu1 }
 0x61f   : > { %v1856_v48 = vadd.f32 %v2690_v63, %v2347_v29  ;;  %v1847_v32 = vpop.f32.mrb[35].mxu1  ;;  %v1909_v3 = vmax.f32 %v1853_v37, 0.0 }
 0x620   : > { %v1848_v51 = vadd.f32 %v2347_v29, %v1847_v32  ;;  %v1907_v39 = vmax.f32 %v1845_v49, 0.0 }
 0x621   : > { %v1910_v43 = vmax.f32 %v1856_v48, 0.0 }
 0x622   : > { %v1908_v50 = vmax.f32 %v1848_v51, 0.0 }
 0x623   : > { %v1924_v44 = vpack.c.bf16 %v1910_v43, %v1909_v3 }
 0x624   : > { %v1923_v57 = vpack.c.bf16 %v1908_v50, %v1907_v39  ;;  %v2693_v55 = vpop.f32.mrb[36].mxu1 }
 0x625   : > { %v1869_v59 = vadd.f32 %v2693_v55, %v2347_v29  ;;  %v1860_v62 = vpop.f32.mrb[37].mxu1 }
 0x626   : > { %v1861_v58 = vadd.f32 %v2347_v29, %v1860_v62  ;;  %v2694_v52 = vpop.f32.mrb[38].mxu1  ;;  %2719 = vmatprep.mubr.bf16.mxu0 %v1923_v57 }
 0x627   : > { %v1872_v38 = vadd.f32 %v2694_v52, %v2347_v29  ;;  %v1863_v11 = vpop.f32.mrb[39].mxu1  ;;  %2720 = vmatmul.mubr.bf16.vlgmr.msra.gmra.mrb[32].mxu0 %v1924_v44  ;;  %v1913_v2 = vmax.f32 %v1869_v59, 0.0 }
 0x628   : > { %v1864_v53 = vadd.f32 %v2347_v29, %v1863_v11  ;;  %v1911_v4 = vmax.f32 %v1861_v58, 0.0 }
 0x629   : > { %v1914_v54 = vmax.f32 %v1872_v38, 0.0 }
 0x62a   : > { %v1912_v0 = vmax.f32 %v1864_v53, 0.0 }
 0x62b   : > { %v1926_v5 = vpack.c.bf16 %v1914_v54, %v1913_v2 }
 0x62c   : > { %v1925_v1 = vpack.c.bf16 %v1912_v0, %v1911_v4  ;;  %v2697_v61 = vpop.f32.mrb[40].mxu1 }
 0x62d   : > { %v1885_v19 = vadd.f32 %v2697_v61, %v2347_v29  ;;  %v1876_v12 = vpop.f32.mrb[41].mxu1 }
 0x62e   : > { %v1877_v10 = vadd.f32 %v2347_v29, %v1876_v12  ;;  %v2698_v8 = vpop.f32.mrb[42].mxu1  ;;  %2723 = vmatprep.mubr.bf16.mxu0 %v1925_v1 }
 0x62f   : > { %v1888_v47 = vadd.f32 %v2698_v8, %v2347_v29  ;;  %v1879_v6 = vpop.f32.mrb[43].mxu1  ;;  %2724 = vmatmul.mubr.bf16.gmra.mrb[36].mxu0 %v1926_v5  ;;  %v1917_v9 = vmax.f32 %v1885_v19, 0.0 }
 0x630   : > { %v1880_v13 = vadd.f32 %v2347_v29, %v1879_v6  ;;  %v1915_v27 = vmax.f32 %v1877_v10, 0.0 }
 0x631   : > { %v1918_v7 = vmax.f32 %v1888_v47, 0.0 }
 0x632   : > { %v1916_v18 = vmax.f32 %v1880_v13, 0.0 }
 0x633   : > { %v1928_v15 = vpack.c.bf16 %v1918_v7, %v1917_v9 }
 0x634   : > { %v1927_v14 = vpack.c.bf16 %v1916_v18, %v1915_v27  ;;  %v2701_v23 = vpop.f32.mrb[44].mxu1 }
 0x635   : > { %v1901_v20 = vadd.f32 %v2701_v23, %v2347_v29  ;;  %v1892_v17 = vpop.f32.mrb[45].mxu1 }
 0x636   : > { %v1893_v16 = vadd.f32 %v2347_v29, %v1892_v17  ;;  %v2702_v36 = vpop.f32.mrb[46].mxu1  ;;  %2727 = vmatprep.mubr.bf16.mxu1 %v1927_v14 }
 0x637   : > { %v1904_v26 = vadd.f32 %v2702_v36, %v2347_v29  ;;  %v1895_v22 = vpop.f32.mrb[47].mxu1  ;;  %2728 = vmatmul.mubr.bf16.vlgmr.msra.gmra.mrb[48].mxu1 %v1928_v15  ;;  %v1921_v24 = vmax.f32 %v1901_v20, 0.0 }
 0x638   : > { %v1896_v34 = vadd.f32 %v2347_v29, %v1895_v22  ;;  %v1919_v21 = vmax.f32 %v1893_v16, 0.0 }
 0x639   : > { %v1922_v25 = vmax.f32 %v1904_v26, 0.0 }
 0x63a   : > { %v1920_v46 = vmax.f32 %v1896_v34, 0.0 }
 0x63b   : > { %v1930_v28 = vpack.c.bf16 %v1922_v25, %v1921_v24 }
 0x63c   : > { %v1929_v33 = vpack.c.bf16 %v1920_v46, %v1919_v21 }
 0x63e   : > { %2731 = vmatprep.mubr.bf16.mxu1 %v1929_v33 }
 0x63f   : > { %2732 = vmatmul.mubr.bf16.gmra.mrb[52].mxu1 %v1930_v28 }
 0x6fa   : > { %v2721_v45 = vpop.f32.mrb[32].mxu0 }
 0x6fb   : > { %v2045_v31 = vadd.f32 %v2721_v45, %v2356_v30  ;;  %v2036_v35 = vpop.f32.mrb[33].mxu0 }
 0x6fc   : > { %v2037_v41 = vadd.f32 %v2356_v30, %v2036_v35  ;;  %v2722_v56 = vpop.f32.mrb[34].mxu0 }
 0x6fd   : > { %2101 = vst [vmem:[%s3612_s27 + $0x10] sm:$0xff] %v2045_v31  ;;  %v2048_v40 = vadd.f32 %v2722_v56, %v2356_v30  ;;  %v2039_v29 = vpop.f32.mrb[35].mxu0 }
 0x6fe   : > { %2099 = vst [vmem:[%s3612_s27] sm:$0xff] %v2037_v41  ;;  %v2040_v42 = vadd.f32 %v2356_v30, %v2039_v29 }
 0x6ff   : > { %2102 = vst [vmem:[%s3612_s27 + $0x18] sm:$0xff] %v2048_v40 }
 0x700   : > { %2100 = vst [vmem:[%s3612_s27 + $0x8] sm:$0xff] %v2040_v42 }
 0x702   : > { %v2725_v37 = vpop.f32.mrb[36].mxu0 }
 0x703   : > { %v2061_v60 = vadd.f32 %v2725_v37, %v2356_v30  ;;  %v2052_v49 = vpop.f32.mrb[37].mxu0 }
 0x704   : > { %v2053_v63 = vadd.f32 %v2356_v30, %v2052_v49  ;;  %v2726_v48 = vpop.f32.mrb[38].mxu0 }
 0x705   : > { %2105 = vst [vmem:[%s3612_s27 + $0x30] sm:$0xff] %v2061_v60  ;;  %v2064_v32 = vadd.f32 %v2726_v48, %v2356_v30  ;;  %v2055_v51 = vpop.f32.mrb[39].mxu0 }
 0x706   : > { %2103 = vst [vmem:[%s3612_s27 + $0x20] sm:$0xff] %v2053_v63  ;;  %v2056_v3 = vadd.f32 %v2356_v30, %v2055_v51 }
 0x707   : > { %2106 = vst [vmem:[%s3612_s27 + $0x38] sm:$0xff] %v2064_v32 }
 0x708   : > { %2104 = vst [vmem:[%s3612_s27 + $0x28] sm:$0xff] %v2056_v3 }
 0x70a   : > { %v2729_v43 = vpop.f32.mrb[48].mxu1 }
 0x70b   : > { %v2077_v39 = vadd.f32 %v2729_v43, %v2356_v30  ;;  %v2068_v50 = vpop.f32.mrb[49].mxu1 }
 0x70c   : > { %v2069_v44 = vadd.f32 %v2356_v30, %v2068_v50  ;;  %v2730_v57 = vpop.f32.mrb[50].mxu1 }
 0x70d   : > { %2109 = vst [vmem:[%s3612_s27 + $0x50] sm:$0xff] %v2077_v39  ;;  %v2080_v55 = vadd.f32 %v2730_v57, %v2356_v30  ;;  %v2071_v59 = vpop.f32.mrb[51].mxu1 }
 0x70e   : > { %2107 = vst [vmem:[%s3612_s27 + $0x40] sm:$0xff] %v2069_v44  ;;  %v2072_v62 = vadd.f32 %v2356_v30, %v2071_v59 }
 0x70f   : > { %2110 = vst [vmem:[%s3612_s27 + $0x58] sm:$0xff] %v2080_v55 }
 0x710   : > { %2108 = vst [vmem:[%s3612_s27 + $0x48] sm:$0xff] %v2072_v62 }
 0x712   : > { %v2733_v58 = vpop.f32.mrb[52].mxu1 }
 0x713   : > { %v2093_v52 = vadd.f32 %v2733_v58, %v2356_v30  ;;  %v2084_v38 = vpop.f32.mrb[53].mxu1 }
 0x714   : > { %v2085_v11 = vadd.f32 %v2356_v30, %v2084_v38  ;;  %v2734_v53 = vpop.f32.mrb[54].mxu1 }
 0x715   : > { %2113 = vst [vmem:[%s3612_s27 + $0x70] sm:$0xff] %v2093_v52  ;;  %v2096_v2 = vadd.f32 %v2734_v53, %v2356_v30  ;;  %v2087_v54 = vpop.f32.mrb[55].mxu1 }
 0x716   : > { %2111 = vst [vmem:[%s3612_s27 + $0x60] sm:$0xff] %v2085_v11  ;;  %v2088_v4 = vadd.f32 %v2356_v30, %v2087_v54 }
 0x717   : > { %2114 = vst [vmem:[%s3612_s27 + $0x78] sm:$0xff] %v2096_v2 }
 0x718   : > { %2112 = vst [vmem:[%s3612_s27 + $0x68] sm:$0xff] %v2088_v4 }
 0x719 PF: > { %s25_s29 = sadd.s32 1, %s2870_s29  }
 0x71a   : > { %p22_p4 = scmp.ge.s32.totalorder %s25_s29, 4  }
 0x71c   :  { %24 = sbr.rel (!%p22_p4) target bundleno = 1 (0x1), region = 130 }

</bundles_post_ra>
